<compile_context>
chip_gen: v7x
topology: tpu7x:2x2x1
jax: 0.10.0
libtpu: 0.0.40
codegen_flags: <defaults>
</compile_context>

<pallas_src>
import functools

import jax
import jax.numpy as jnp
from jax import lax
from jax.experimental import pallas as pl
from jax.experimental.pallas import tpu as pltpu


# Matmul operands in bf16 (MXU-native, halves adjacency bytes) with f32
# accumulation; all elementwise gating/softmax math stays in f32.
USE_BF16_MATMUL = True


def _vmem_limit_bytes():
    """Physical VMEM minus headroom (never below 32 MiB)."""
    cap = 128 * 1024 * 1024
    try:
        cap = int(pltpu.get_tpu_info().vmem_capacity_bytes)
    except Exception:  # pragma: no cover - info query unavailable
        pass
    return max(32 * 1024 * 1024, cap - 16 * 1024 * 1024)


# ----------------------------------------------------------------------------
# Fused forward kernel
# ----------------------------------------------------------------------------
def _graph_gac_kernel(
    # data
    x_ref, a_ref, adj_ref,
    # fused first-layer weight [We1 | Wa0]
    wx_ref,
    # LHS-shared fused weights for h1/h2/h3 and z
    wh1_ref, wh2_ref, wh3_ref, wz_ref,
    # remaining decoder weights
    wd2_ref, wd3_ref, wd4_ref,
    # AGCN layers 1..3
    wa1_ref, wa2_ref, wa3_ref,
    # LHS-shared fused weights for z1..z4 (gate | u-gate | scale-fusion)
    wz1_ref, wz2_ref, wz3_ref, wz4_ref,
    # gate biases
    bm1_ref, bm2_ref, bm3_ref, bl_ref,
    # cluster centers, transposed: (n_z, n_clusters), f32
    mu_t_ref,
    # outputs
    xbar_ref, q_ref, pred_ref, z_ref,
    *, n1, n2, n3, nz, v, use_bf16):

    act_dt = jnp.bfloat16 if use_bf16 else jnp.float32

    def dot(a, b):
        if use_bf16:
            if a.dtype != jnp.bfloat16:
                a = a.astype(jnp.bfloat16)
            if b.dtype != jnp.bfloat16:
                b = b.astype(jnp.bfloat16)
        return jnp.dot(a, b, preferred_element_type=jnp.float32)

    def softmax_rows(y, exact):
        y = y - jnp.max(y, axis=1, keepdims=True)
        e = jnp.exp(y)
        s = jnp.sum(e, axis=1, keepdims=True)
        return e / s if exact else e * pl.reciprocal(s, approx=True)

    def gate(y, b_ref):
        # MLP_* gate: F.normalize(softmax(leaky_relu(xW + b), dim=1), p=2).
        # No eps clamp needed: softmax rows sum to 1 => sum(s^2) >= 1/width.
        # Do NOT reuse this helper where the input can be all-zero.
        y = y + b_ref[...]
        y = jnp.where(y > 0.0, y, 0.01 * y)            # leaky_relu, slope 0.01
        s = softmax_rows(y, exact=False)
        return s * lax.rsqrt(jnp.sum(s * s, axis=1, keepdims=True))

    x = x_ref[...]                                     # f32
    a = a_ref[...]                                     # bf16 (cast in wrapper)
    adj = adj_ref[...]                                 # bf16 (cast in wrapper)

    # --- shared first-layer x-side matmul of both branches (wider MXU) -------
    sup = dot(x, wx_ref[...]).astype(act_dt)           # (N, 2*n1)
    h1 = jnp.maximum(dot(a, sup[:, :n1]), 0.0).astype(act_dt)
    z1 = jnp.maximum(dot(adj, sup[:, n1:]), 0.0).astype(act_dt)

    # --- GAE encoder: fused h_i @ [W_enc | W_gate] dots -----------------------
    t1 = dot(h1, wh1_ref[...])                         # (N, n2 + 2)
    h2 = jnp.maximum(dot(a, t1[:, :n2]), 0.0).astype(act_dt)
    gm1_h = t1[:, n2:]

    t2 = dot(h2, wh2_ref[...])                         # (N, n3 + 2)
    h3 = jnp.maximum(dot(a, t2[:, :n3]), 0.0).astype(act_dt)
    gm2_h = t2[:, n3:]

    t3 = dot(h3, wh3_ref[...])                         # (N, nz + 2)
    z = dot(a, t3[:, :nz])                             # f32 (output + Student-t)
    gm3_h = t3[:, nz:]

    # --- z fused dot: decoder support | u-gate part | scale-fusion part ------
    tz = dot(z, wz_ref[...])                           # (N, n3 + 5 + K)
    dec1 = jnp.maximum(dot(a, tz[:, :n3]), 0.0).astype(act_dt)
    gl_z = tz[:, n3:n3 + 5]
    az_z = tz[:, n3 + 5:]

    dec2 = jnp.maximum(dot(a, dot(dec1, wd2_ref[...])), 0.0).astype(act_dt)
    dec3 = jnp.maximum(dot(a, dot(dec2, wd3_ref[...])), 0.0).astype(act_dt)
    xbar_ref[...] = dot(a, dot(dec3, wd4_ref[...]))

    # --- AGCN branch with attention gates (concat folded into split weights) -
    tz1 = dot(z1, wz1_ref[...])                        # (N, 2 + 5 + K)
    gm1_z, gl_z1, az_z1 = tz1[:, :2], tz1[:, 2:7], tz1[:, 7:]

    m1 = gate(gm1_h + gm1_z, bm1_ref)
    z2 = jnp.maximum(
        dot(adj, dot(m1[:, 0:1] * z1 + m1[:, 1:2] * h1, wa1_ref[...])),
        0.0).astype(act_dt)
    tz2 = dot(z2, wz2_ref[...])
    gm2_z, gl_z2, az_z2 = tz2[:, :2], tz2[:, 2:7], tz2[:, 7:]

    m2 = gate(gm2_h + gm2_z, bm2_ref)
    z3 = jnp.maximum(
        dot(adj, dot(m2[:, 0:1] * z2 + m2[:, 1:2] * h2, wa2_ref[...])),
        0.0).astype(act_dt)
    tz3 = dot(z3, wz3_ref[...])
    gm3_z, gl_z3, az_z3 = tz3[:, :2], tz3[:, 2:7], tz3[:, 7:]

    m3 = gate(gm3_h + gm3_z, bm3_ref)
    z4 = jnp.maximum(
        dot(adj, dot(m3[:, 0:1] * z3 + m3[:, 1:2] * h3, wa3_ref[...])),
        0.0).astype(act_dt)
    tz4 = dot(z4, wz4_ref[...])                        # (N, 5 + K)
    gl_z4, az_z4 = tz4[:, :5], tz4[:, 5:]

    # --- scale-wise fusion: u-scaling applied AFTER the small Waz dots -------
    u = gate(gl_z1 + gl_z2 + gl_z3 + gl_z4 + gl_z, bl_ref)
    support = (u[:, 0:1] * az_z1 + u[:, 1:2] * az_z2 + u[:, 2:3] * az_z3
               + u[:, 3:4] * az_z4 + u[:, 4:5] * az_z)
    pred_ref[...] = softmax_rows(dot(adj, support), exact=True)

    # --- Student-t soft assignments: one f32 MXU distance computation --------
    mu_t = mu_t_ref[...]                               # f32 (n_z, K)
    z2sum = jnp.sum(z * z, axis=1, keepdims=True)      # (N, 1)
    mu2sum = jnp.sum(mu_t * mu_t, axis=0, keepdims=True)   # (1, K)
    d2 = z2sum + mu2sum - 2.0 * jnp.dot(z, mu_t, preferred_element_type=jnp.float32)
    d2 = jnp.maximum(d2, 0.0)                          # guard tiny cancellation
    qv = 1.0 / (1.0 + d2 * (1.0 / v))
    exponent = (v + 1.0) / 2.0
    if exponent != 1.0:                                # v == 1 -> pow is a no-op
        qv = qv ** exponent
    q_ref[...] = qv / jnp.sum(qv, axis=1, keepdims=True)   # exact normalization
    z_ref[...] = z


# ----------------------------------------------------------------------------
# Parameters (deterministic xavier-normal init, PyTorch-equivalent layout)
# ----------------------------------------------------------------------------
def xavier_normal(key, shape):
    fan_in, fan_out = shape[0], shape[1]
    std = jnp.sqrt(2.0 / (fan_in + fan_out))
    return std * jax.random.normal(key, shape, dtype=jnp.float32)


def init_params(key, n_input, n_enc_1, n_enc_2, n_enc_3, n_z, n_clusters):
    ks = jax.random.split(key, 20)
    fused = n_enc_1 + n_enc_2 + n_enc_3 + 2 * n_z      # 256 for default sizes
    p = {}
    # GAE encoder / decoder (GCN auto-encoder)
    p["We1"] = xavier_normal(ks[0], (n_input, n_enc_1))
    p["We2"] = xavier_normal(ks[1], (n_enc_1, n_enc_2))
    p["We3"] = xavier_normal(ks[2], (n_enc_2, n_enc_3))
    p["Wez"] = xavier_normal(ks[3], (n_enc_3, n_z))
    p["Wd1"] = xavier_normal(ks[4], (n_z, n_enc_3))
    p["Wd2"] = xavier_normal(ks[5], (n_enc_3, n_enc_2))
    p["Wd3"] = xavier_normal(ks[6], (n_enc_2, n_enc_1))
    p["Wd4"] = xavier_normal(ks[7], (n_enc_1, n_input))
    # AGCN branch
    p["Wa0"] = xavier_normal(ks[8], (n_input, n_enc_1))
    p["Wa1"] = xavier_normal(ks[9], (n_enc_1, n_enc_2))
    p["Wa2"] = xavier_normal(ks[10], (n_enc_2, n_enc_3))
    p["Wa3"] = xavier_normal(ks[11], (n_enc_3, n_z))
    p["Waz"] = xavier_normal(ks[12], (fused, n_clusters))
    # MLP gates (stored transposed: (in, out)); biases as (1, out)
    p["Wm1"] = xavier_normal(ks[13], (2 * n_enc_1, 2))
    p["bm1"] = jnp.zeros((1, 2), jnp.float32)
    p["Wm2"] = xavier_normal(ks[14], (2 * n_enc_2, 2))
    p["bm2"] = jnp.zeros((1, 2), jnp.float32)
    p["Wm3"] = xavier_normal(ks[15], (2 * n_enc_3, 2))
    p["bm3"] = jnp.zeros((1, 2), jnp.float32)
    p["WmL"] = xavier_normal(ks[16], (fused, 5))
    p["bmL"] = jnp.zeros((1, 5), jnp.float32)
    # cluster layer
    p["cluster"] = xavier_normal(ks[17], (n_clusters, n_z))
    return p


def prepare_kernel_params(p, use_bf16=USE_BF16_MATMUL):
    """One-time weight re-layout: LHS-shared concats + split concat-weights."""
    n1 = p["We1"].shape[1]
    n2 = p["We2"].shape[1]
    n3 = p["We3"].shape[1]
    nz = p["Wez"].shape[1]
    o1, o2, o3, o4 = n1, n1 + n2, n1 + n2 + n3, n1 + n2 + n3 + nz
    w_dt = jnp.bfloat16 if use_bf16 else jnp.float32

    def cat(*xs):
        return jnp.concatenate(xs, axis=1).astype(w_dt)

    # gate weights: cat(h, z) @ W == h @ W[:d] + z @ W[d:]
    Wm1h, Wm1z = p["Wm1"][:n1], p["Wm1"][n1:]
    Wm2h, Wm2z = p["Wm2"][:n2], p["Wm2"][n2:]
    Wm3h, Wm3z = p["Wm3"][:n3], p["Wm3"][n3:]
    # scale-fusion weights split per (z1, z2, z3, z4, z) block
    Wl1, Wl2, Wl3, Wl4, Wl5 = (p["WmL"][:o1], p["WmL"][o1:o2], p["WmL"][o2:o3],
                               p["WmL"][o3:o4], p["WmL"][o4:])
    Waz1, Waz2, Waz3, Waz4, Waz5 = (p["Waz"][:o1], p["Waz"][o1:o2],
                                    p["Waz"][o2:o3], p["Waz"][o3:o4],
                                    p["Waz"][o4:])
    kp = {
        "Wx":  cat(p["We1"], p["Wa0"]),            # shared x-side matmul
        "Wh1": cat(p["We2"], Wm1h),                # h1 @ [We2 | Wm1h]
        "Wh2": cat(p["We3"], Wm2h),                # h2 @ [We3 | Wm2h]
        "Wh3": cat(p["Wez"], Wm3h),                # h3 @ [Wez | Wm3h]
        "Wz":  cat(p["Wd1"], Wl5, Waz5),           # z  @ [Wd1 | Wl5 | Waz5]
        "Wd2": p["Wd2"].astype(w_dt),
        "Wd3": p["Wd3"].astype(w_dt),
        "Wd4": p["Wd4"].astype(w_dt),
        "Wa1": p["Wa1"].astype(w_dt),
        "Wa2": p["Wa2"].astype(w_dt),
        "Wa3": p["Wa3"].astype(w_dt),
        "Wz1": cat(Wm1z, Wl1, Waz1),               # z1 @ [Wm1z | Wl1 | Waz1]
        "Wz2": cat(Wm2z, Wl2, Waz2),
        "Wz3": cat(Wm3z, Wl3, Waz3),
        "Wz4": cat(Wl4, Waz4),                     # z4 @ [Wl4 | Waz4]
        "bm1": p["bm1"], "bm2": p["bm2"], "bm3": p["bm3"], "bmL": p["bmL"],
        "muT": jnp.transpose(p["cluster"]),        # (n_z, K), f32
    }
    return kp


# ----------------------------------------------------------------------------
# Wrapper: one pallas_call for the whole forward
# ----------------------------------------------------------------------------
def graph_gac_forward(kp, x, A, adj, v=1.0, use_bf16=USE_BF16_MATMUL):
    N, n_input = x.shape
    n1 = kp["Wx"].shape[1] // 2
    n2 = kp["Wh1"].shape[1] - 2
    n3 = kp["Wh2"].shape[1] - 2
    nz = kp["Wh3"].shape[1] - 2
    n_clusters = kp["muT"].shape[1]

    adj_dt = jnp.bfloat16 if use_bf16 else jnp.float32
    inputs = [
        x, A.astype(adj_dt), adj.astype(adj_dt),
        kp["Wx"], kp["Wh1"], kp["Wh2"], kp["Wh3"], kp["Wz"],
        kp["Wd2"], kp["Wd3"], kp["Wd4"],
        kp["Wa1"], kp["Wa2"], kp["Wa3"],
        kp["Wz1"], kp["Wz2"], kp["Wz3"], kp["Wz4"],
        kp["bm1"], kp["bm2"], kp["bm3"], kp["bmL"],
        kp["muT"],
    ]
    vmem = pl.BlockSpec(memory_space=pltpu.MemorySpace.VMEM)
    kernel = functools.partial(
        _graph_gac_kernel, n1=n1, n2=n2, n3=n3, nz=nz,
        v=float(v), use_bf16=use_bf16)
    out_shape = (
        jax.ShapeDtypeStruct((N, n_input), jnp.float32),      # x_bar
        jax.ShapeDtypeStruct((N, n_clusters), jnp.float32),   # q
        jax.ShapeDtypeStruct((N, n_clusters), jnp.float32),   # predict
        jax.ShapeDtypeStruct((N, nz), jnp.float32),           # z
    )
    return pl.pallas_call(
        kernel,
        in_specs=[vmem] * len(inputs),
        out_specs=tuple(vmem for _ in out_shape),
        out_shape=out_shape,
        compiler_params=pltpu.CompilerParams(
            vmem_limit_bytes=_vmem_limit_bytes()),
    )(*inputs)


# ----------------------------------------------------------------------------
def _make_norm_adj(key, n):
    a = (jax.random.uniform(key, (n, n), dtype=jnp.float32) > 0.8).astype(jnp.float32)
    a = jnp.maximum(a, a.T) + jnp.eye(n, dtype=jnp.float32)
    return a / jnp.sum(a, axis=1, keepdims=True)               # row-normalized adjacency


if __name__ == "__main__":
    # small, but consistent with the hard-coded broadcasts in the forward pass
    N, n_input = 64, 32
    n_enc_1, n_enc_2, n_enc_3, n_z, n_clusters = 128, 64, 32, 16, 8

    key = jax.random.PRNGKey(0)
    k_x, k_A, k_adj, k_p = jax.random.split(key, 4)
    x = jax.random.normal(k_x, (N, n_input), dtype=jnp.float32)
    A = _make_norm_adj(k_A, N)
    adj = _make_norm_adj(k_adj, N)

    params = init_params(k_p, n_input, n_enc_1, n_enc_2, n_enc_3, n_z, n_clusters)
    kparams = prepare_kernel_params(params)

    x_bar, q, predict, z = graph_gac_forward(kparams, x, A, adj, v=1.0)
    jax.block_until_ready((x_bar, q, predict, z))

    assert x_bar.shape == (N, n_input)
    assert q.shape == (N, n_clusters)
    assert predict.shape == (N, n_clusters)
    assert z.shape == (N, n_z)
    assert bool(jnp.all(jnp.isfinite(x_bar)))
    assert bool(jnp.all(jnp.isfinite(q)))
    assert bool(jnp.all(jnp.isfinite(predict)))
    assert bool(jnp.all(jnp.isfinite(z)))
    # exact final normalizations -> probability rows must sum to 1
    assert bool(jnp.allclose(jnp.sum(q, axis=1), 1.0, atol=1e-4))
    assert bool(jnp.allclose(jnp.sum(predict, axis=1), 1.0, atol=1e-4))
    print("KERNEL_OK")
</pallas_src>

<mosaic_0001>
module attributes {stable_mosaic.version = 11 : i64} {
  func.func @_graph_gac_kernel(%arg0: memref<64x32xf32, #tpu.memory_space<vmem>>, %arg1: memref<64x64xbf16, #tpu.memory_space<vmem>>, %arg2: memref<64x64xbf16, #tpu.memory_space<vmem>>, %arg3: memref<32x256xbf16, #tpu.memory_space<vmem>>, %arg4: memref<128x66xbf16, #tpu.memory_space<vmem>>, %arg5: memref<64x34xbf16, #tpu.memory_space<vmem>>, %arg6: memref<32x18xbf16, #tpu.memory_space<vmem>>, %arg7: memref<16x45xbf16, #tpu.memory_space<vmem>>, %arg8: memref<32x64xbf16, #tpu.memory_space<vmem>>, %arg9: memref<64x128xbf16, #tpu.memory_space<vmem>>, %arg10: memref<128x32xbf16, #tpu.memory_space<vmem>>, %arg11: memref<128x64xbf16, #tpu.memory_space<vmem>>, %arg12: memref<64x32xbf16, #tpu.memory_space<vmem>>, %arg13: memref<32x16xbf16, #tpu.memory_space<vmem>>, %arg14: memref<128x15xbf16, #tpu.memory_space<vmem>>, %arg15: memref<64x15xbf16, #tpu.memory_space<vmem>>, %arg16: memref<32x15xbf16, #tpu.memory_space<vmem>>, %arg17: memref<16x13xbf16, #tpu.memory_space<vmem>>, %arg18: memref<1x2xf32, #tpu.memory_space<vmem>>, %arg19: memref<1x2xf32, #tpu.memory_space<vmem>>, %arg20: memref<1x2xf32, #tpu.memory_space<vmem>>, %arg21: memref<1x5xf32, #tpu.memory_space<vmem>>, %arg22: memref<16x8xf32, #tpu.memory_space<vmem>>, %arg23: memref<64x32xf32, #tpu.memory_space<vmem>>, %arg24: memref<64x8xf32, #tpu.memory_space<vmem>>, %arg25: memref<64x8xf32, #tpu.memory_space<vmem>>, %arg26: memref<64x16xf32, #tpu.memory_space<vmem>>) attributes {dimension_semantics = [], scalar_prefetch = 0 : i64, scratch_operands = 0 : i64, tpu.core_type = #tpu.core_type<tc>} {
    %c0 = arith.constant 0 : index
    %c0_0 = arith.constant 0 : index
    %0 = vector.load %arg0[%c0, %c0_0] : memref<64x32xf32, #tpu.memory_space<vmem>>, vector<64x32xf32>
    %c0_1 = arith.constant 0 : index
    %c0_2 = arith.constant 0 : index
    %1 = vector.load %arg1[%c0_1, %c0_2] : memref<64x64xbf16, #tpu.memory_space<vmem>>, vector<64x64xbf16>
    %c0_3 = arith.constant 0 : index
    %c0_4 = arith.constant 0 : index
    %2 = vector.load %arg2[%c0_3, %c0_4] : memref<64x64xbf16, #tpu.memory_space<vmem>>, vector<64x64xbf16>
    %c0_5 = arith.constant 0 : index
    %c0_6 = arith.constant 0 : index
    %3 = vector.load %arg3[%c0_5, %c0_6] : memref<32x256xbf16, #tpu.memory_space<vmem>>, vector<32x256xbf16>
    %4 = arith.truncf %0 : vector<64x32xf32> to vector<64x32xbf16>
    %cst = arith.constant dense<0.000000e+00> : vector<64x256xf32>
    %5 = tpu.matmul %4, %3, %cst {dimension_numbers = #tpu.dot_dimension_numbers<[1], [0], [0], [1], [0, 0, 1, 1], [], []>} : vector<64x32xbf16>, vector<32x256xbf16>, vector<64x256xf32> -> vector<64x256xf32>
    %6 = arith.truncf %5 : vector<64x256xf32> to vector<64x256xbf16>
    %7 = vector.extract_strided_slice %6 {offsets = [0, 0], sizes = [64, 128], strides = [1, 1]} : vector<64x256xbf16> to vector<64x128xbf16>
    %cst_7 = arith.constant dense<0.000000e+00> : vector<64x128xf32>
    %8 = tpu.matmul %1, %7, %cst_7 {dimension_numbers = #tpu.dot_dimension_numbers<[1], [0], [0], [1], [0, 0, 1, 1], [], []>} : vector<64x64xbf16>, vector<64x128xbf16>, vector<64x128xf32> -> vector<64x128xf32>
    %cst_8 = arith.constant 0.000000e+00 : f32
    %9 = vector.broadcast %cst_8 : f32 to vector<64x128xf32>
    %10 = arith.maximumf %8, %9 : vector<64x128xf32>
    %11 = arith.truncf %10 : vector<64x128xf32> to vector<64x128xbf16>
    %12 = vector.extract_strided_slice %6 {offsets = [0, 128], sizes = [64, 128], strides = [1, 1]} : vector<64x256xbf16> to vector<64x128xbf16>
    %cst_9 = arith.constant dense<0.000000e+00> : vector<64x128xf32>
    %13 = tpu.matmul %2, %12, %cst_9 {dimension_numbers = #tpu.dot_dimension_numbers<[1], [0], [0], [1], [0, 0, 1, 1], [], []>} : vector<64x64xbf16>, vector<64x128xbf16>, vector<64x128xf32> -> vector<64x128xf32>
    %cst_10 = arith.constant 0.000000e+00 : f32
    %14 = vector.broadcast %cst_10 : f32 to vector<64x128xf32>
    %15 = arith.maximumf %13, %14 : vector<64x128xf32>
    %16 = arith.truncf %15 : vector<64x128xf32> to vector<64x128xbf16>
    %c0_11 = arith.constant 0 : index
    %c0_12 = arith.constant 0 : index
    %17 = vector.load %arg4[%c0_11, %c0_12] : memref<128x66xbf16, #tpu.memory_space<vmem>>, vector<128x66xbf16>
    %cst_13 = arith.constant dense<0.000000e+00> : vector<64x66xf32>
    %18 = tpu.matmul %11, %17, %cst_13 {dimension_numbers = #tpu.dot_dimension_numbers<[1], [0], [0], [1], [0, 0, 1, 1], [], []>} : vector<64x128xbf16>, vector<128x66xbf16>, vector<64x66xf32> -> vector<64x66xf32>
    %19 = vector.extract_strided_slice %18 {offsets = [0, 0], sizes = [64, 64], strides = [1, 1]} : vector<64x66xf32> to vector<64x64xf32>
    %20 = arith.truncf %19 : vector<64x64xf32> to vector<64x64xbf16>
    %cst_14 = arith.constant dense<0.000000e+00> : vector<64x64xf32>
    %21 = tpu.matmul %1, %20, %cst_14 {dimension_numbers = #tpu.dot_dimension_numbers<[1], [0], [0], [1], [0, 0, 1, 1], [], []>} : vector<64x64xbf16>, vector<64x64xbf16>, vector<64x64xf32> -> vector<64x64xf32>
    %cst_15 = arith.constant 0.000000e+00 : f32
    %22 = vector.broadcast %cst_15 : f32 to vector<64x64xf32>
    %23 = arith.maximumf %21, %22 : vector<64x64xf32>
    %24 = arith.truncf %23 : vector<64x64xf32> to vector<64x64xbf16>
    %25 = vector.extract_strided_slice %18 {offsets = [0, 64], sizes = [64, 2], strides = [1, 1]} : vector<64x66xf32> to vector<64x2xf32>
    %c0_16 = arith.constant 0 : index
    %c0_17 = arith.constant 0 : index
    %26 = vector.load %arg5[%c0_16, %c0_17] : memref<64x34xbf16, #tpu.memory_space<vmem>>, vector<64x34xbf16>
    %cst_18 = arith.constant dense<0.000000e+00> : vector<64x34xf32>
    %27 = tpu.matmul %24, %26, %cst_18 {dimension_numbers = #tpu.dot_dimension_numbers<[1], [0], [0], [1], [0, 0, 1, 1], [], []>} : vector<64x64xbf16>, vector<64x34xbf16>, vector<64x34xf32> -> vector<64x34xf32>
    %28 = vector.extract_strided_slice %27 {offsets = [0, 0], sizes = [64, 32], strides = [1, 1]} : vector<64x34xf32> to vector<64x32xf32>
    %29 = arith.truncf %28 : vector<64x32xf32> to vector<64x32xbf16>
    %cst_19 = arith.constant dense<0.000000e+00> : vector<64x32xf32>
    %30 = tpu.matmul %1, %29, %cst_19 {dimension_numbers = #tpu.dot_dimension_numbers<[1], [0], [0], [1], [0, 0, 1, 1], [], []>} : vector<64x64xbf16>, vector<64x32xbf16>, vector<64x32xf32> -> vector<64x32xf32>
    %cst_20 = arith.constant 0.000000e+00 : f32
    %31 = vector.broadcast %cst_20 : f32 to vector<64x32xf32>
    %32 = arith.maximumf %30, %31 : vector<64x32xf32>
    %33 = arith.truncf %32 : vector<64x32xf32> to vector<64x32xbf16>
    %34 = vector.extract_strided_slice %27 {offsets = [0, 32], sizes = [64, 2], strides = [1, 1]} : vector<64x34xf32> to vector<64x2xf32>
    %c0_21 = arith.constant 0 : index
    %c0_22 = arith.constant 0 : index
    %35 = vector.load %arg6[%c0_21, %c0_22] : memref<32x18xbf16, #tpu.memory_space<vmem>>, vector<32x18xbf16>
    %cst_23 = arith.constant dense<0.000000e+00> : vector<64x18xf32>
    %36 = tpu.matmul %33, %35, %cst_23 {dimension_numbers = #tpu.dot_dimension_numbers<[1], [0], [0], [1], [0, 0, 1, 1], [], []>} : vector<64x32xbf16>, vector<32x18xbf16>, vector<64x18xf32> -> vector<64x18xf32>
    %37 = vector.extract_strided_slice %36 {offsets = [0, 0], sizes = [64, 16], strides = [1, 1]} : vector<64x18xf32> to vector<64x16xf32>
    %38 = arith.truncf %37 : vector<64x16xf32> to vector<64x16xbf16>
    %cst_24 = arith.constant dense<0.000000e+00> : vector<64x16xf32>
    %39 = tpu.matmul %1, %38, %cst_24 {dimension_numbers = #tpu.dot_dimension_numbers<[1], [0], [0], [1], [0, 0, 1, 1], [], []>} : vector<64x64xbf16>, vector<64x16xbf16>, vector<64x16xf32> -> vector<64x16xf32>
    %40 = vector.extract_strided_slice %36 {offsets = [0, 16], sizes = [64, 2], strides = [1, 1]} : vector<64x18xf32> to vector<64x2xf32>
    %c0_25 = arith.constant 0 : index
    %c0_26 = arith.constant 0 : index
    %41 = vector.load %arg7[%c0_25, %c0_26] : memref<16x45xbf16, #tpu.memory_space<vmem>>, vector<16x45xbf16>
    %42 = arith.truncf %39 : vector<64x16xf32> to vector<64x16xbf16>
    %cst_27 = arith.constant dense<0.000000e+00> : vector<64x45xf32>
    %43 = tpu.matmul %42, %41, %cst_27 {dimension_numbers = #tpu.dot_dimension_numbers<[1], [0], [0], [1], [0, 0, 1, 1], [], []>} : vector<64x16xbf16>, vector<16x45xbf16>, vector<64x45xf32> -> vector<64x45xf32>
    %44 = vector.extract_strided_slice %43 {offsets = [0, 0], sizes = [64, 32], strides = [1, 1]} : vector<64x45xf32> to vector<64x32xf32>
    %45 = arith.truncf %44 : vector<64x32xf32> to vector<64x32xbf16>
    %cst_28 = arith.constant dense<0.000000e+00> : vector<64x32xf32>
    %46 = tpu.matmul %1, %45, %cst_28 {dimension_numbers = #tpu.dot_dimension_numbers<[1], [0], [0], [1], [0, 0, 1, 1], [], []>} : vector<64x64xbf16>, vector<64x32xbf16>, vector<64x32xf32> -> vector<64x32xf32>
    %cst_29 = arith.constant 0.000000e+00 : f32
    %47 = vector.broadcast %cst_29 : f32 to vector<64x32xf32>
    %48 = arith.maximumf %46, %47 : vector<64x32xf32>
    %49 = arith.truncf %48 : vector<64x32xf32> to vector<64x32xbf16>
    %50 = vector.extract_strided_slice %43 {offsets = [0, 32], sizes = [64, 5], strides = [1, 1]} : vector<64x45xf32> to vector<64x5xf32>
    %51 = vector.extract_strided_slice %43 {offsets = [0, 37], sizes = [64, 8], strides = [1, 1]} : vector<64x45xf32> to vector<64x8xf32>
    %c0_30 = arith.constant 0 : index
    %c0_31 = arith.constant 0 : index
    %52 = vector.load %arg8[%c0_30, %c0_31] : memref<32x64xbf16, #tpu.memory_space<vmem>>, vector<32x64xbf16>
    %cst_32 = arith.constant dense<0.000000e+00> : vector<64x64xf32>
    %53 = tpu.matmul %49, %52, %cst_32 {dimension_numbers = #tpu.dot_dimension_numbers<[1], [0], [0], [1], [0, 0, 1, 1], [], []>} : vector<64x32xbf16>, vector<32x64xbf16>, vector<64x64xf32> -> vector<64x64xf32>
    %54 = arith.truncf %53 : vector<64x64xf32> to vector<64x64xbf16>
    %cst_33 = arith.constant dense<0.000000e+00> : vector<64x64xf32>
    %55 = tpu.matmul %1, %54, %cst_33 {dimension_numbers = #tpu.dot_dimension_numbers<[1], [0], [0], [1], [0, 0, 1, 1], [], []>} : vector<64x64xbf16>, vector<64x64xbf16>, vector<64x64xf32> -> vector<64x64xf32>
    %cst_34 = arith.constant 0.000000e+00 : f32
    %56 = vector.broadcast %cst_34 : f32 to vector<64x64xf32>
    %57 = arith.maximumf %55, %56 : vector<64x64xf32>
    %58 = arith.truncf %57 : vector<64x64xf32> to vector<64x64xbf16>
    %c0_35 = arith.constant 0 : index
    %c0_36 = arith.constant 0 : index
    %59 = vector.load %arg9[%c0_35, %c0_36] : memref<64x128xbf16, #tpu.memory_space<vmem>>, vector<64x128xbf16>
    %cst_37 = arith.constant dense<0.000000e+00> : vector<64x128xf32>
    %60 = tpu.matmul %58, %59, %cst_37 {dimension_numbers = #tpu.dot_dimension_numbers<[1], [0], [0], [1], [0, 0, 1, 1], [], []>} : vector<64x64xbf16>, vector<64x128xbf16>, vector<64x128xf32> -> vector<64x128xf32>
    %61 = arith.truncf %60 : vector<64x128xf32> to vector<64x128xbf16>
    %cst_38 = arith.constant dense<0.000000e+00> : vector<64x128xf32>
    %62 = tpu.matmul %1, %61, %cst_38 {dimension_numbers = #tpu.dot_dimension_numbers<[1], [0], [0], [1], [0, 0, 1, 1], [], []>} : vector<64x64xbf16>, vector<64x128xbf16>, vector<64x128xf32> -> vector<64x128xf32>
    %cst_39 = arith.constant 0.000000e+00 : f32
    %63 = vector.broadcast %cst_39 : f32 to vector<64x128xf32>
    %64 = arith.maximumf %62, %63 : vector<64x128xf32>
    %65 = arith.truncf %64 : vector<64x128xf32> to vector<64x128xbf16>
    %c0_40 = arith.constant 0 : index
    %c0_41 = arith.constant 0 : index
    %66 = vector.load %arg10[%c0_40, %c0_41] : memref<128x32xbf16, #tpu.memory_space<vmem>>, vector<128x32xbf16>
    %cst_42 = arith.constant dense<0.000000e+00> : vector<64x32xf32>
    %67 = tpu.matmul %65, %66, %cst_42 {dimension_numbers = #tpu.dot_dimension_numbers<[1], [0], [0], [1], [0, 0, 1, 1], [], []>} : vector<64x128xbf16>, vector<128x32xbf16>, vector<64x32xf32> -> vector<64x32xf32>
    %68 = arith.truncf %67 : vector<64x32xf32> to vector<64x32xbf16>
    %cst_43 = arith.constant dense<0.000000e+00> : vector<64x32xf32>
    %69 = tpu.matmul %1, %68, %cst_43 {dimension_numbers = #tpu.dot_dimension_numbers<[1], [0], [0], [1], [0, 0, 1, 1], [], []>} : vector<64x64xbf16>, vector<64x32xbf16>, vector<64x32xf32> -> vector<64x32xf32>
    %c0_44 = arith.constant 0 : index
    %c0_45 = arith.constant 0 : index
    %70 = vector.load %arg23[%c0_44, %c0_45] : memref<64x32xf32, #tpu.memory_space<vmem>>, vector<64x32xf32>
    tpu.vector_store %arg23[%c0_44, %c0_45], %69 {strides = array<i32>} : memref<64x32xf32, #tpu.memory_space<vmem>>, vector<64x32xf32>,
    %c0_46 = arith.constant 0 : index
    %c0_47 = arith.constant 0 : index
    %71 = vector.load %arg14[%c0_46, %c0_47] : memref<128x15xbf16, #tpu.memory_space<vmem>>, vector<128x15xbf16>
    %cst_48 = arith.constant dense<0.000000e+00> : vector<64x15xf32>
    %72 = tpu.matmul %16, %71, %cst_48 {dimension_numbers = #tpu.dot_dimension_numbers<[1], [0], [0], [1], [0, 0, 1, 1], [], []>} : vector<64x128xbf16>, vector<128x15xbf16>, vector<64x15xf32> -> vector<64x15xf32>
    %73 = vector.extract_strided_slice %72 {offsets = [0, 0], sizes = [64, 2], strides = [1, 1]} : vector<64x15xf32> to vector<64x2xf32>
    %74 = vector.extract_strided_slice %72 {offsets = [0, 2], sizes = [64, 5], strides = [1, 1]} : vector<64x15xf32> to vector<64x5xf32>
    %75 = vector.extract_strided_slice %72 {offsets = [0, 7], sizes = [64, 8], strides = [1, 1]} : vector<64x15xf32> to vector<64x8xf32>
    %76 = arith.addf %25, %73 : vector<64x2xf32>
    %c0_49 = arith.constant 0 : index
    %c0_50 = arith.constant 0 : index
    %77 = vector.load %arg18[%c0_49, %c0_50] : memref<1x2xf32, #tpu.memory_space<vmem>>, vector<1x2xf32>
    %78 = vector.broadcast %77 : vector<1x2xf32> to vector<64x2xf32>
    %79 = arith.addf %76, %78 : vector<64x2xf32>
    %cst_51 = arith.constant 0.000000e+00 : f32
    %80 = vector.broadcast %cst_51 : f32 to vector<64x2xf32>
    %81 = arith.cmpf ogt, %79, %80 : vector<64x2xf32>
    %cst_52 = arith.constant 0.00999999977 : f32
    %82 = vector.broadcast %cst_52 : f32 to vector<64x2xf32>
    %83 = arith.mulf %82, %79 : vector<64x2xf32>
    %84 = arith.select %81, %79, %83 : vector<64x2xi1>, vector<64x2xf32>
    %cst_53 = arith.constant dense<0xFF800000> : vector<64xf32>
    %85 = vector.multi_reduction <maximumf>, %84, %cst_53 [1] : vector<64x2xf32> to vector<64xf32>
    %86 = vector.shape_cast %85 : vector<64xf32> to vector<64x1xf32>
    %87 = vector.broadcast %86 : vector<64x1xf32> to vector<64x2xf32>
    %88 = arith.subf %84, %87 : vector<64x2xf32>
    %89 = math.exp %88 : vector<64x2xf32>
    %cst_54 = arith.constant dense<0.000000e+00> : vector<64xf32>
    %90 = vector.multi_reduction <add>, %89, %cst_54 [1] : vector<64x2xf32> to vector<64xf32>
    %91 = vector.shape_cast %90 : vector<64xf32> to vector<64x1xf32>
    %92 = tpu.reciprocal %91 {approx = true} : vector<64x1xf32> -> vector<64x1xf32>
    %93 = vector.broadcast %92 : vector<64x1xf32> to vector<64x2xf32>
    %94 = arith.mulf %89, %93 : vector<64x2xf32>
    %95 = arith.mulf %94, %94 : vector<64x2xf32>
    %cst_55 = arith.constant dense<0.000000e+00> : vector<64xf32>
    %96 = vector.multi_reduction <add>, %95, %cst_55 [1] : vector<64x2xf32> to vector<64xf32>
    %97 = vector.shape_cast %96 : vector<64xf32> to vector<64x1xf32>
    %98 = math.rsqrt %97 : vector<64x1xf32>
    %99 = vector.broadcast %98 : vector<64x1xf32> to vector<64x2xf32>
    %100 = arith.mulf %94, %99 : vector<64x2xf32>
    %101 = vector.extract_strided_slice %100 {offsets = [0, 0], sizes = [64, 1], strides = [1, 1]} : vector<64x2xf32> to vector<64x1xf32>
    %102 = arith.extf %16 : vector<64x128xbf16> to vector<64x128xf32>
    %103 = vector.broadcast %101 : vector<64x1xf32> to vector<64x128xf32>
    %104 = arith.mulf %103, %102 : vector<64x128xf32>
    %105 = vector.extract_strided_slice %100 {offsets = [0, 1], sizes = [64, 1], strides = [1, 1]} : vector<64x2xf32> to vector<64x1xf32>
    %106 = arith.extf %11 : vector<64x128xbf16> to vector<64x128xf32>
    %107 = vector.broadcast %105 : vector<64x1xf32> to vector<64x128xf32>
    %108 = arith.mulf %107, %106 : vector<64x128xf32>
    %109 = arith.addf %104, %108 : vector<64x128xf32>
    %c0_56 = arith.constant 0 : index
    %c0_57 = arith.constant 0 : index
    %110 = vector.load %arg11[%c0_56, %c0_57] : memref<128x64xbf16, #tpu.memory_space<vmem>>, vector<128x64xbf16>
    %111 = arith.truncf %109 : vector<64x128xf32> to vector<64x128xbf16>
    %cst_58 = arith.constant dense<0.000000e+00> : vector<64x64xf32>
    %112 = tpu.matmul %111, %110, %cst_58 {dimension_numbers = #tpu.dot_dimension_numbers<[1], [0], [0], [1], [0, 0, 1, 1], [], []>} : vector<64x128xbf16>, vector<128x64xbf16>, vector<64x64xf32> -> vector<64x64xf32>
    %113 = arith.truncf %112 : vector<64x64xf32> to vector<64x64xbf16>
    %cst_59 = arith.constant dense<0.000000e+00> : vector<64x64xf32>
    %114 = tpu.matmul %2, %113, %cst_59 {dimension_numbers = #tpu.dot_dimension_numbers<[1], [0], [0], [1], [0, 0, 1, 1], [], []>} : vector<64x64xbf16>, vector<64x64xbf16>, vector<64x64xf32> -> vector<64x64xf32>
    %cst_60 = arith.constant 0.000000e+00 : f32
    %115 = vector.broadcast %cst_60 : f32 to vector<64x64xf32>
    %116 = arith.maximumf %114, %115 : vector<64x64xf32>
    %117 = arith.truncf %116 : vector<64x64xf32> to vector<64x64xbf16>
    %c0_61 = arith.constant 0 : index
    %c0_62 = arith.constant 0 : index
    %118 = vector.load %arg15[%c0_61, %c0_62] : memref<64x15xbf16, #tpu.memory_space<vmem>>, vector<64x15xbf16>
    %cst_63 = arith.constant dense<0.000000e+00> : vector<64x15xf32>
    %119 = tpu.matmul %117, %118, %cst_63 {dimension_numbers = #tpu.dot_dimension_numbers<[1], [0], [0], [1], [0, 0, 1, 1], [], []>} : vector<64x64xbf16>, vector<64x15xbf16>, vector<64x15xf32> -> vector<64x15xf32>
    %120 = vector.extract_strided_slice %119 {offsets = [0, 0], sizes = [64, 2], strides = [1, 1]} : vector<64x15xf32> to vector<64x2xf32>
    %121 = vector.extract_strided_slice %119 {offsets = [0, 2], sizes = [64, 5], strides = [1, 1]} : vector<64x15xf32> to vector<64x5xf32>
    %122 = vector.extract_strided_slice %119 {offsets = [0, 7], sizes = [64, 8], strides = [1, 1]} : vector<64x15xf32> to vector<64x8xf32>
    %123 = arith.addf %34, %120 : vector<64x2xf32>
    %c0_64 = arith.constant 0 : index
    %c0_65 = arith.constant 0 : index
    %124 = vector.load %arg19[%c0_64, %c0_65] : memref<1x2xf32, #tpu.memory_space<vmem>>, vector<1x2xf32>
    %125 = vector.broadcast %124 : vector<1x2xf32> to vector<64x2xf32>
    %126 = arith.addf %123, %125 : vector<64x2xf32>
    %cst_66 = arith.constant 0.000000e+00 : f32
    %127 = vector.broadcast %cst_66 : f32 to vector<64x2xf32>
    %128 = arith.cmpf ogt, %126, %127 : vector<64x2xf32>
    %cst_67 = arith.constant 0.00999999977 : f32
    %129 = vector.broadcast %cst_67 : f32 to vector<64x2xf32>
    %130 = arith.mulf %129, %126 : vector<64x2xf32>
    %131 = arith.select %128, %126, %130 : vector<64x2xi1>, vector<64x2xf32>
    %cst_68 = arith.constant dense<0xFF800000> : vector<64xf32>
    %132 = vector.multi_reduction <maximumf>, %131, %cst_68 [1] : vector<64x2xf32> to vector<64xf32>
    %133 = vector.shape_cast %132 : vector<64xf32> to vector<64x1xf32>
    %134 = vector.broadcast %133 : vector<64x1xf32> to vector<64x2xf32>
    %135 = arith.subf %131, %134 : vector<64x2xf32>
    %136 = math.exp %135 : vector<64x2xf32>
    %cst_69 = arith.constant dense<0.000000e+00> : vector<64xf32>
    %137 = vector.multi_reduction <add>, %136, %cst_69 [1] : vector<64x2xf32> to vector<64xf32>
    %138 = vector.shape_cast %137 : vector<64xf32> to vector<64x1xf32>
    %139 = tpu.reciprocal %138 {approx = true} : vector<64x1xf32> -> vector<64x1xf32>
    %140 = vector.broadcast %139 : vector<64x1xf32> to vector<64x2xf32>
    %141 = arith.mulf %136, %140 : vector<64x2xf32>
    %142 = arith.mulf %141, %141 : vector<64x2xf32>
    %cst_70 = arith.constant dense<0.000000e+00> : vector<64xf32>
    %143 = vector.multi_reduction <add>, %142, %cst_70 [1] : vector<64x2xf32> to vector<64xf32>
    %144 = vector.shape_cast %143 : vector<64xf32> to vector<64x1xf32>
    %145 = math.rsqrt %144 : vector<64x1xf32>
    %146 = vector.broadcast %145 : vector<64x1xf32> to vector<64x2xf32>
    %147 = arith.mulf %141, %146 : vector<64x2xf32>
    %148 = vector.extract_strided_slice %147 {offsets = [0, 0], sizes = [64, 1], strides = [1, 1]} : vector<64x2xf32> to vector<64x1xf32>
    %149 = arith.extf %117 : vector<64x64xbf16> to vector<64x64xf32>
    %150 = vector.broadcast %148 : vector<64x1xf32> to vector<64x64xf32>
    %151 = arith.mulf %150, %149 : vector<64x64xf32>
    %152 = vector.extract_strided_slice %147 {offsets = [0, 1], sizes = [64, 1], strides = [1, 1]} : vector<64x2xf32> to vector<64x1xf32>
    %153 = arith.extf %24 : vector<64x64xbf16> to vector<64x64xf32>
    %154 = vector.broadcast %152 : vector<64x1xf32> to vector<64x64xf32>
    %155 = arith.mulf %154, %153 : vector<64x64xf32>
    %156 = arith.addf %151, %155 : vector<64x64xf32>
    %c0_71 = arith.constant 0 : index
    %c0_72 = arith.constant 0 : index
    %157 = vector.load %arg12[%c0_71, %c0_72] : memref<64x32xbf16, #tpu.memory_space<vmem>>, vector<64x32xbf16>
    %158 = arith.truncf %156 : vector<64x64xf32> to vector<64x64xbf16>
    %cst_73 = arith.constant dense<0.000000e+00> : vector<64x32xf32>
    %159 = tpu.matmul %158, %157, %cst_73 {dimension_numbers = #tpu.dot_dimension_numbers<[1], [0], [0], [1], [0, 0, 1, 1], [], []>} : vector<64x64xbf16>, vector<64x32xbf16>, vector<64x32xf32> -> vector<64x32xf32>
    %160 = arith.truncf %159 : vector<64x32xf32> to vector<64x32xbf16>
    %cst_74 = arith.constant dense<0.000000e+00> : vector<64x32xf32>
    %161 = tpu.matmul %2, %160, %cst_74 {dimension_numbers = #tpu.dot_dimension_numbers<[1], [0], [0], [1], [0, 0, 1, 1], [], []>} : vector<64x64xbf16>, vector<64x32xbf16>, vector<64x32xf32> -> vector<64x32xf32>
    %cst_75 = arith.constant 0.000000e+00 : f32
    %162 = vector.broadcast %cst_75 : f32 to vector<64x32xf32>
    %163 = arith.maximumf %161, %162 : vector<64x32xf32>
    %164 = arith.truncf %163 : vector<64x32xf32> to vector<64x32xbf16>
    %c0_76 = arith.constant 0 : index
    %c0_77 = arith.constant 0 : index
    %165 = vector.load %arg16[%c0_76, %c0_77] : memref<32x15xbf16, #tpu.memory_space<vmem>>, vector<32x15xbf16>
    %cst_78 = arith.constant dense<0.000000e+00> : vector<64x15xf32>
    %166 = tpu.matmul %164, %165, %cst_78 {dimension_numbers = #tpu.dot_dimension_numbers<[1], [0], [0], [1], [0, 0, 1, 1], [], []>} : vector<64x32xbf16>, vector<32x15xbf16>, vector<64x15xf32> -> vector<64x15xf32>
    %167 = vector.extract_strided_slice %166 {offsets = [0, 0], sizes = [64, 2], strides = [1, 1]} : vector<64x15xf32> to vector<64x2xf32>
    %168 = vector.extract_strided_slice %166 {offsets = [0, 2], sizes = [64, 5], strides = [1, 1]} : vector<64x15xf32> to vector<64x5xf32>
    %169 = vector.extract_strided_slice %166 {offsets = [0, 7], sizes = [64, 8], strides = [1, 1]} : vector<64x15xf32> to vector<64x8xf32>
    %170 = arith.addf %40, %167 : vector<64x2xf32>
    %c0_79 = arith.constant 0 : index
    %c0_80 = arith.constant 0 : index
    %171 = vector.load %arg20[%c0_79, %c0_80] : memref<1x2xf32, #tpu.memory_space<vmem>>, vector<1x2xf32>
    %172 = vector.broadcast %171 : vector<1x2xf32> to vector<64x2xf32>
    %173 = arith.addf %170, %172 : vector<64x2xf32>
    %cst_81 = arith.constant 0.000000e+00 : f32
    %174 = vector.broadcast %cst_81 : f32 to vector<64x2xf32>
    %175 = arith.cmpf ogt, %173, %174 : vector<64x2xf32>
    %cst_82 = arith.constant 0.00999999977 : f32
    %176 = vector.broadcast %cst_82 : f32 to vector<64x2xf32>
    %177 = arith.mulf %176, %173 : vector<64x2xf32>
    %178 = arith.select %175, %173, %177 : vector<64x2xi1>, vector<64x2xf32>
    %cst_83 = arith.constant dense<0xFF800000> : vector<64xf32>
    %179 = vector.multi_reduction <maximumf>, %178, %cst_83 [1] : vector<64x2xf32> to vector<64xf32>
    %180 = vector.shape_cast %179 : vector<64xf32> to vector<64x1xf32>
    %181 = vector.broadcast %180 : vector<64x1xf32> to vector<64x2xf32>
    %182 = arith.subf %178, %181 : vector<64x2xf32>
    %183 = math.exp %182 : vector<64x2xf32>
    %cst_84 = arith.constant dense<0.000000e+00> : vector<64xf32>
    %184 = vector.multi_reduction <add>, %183, %cst_84 [1] : vector<64x2xf32> to vector<64xf32>
    %185 = vector.shape_cast %184 : vector<64xf32> to vector<64x1xf32>
    %186 = tpu.reciprocal %185 {approx = true} : vector<64x1xf32> -> vector<64x1xf32>
    %187 = vector.broadcast %186 : vector<64x1xf32> to vector<64x2xf32>
    %188 = arith.mulf %183, %187 : vector<64x2xf32>
    %189 = arith.mulf %188, %188 : vector<64x2xf32>
    %cst_85 = arith.constant dense<0.000000e+00> : vector<64xf32>
    %190 = vector.multi_reduction <add>, %189, %cst_85 [1] : vector<64x2xf32> to vector<64xf32>
    %191 = vector.shape_cast %190 : vector<64xf32> to vector<64x1xf32>
    %192 = math.rsqrt %191 : vector<64x1xf32>
    %193 = vector.broadcast %192 : vector<64x1xf32> to vector<64x2xf32>
    %194 = arith.mulf %188, %193 : vector<64x2xf32>
    %195 = vector.extract_strided_slice %194 {offsets = [0, 0], sizes = [64, 1], strides = [1, 1]} : vector<64x2xf32> to vector<64x1xf32>
    %196 = arith.extf %164 : vector<64x32xbf16> to vector<64x32xf32>
    %197 = vector.broadcast %195 : vector<64x1xf32> to vector<64x32xf32>
    %198 = arith.mulf %197, %196 : vector<64x32xf32>
    %199 = vector.extract_strided_slice %194 {offsets = [0, 1], sizes = [64, 1], strides = [1, 1]} : vector<64x2xf32> to vector<64x1xf32>
    %200 = arith.extf %33 : vector<64x32xbf16> to vector<64x32xf32>
    %201 = vector.broadcast %199 : vector<64x1xf32> to vector<64x32xf32>
    %202 = arith.mulf %201, %200 : vector<64x32xf32>
    %203 = arith.addf %198, %202 : vector<64x32xf32>
    %c0_86 = arith.constant 0 : index
    %c0_87 = arith.constant 0 : index
    %204 = vector.load %arg13[%c0_86, %c0_87] : memref<32x16xbf16, #tpu.memory_space<vmem>>, vector<32x16xbf16>
    %205 = arith.truncf %203 : vector<64x32xf32> to vector<64x32xbf16>
    %cst_88 = arith.constant dense<0.000000e+00> : vector<64x16xf32>
    %206 = tpu.matmul %205, %204, %cst_88 {dimension_numbers = #tpu.dot_dimension_numbers<[1], [0], [0], [1], [0, 0, 1, 1], [], []>} : vector<64x32xbf16>, vector<32x16xbf16>, vector<64x16xf32> -> vector<64x16xf32>
    %207 = arith.truncf %206 : vector<64x16xf32> to vector<64x16xbf16>
    %cst_89 = arith.constant dense<0.000000e+00> : vector<64x16xf32>
    %208 = tpu.matmul %2, %207, %cst_89 {dimension_numbers = #tpu.dot_dimension_numbers<[1], [0], [0], [1], [0, 0, 1, 1], [], []>} : vector<64x64xbf16>, vector<64x16xbf16>, vector<64x16xf32> -> vector<64x16xf32>
    %cst_90 = arith.constant 0.000000e+00 : f32
    %209 = vector.broadcast %cst_90 : f32 to vector<64x16xf32>
    %210 = arith.maximumf %208, %209 : vector<64x16xf32>
    %211 = arith.truncf %210 : vector<64x16xf32> to vector<64x16xbf16>
    %c0_91 = arith.constant 0 : index
    %c0_92 = arith.constant 0 : index
    %212 = vector.load %arg17[%c0_91, %c0_92] : memref<16x13xbf16, #tpu.memory_space<vmem>>, vector<16x13xbf16>
    %cst_93 = arith.constant dense<0.000000e+00> : vector<64x13xf32>
    %213 = tpu.matmul %211, %212, %cst_93 {dimension_numbers = #tpu.dot_dimension_numbers<[1], [0], [0], [1], [0, 0, 1, 1], [], []>} : vector<64x16xbf16>, vector<16x13xbf16>, vector<64x13xf32> -> vector<64x13xf32>
    %214 = vector.extract_strided_slice %213 {offsets = [0, 0], sizes = [64, 5], strides = [1, 1]} : vector<64x13xf32> to vector<64x5xf32>
    %215 = vector.extract_strided_slice %213 {offsets = [0, 5], sizes = [64, 8], strides = [1, 1]} : vector<64x13xf32> to vector<64x8xf32>
    %216 = arith.addf %74, %121 : vector<64x5xf32>
    %217 = arith.addf %216, %168 : vector<64x5xf32>
    %218 = arith.addf %217, %214 : vector<64x5xf32>
    %219 = arith.addf %218, %50 : vector<64x5xf32>
    %c0_94 = arith.constant 0 : index
    %c0_95 = arith.constant 0 : index
    %220 = vector.load %arg21[%c0_94, %c0_95] : memref<1x5xf32, #tpu.memory_space<vmem>>, vector<1x5xf32>
    %221 = vector.broadcast %220 : vector<1x5xf32> to vector<64x5xf32>
    %222 = arith.addf %219, %221 : vector<64x5xf32>
    %cst_96 = arith.constant 0.000000e+00 : f32
    %223 = vector.broadcast %cst_96 : f32 to vector<64x5xf32>
    %224 = arith.cmpf ogt, %222, %223 : vector<64x5xf32>
    %cst_97 = arith.constant 0.00999999977 : f32
    %225 = vector.broadcast %cst_97 : f32 to vector<64x5xf32>
    %226 = arith.mulf %225, %222 : vector<64x5xf32>
    %227 = arith.select %224, %222, %226 : vector<64x5xi1>, vector<64x5xf32>
    %cst_98 = arith.constant dense<0xFF800000> : vector<64xf32>
    %228 = vector.multi_reduction <maximumf>, %227, %cst_98 [1] : vector<64x5xf32> to vector<64xf32>
    %229 = vector.shape_cast %228 : vector<64xf32> to vector<64x1xf32>
    %230 = vector.broadcast %229 : vector<64x1xf32> to vector<64x5xf32>
    %231 = arith.subf %227, %230 : vector<64x5xf32>
    %232 = math.exp %231 : vector<64x5xf32>
    %cst_99 = arith.constant dense<0.000000e+00> : vector<64xf32>
    %233 = vector.multi_reduction <add>, %232, %cst_99 [1] : vector<64x5xf32> to vector<64xf32>
    %234 = vector.shape_cast %233 : vector<64xf32> to vector<64x1xf32>
    %235 = tpu.reciprocal %234 {approx = true} : vector<64x1xf32> -> vector<64x1xf32>
    %236 = vector.broadcast %235 : vector<64x1xf32> to vector<64x5xf32>
    %237 = arith.mulf %232, %236 : vector<64x5xf32>
    %238 = arith.mulf %237, %237 : vector<64x5xf32>
    %cst_100 = arith.constant dense<0.000000e+00> : vector<64xf32>
    %239 = vector.multi_reduction <add>, %238, %cst_100 [1] : vector<64x5xf32> to vector<64xf32>
    %240 = vector.shape_cast %239 : vector<64xf32> to vector<64x1xf32>
    %241 = math.rsqrt %240 : vector<64x1xf32>
    %242 = vector.broadcast %241 : vector<64x1xf32> to vector<64x5xf32>
    %243 = arith.mulf %237, %242 : vector<64x5xf32>
    %244 = vector.extract_strided_slice %243 {offsets = [0, 0], sizes = [64, 1], strides = [1, 1]} : vector<64x5xf32> to vector<64x1xf32>
    %245 = vector.broadcast %244 : vector<64x1xf32> to vector<64x8xf32>
    %246 = arith.mulf %245, %75 : vector<64x8xf32>
    %247 = vector.extract_strided_slice %243 {offsets = [0, 1], sizes = [64, 1], strides = [1, 1]} : vector<64x5xf32> to vector<64x1xf32>
    %248 = vector.broadcast %247 : vector<64x1xf32> to vector<64x8xf32>
    %249 = arith.mulf %248, %122 : vector<64x8xf32>
    %250 = arith.addf %246, %249 : vector<64x8xf32>
    %251 = vector.extract_strided_slice %243 {offsets = [0, 2], sizes = [64, 1], strides = [1, 1]} : vector<64x5xf32> to vector<64x1xf32>
    %252 = vector.broadcast %251 : vector<64x1xf32> to vector<64x8xf32>
    %253 = arith.mulf %252, %169 : vector<64x8xf32>
    %254 = arith.addf %250, %253 : vector<64x8xf32>
    %255 = vector.extract_strided_slice %243 {offsets = [0, 3], sizes = [64, 1], strides = [1, 1]} : vector<64x5xf32> to vector<64x1xf32>
    %256 = vector.broadcast %255 : vector<64x1xf32> to vector<64x8xf32>
    %257 = arith.mulf %256, %215 : vector<64x8xf32>
    %258 = arith.addf %254, %257 : vector<64x8xf32>
    %259 = vector.extract_strided_slice %243 {offsets = [0, 4], sizes = [64, 1], strides = [1, 1]} : vector<64x5xf32> to vector<64x1xf32>
    %260 = vector.broadcast %259 : vector<64x1xf32> to vector<64x8xf32>
    %261 = arith.mulf %260, %51 : vector<64x8xf32>
    %262 = arith.addf %258, %261 : vector<64x8xf32>
    %263 = arith.truncf %262 : vector<64x8xf32> to vector<64x8xbf16>
    %cst_101 = arith.constant dense<0.000000e+00> : vector<64x8xf32>
    %264 = tpu.matmul %2, %263, %cst_101 {dimension_numbers = #tpu.dot_dimension_numbers<[1], [0], [0], [1], [0, 0, 1, 1], [], []>} : vector<64x64xbf16>, vector<64x8xbf16>, vector<64x8xf32> -> vector<64x8xf32>
    %cst_102 = arith.constant dense<0xFF800000> : vector<64xf32>
    %265 = vector.multi_reduction <maximumf>, %264, %cst_102 [1] : vector<64x8xf32> to vector<64xf32>
    %266 = vector.shape_cast %265 : vector<64xf32> to vector<64x1xf32>
    %267 = vector.broadcast %266 : vector<64x1xf32> to vector<64x8xf32>
    %268 = arith.subf %264, %267 : vector<64x8xf32>
    %269 = math.exp %268 : vector<64x8xf32>
    %cst_103 = arith.constant dense<0.000000e+00> : vector<64xf32>
    %270 = vector.multi_reduction <add>, %269, %cst_103 [1] : vector<64x8xf32> to vector<64xf32>
    %271 = vector.shape_cast %270 : vector<64xf32> to vector<64x1xf32>
    %272 = vector.broadcast %271 : vector<64x1xf32> to vector<64x8xf32>
    %273 = arith.divf %269, %272 : vector<64x8xf32>
    %c0_104 = arith.constant 0 : index
    %c0_105 = arith.constant 0 : index
    %274 = vector.load %arg25[%c0_104, %c0_105] : memref<64x8xf32, #tpu.memory_space<vmem>>, vector<64x8xf32>
    tpu.vector_store %arg25[%c0_104, %c0_105], %273 {strides = array<i32>} : memref<64x8xf32, #tpu.memory_space<vmem>>, vector<64x8xf32>,
    %c0_106 = arith.constant 0 : index
    %c0_107 = arith.constant 0 : index
    %275 = vector.load %arg22[%c0_106, %c0_107] : memref<16x8xf32, #tpu.memory_space<vmem>>, vector<16x8xf32>
    %276 = arith.mulf %39, %39 : vector<64x16xf32>
    %cst_108 = arith.constant dense<0.000000e+00> : vector<64xf32>
    %277 = vector.multi_reduction <add>, %276, %cst_108 [1] : vector<64x16xf32> to vector<64xf32>
    %278 = vector.shape_cast %277 : vector<64xf32> to vector<64x1xf32>
    %279 = arith.mulf %275, %275 : vector<16x8xf32>
    %cst_109 = arith.constant dense<0.000000e+00> : vector<8xf32>
    %280 = vector.multi_reduction <add>, %279, %cst_109 [0] : vector<16x8xf32> to vector<8xf32>
    %281 = vector.shape_cast %280 : vector<8xf32> to vector<1x8xf32>
    %282 = vector.broadcast %278 : vector<64x1xf32> to vector<64x8xf32>
    %283 = vector.broadcast %281 : vector<1x8xf32> to vector<64x8xf32>
    %284 = arith.addf %282, %283 : vector<64x8xf32>
    %cst_110 = arith.constant dense<0.000000e+00> : vector<64x8xf32>
    %285 = tpu.matmul %39, %275, %cst_110 {dimension_numbers = #tpu.dot_dimension_numbers<[1], [0], [0], [1], [0, 0, 1, 1], [], []>} : vector<64x16xf32>, vector<16x8xf32>, vector<64x8xf32> -> vector<64x8xf32>
    %cst_111 = arith.constant 2.000000e+00 : f32
    %286 = vector.broadcast %cst_111 : f32 to vector<64x8xf32>
    %287 = arith.mulf %286, %285 : vector<64x8xf32>
    %288 = arith.subf %284, %287 : vector<64x8xf32>
    %cst_112 = arith.constant 0.000000e+00 : f32
    %289 = vector.broadcast %cst_112 : f32 to vector<64x8xf32>
    %290 = arith.maximumf %288, %289 : vector<64x8xf32>
    %cst_113 = arith.constant 1.000000e+00 : f32
    %291 = vector.broadcast %cst_113 : f32 to vector<64x8xf32>
    %292 = arith.mulf %290, %291 : vector<64x8xf32>
    %cst_114 = arith.constant 1.000000e+00 : f32
    %293 = vector.broadcast %cst_114 : f32 to vector<64x8xf32>
    %294 = arith.addf %293, %292 : vector<64x8xf32>
    %cst_115 = arith.constant 1.000000e+00 : f32
    %295 = vector.broadcast %cst_115 : f32 to vector<64x8xf32>
    %296 = arith.divf %295, %294 : vector<64x8xf32>
    %cst_116 = arith.constant dense<0.000000e+00> : vector<64xf32>
    %297 = vector.multi_reduction <add>, %296, %cst_116 [1] : vector<64x8xf32> to vector<64xf32>
    %298 = vector.shape_cast %297 : vector<64xf32> to vector<64x1xf32>
    %299 = vector.broadcast %298 : vector<64x1xf32> to vector<64x8xf32>
    %300 = arith.divf %296, %299 : vector<64x8xf32>
    %c0_117 = arith.constant 0 : index
    %c0_118 = arith.constant 0 : index
    %301 = vector.load %arg24[%c0_117, %c0_118] : memref<64x8xf32, #tpu.memory_space<vmem>>, vector<64x8xf32>
    tpu.vector_store %arg24[%c0_117, %c0_118], %300 {strides = array<i32>} : memref<64x8xf32, #tpu.memory_space<vmem>>, vector<64x8xf32>,
    %c0_119 = arith.constant 0 : index
    %c0_120 = arith.constant 0 : index
    %302 = vector.load %arg26[%c0_119, %c0_120] : memref<64x16xf32, #tpu.memory_space<vmem>>, vector<64x16xf32>
    tpu.vector_store %arg26[%c0_119, %c0_120], %39 {strides = array<i32>} : memref<64x16xf32, #tpu.memory_space<vmem>>, vector<64x16xf32>,
    return
  }
}

</mosaic_0001>

<bundles_post_ra>
// kernel: tpu_custom_call.1
= control target key start
LH: loop header
LB: loop body
LE: loop exit
PB: predicated region body
PF: predicated region fallthrough
CT: control target
= control target key end

     0   :  { %s9336_s0 = inlined_call_operand.hbm [shape: f32[64,32], index: 0, kind: input, shape index: {}]   ;;  %s9337_s1 = inlined_call_operand.hbm [shape: bf16[64,64], index: 1, kind: input, shape index: {}]   ;;  %s9338_s2 = inlined_call_operand.hbm [shape: bf16[64,64], index: 2, kind: input, shape index: {}]   ;;  %s9339_s3 = inlined_call_operand.hbm [shape: bf16[32,256], index: 3, kind: input, shape index: {}]   ;;  %s9340_s4 = inlined_call_operand.hbm [shape: bf16[128,66], index: 4, kind: input, shape index: {}]   ;;  %s9341_s5 = inlined_call_operand.hbm [shape: bf16[64,34], index: 5, kind: input, shape index: {}]   ;;  %s9342_s6 = inlined_call_operand.hbm [shape: bf16[32,18], index: 6, kind: input, shape index: {}]   ;;  %s9343_s7 = inlined_call_operand.hbm [shape: bf16[16,45], index: 7, kind: input, shape index: {}]   ;;  %s9344_s8 = inlined_call_operand.hbm [shape: bf16[32,64], index: 8, kind: input, shape index: {}]   ;;  %s9345_s9 = inlined_call_operand.hbm [shape: bf16[64,128], index: 9, kind: input, shape index: {}]   ;;  %s9346_s10 = inlined_call_operand.hbm [shape: bf16[128,32], index: 10, kind: input, shape index: {}]   ;;  %s9347_s11 = inlined_call_operand.hbm [shape: bf16[128,64], index: 11, kind: input, shape index: {}]   ;;  %s9348_s12 = inlined_call_operand.hbm [shape: bf16[64,32], index: 12, kind: input, shape index: {}]   ;;  %s9349_s13 = inlined_call_operand.hbm [shape: bf16[32,16], index: 13, kind: input, shape index: {}]   ;;  %s9350_s14 = inlined_call_operand.hbm [shape: bf16[128,15], index: 14, kind: input, shape index: {}]   ;;  %s9351_s15 = inlined_call_operand.hbm [shape: bf16[64,15], index: 15, kind: input, shape index: {}]   ;;  %s9352_s16 = inlined_call_operand.hbm [shape: bf16[32,15], index: 16, kind: input, shape index: {}]   ;;  %s9353_s17 = inlined_call_operand.hbm [shape: bf16[16,13], index: 17, kind: input, shape index: {}]   ;;  %s9354_s18 = inlined_call_operand.hbm [shape: f32[1,2], index: 18, kind: input, shape index: {}]   ;;  %s9355_s19 = inlined_call_operand.hbm [shape: f32[1,2], index: 19, kind: input, shape index: {}]   ;;  %s9356_s20 = inlined_call_operand.hbm [shape: f32[1,2], index: 20, kind: input, shape index: {}]   ;;  %s9357_s21 = inlined_call_operand.hbm [shape: f32[1,5], index: 21, kind: input, shape index: {}]   ;;  %s9358_s22 = inlined_call_operand.hbm [shape: f32[16,8], index: 22, kind: input, shape index: {}]   ;;  %s9359_s23 = inlined_call_operand.hbm [shape: f32[64,32], index: 23, kind: output, shape index: {0}]   ;;  %s9360_s24 = inlined_call_operand.hbm [shape: f32[64,8], index: 24, kind: output, shape index: {1}]   ;;  %s9361_s25 = inlined_call_operand.hbm [shape: f32[64,8], index: 25, kind: output, shape index: {2}]   ;;  %s9362_s26 = inlined_call_operand.hbm [shape: f32[64,16], index: 26, kind: output, shape index: {3}]  }
   0x1   :  { %9431 = sst [smem:[#allocation86_spill]] %s9336_s0 }
   0x2   :  { %9432 = sst [smem:[#allocation87_spill]] %s9337_s1 }
   0x3   :  { %9433 = sst [smem:[#allocation88_spill]] %s9338_s2 }
   0x4   :  { %9434 = sst [smem:[#allocation89_spill]] %s9339_s3 }
   0x5   :  { %9435 = sst [smem:[#allocation90_spill]] %s9340_s4 }
   0x6   :  { %9436 = sst [smem:[#allocation91_spill]] %s9341_s5 }
   0x7   :  { %9437 = sst [smem:[#allocation92_spill]] %s9342_s6 }
   0x8   :  { %9438 = sst [smem:[#allocation93_spill]] %s9343_s7 }
   0x9   :  { %9439 = sst [smem:[#allocation94_spill]] %s9344_s8 }
   0xa   :  { %9440 = sst [smem:[#allocation95_spill]] %s9345_s9 }
   0xb   :  { %9441 = sst [smem:[#allocation96_spill]] %s9346_s10 }
   0xc   :  { %9442 = sst [smem:[#allocation97_spill]] %s9359_s23 }
   0xd   :  { %9443 = sst [smem:[#allocation98_spill]] %s9361_s25 }
   0xe   :  { %9444 = sst [smem:[#allocation99_spill]] %s9362_s26 }
   0xf   :  { %32 = vsyncpa [#allocation3], 0 }
  0x10   :  { %33 = vsyncpa [#allocation6], 0 }
  0x11   :  { %34 = vsyncpa [#allocation9], 0 }
  0x12   :  { %35 = vsyncpa [#allocation12], 0 }
  0x13   :  { %36 = vsyncpa [#allocation15], 0 }
  0x14   :  { %37 = vsyncpa [#allocation18], 0 }
  0x15   :  { %38 = vsyncpa [#allocation21], 0 }
  0x16   :  { %39 = vsyncpa [#allocation24], 0 }
  0x17   :  { %40 = vsyncpa [#allocation27], 0 }
  0x18   :  { %41 = vsyncpa [#allocation30], 0 }
  0x19   :  { %42 = vsyncpa [#allocation33], 0 }
  0x1a   :  { %43 = vsyncpa [#allocation36], 0 }
  0x1b   :  { %44 = vsyncpa [#allocation4], 0 }
  0x1c   :  { %45 = vsyncpa [#allocation40], 0 }
  0x1d   :  { %46 = vsyncpa [#allocation43], 0  ;;  %s7374_s27 = smov [#allocation5]   ;;  %s9445_s8 = sld [smem:[#allocation87_spill]] }
  0x1e   :  { %s64_s3 = sshll.u32 %s7374_s27, 4  ;;  %s65_s3 = int_to_ptr.vmem [resolvable:$true] %s64_s3 }
  0x23   :  { %s6750_s4 = scalar_lea.hbm %s9445_s8, 512 }
  0x24   :  { %p6751_p0 = scmp.ne.s32.totalorder %s9445_s8, %s6750_s4  ;;  %p6754_p1 = scmp.lt.u32.totalorder %s6750_s4, %s9445_s8 }
  0x26   :  { %p6756_p2 = pnand %p6754_p1, %p6751_p0 }
  0x28   :  { %6759 = shalt.err (!%p6756_p2)
}
  0x29   :  { %s6760_s2 = scalar_lea.vmem %s65_s3, 512  ;;  %p6765_p4 = scmp.lt.s32.totalorder %s65_s3, %s65_s3 }
  0x2a   :  { %p6761_p3 = scmp.ne.s32.totalorder %s65_s3, %s6760_s2  ;;  %p6766_p5 = scmp.lt.s32.totalorder %s6760_s2, %s6760_s2 }
  0x2c   :  { %p6767_p6 = por %p6766_p5, %p6765_p4 }
  0x2e   :  { %p6768_p7 = pnand %p6767_p6, %p6761_p3 }
  0x30   :  { %6771 = shalt.err (!%p6768_p7)
}
  0x31   :  { %s7375_s5 = smov 64   ;;  %s7376_s10 = smov 4  }
  0x32   :  { %70 = dma.hbm_to_vmem [thread:$0]  %s9445_s8, 512, %s65_s3, [#allocation6], %s7375_s5, %s7375_s5, %s7376_s10  }
  0x33   :  { %s7377_s27 = smov [#allocation8]   ;;  %s7378_s28 = smov [#allocation11]  }
  0x34   :  { %s88_s7 = sshll.u32 %s7377_s27, 4  ;;  %s112_s4 = sshll.u32 %s7378_s28, 4  ;;  %s89_s7 = int_to_ptr.vmem [resolvable:$true] %s88_s7  ;;  %s113_s4 = int_to_ptr.vmem [resolvable:$true] %s112_s4 }
  0x35   :  { %s9446_s9 = sld [smem:[#allocation89_spill]] }
  0x3b   :  { %s6772_s30 = scalar_lea.hbm %s9446_s9, 512 }
  0x3c   :  { %p6773_p8 = scmp.ne.s32.totalorder %s9446_s9, %s6772_s30  ;;  %p6776_p9 = scmp.lt.u32.totalorder %s6772_s30, %s9446_s9 }
  0x3e   :  { %p6778_p10 = pnand %p6776_p9, %p6773_p8 }
  0x40   :  { %6781 = shalt.err (!%p6778_p10)
}
  0x41   :  { %s6782_s3 = scalar_lea.vmem %s89_s7, 512  ;;  %p6787_p12 = scmp.lt.s32.totalorder %s89_s7, %s89_s7 }
  0x42   :  { %p6783_p11 = scmp.ne.s32.totalorder %s89_s7, %s6782_s3  ;;  %p6788_p13 = scmp.lt.s32.totalorder %s6782_s3, %s6782_s3 }
  0x44   :  { %p6789_p0 = por %p6788_p13, %p6787_p12 }
  0x46   :  { %p6790_p1 = pnand %p6789_p0, %p6783_p11 }
  0x48   :  { %6793 = shalt.err (!%p6790_p1)
}
  0x49   :  { %s9377_s8 = smov 128   ;;  %s9379_s6 = smov 8  }
  0x4a   :  { %94 = dma.hbm_to_vmem [thread:$0]  %s9446_s9, 512, %s89_s7, [#allocation9], %s9377_s8, %s9377_s8, %s9379_s6  }
  0x4b   :  { %s9447_s27 = sld [smem:[#allocation91_spill]] }
  0x51   :  { %s6794_s28 = scalar_lea.hbm %s9447_s27, 512 }
  0x52   :  { %p6795_p2 = scmp.ne.s32.totalorder %s9447_s27, %s6794_s28  ;;  %p6798_p3 = scmp.lt.u32.totalorder %s6794_s28, %s9447_s27 }
  0x54   :  { %p6800_p4 = pnand %p6798_p3, %p6795_p2 }
  0x56   :  { %6803 = shalt.err (!%p6800_p4)
}
  0x57   :  { %s6804_s3 = scalar_lea.vmem %s113_s4, 512  ;;  %p6809_p6 = scmp.lt.s32.totalorder %s113_s4, %s113_s4 }
  0x58   :  { %p6805_p5 = scmp.ne.s32.totalorder %s113_s4, %s6804_s3  ;;  %p6810_p7 = scmp.lt.s32.totalorder %s6804_s3, %s6804_s3 }
  0x5a   :  { %p6811_p8 = por %p6810_p7, %p6809_p6 }
  0x5c   :  { %p6812_p9 = pnand %p6811_p8, %p6805_p5 }
  0x5e   :  { %6815 = shalt.err (!%p6812_p9)
}
  0x5f   :  { %118 = dma.hbm_to_vmem [thread:$0]  %s9447_s27, 512, %s113_s4, [#allocation12], %s7375_s5, %s7375_s5, %s7376_s10  }
  0x60   :  { %s7381_s25 = smov [#allocation14]   ;;  %s7382_s23 = smov [#allocation17]  }
  0x61   :  { %s136_s1 = sshll.u32 %s7381_s25, 4  ;;  %s160_s26 = sshll.u32 %s7382_s23, 4  ;;  %s137_s1 = int_to_ptr.vmem [resolvable:$true] %s136_s1  ;;  %s161_s26 = int_to_ptr.vmem [resolvable:$true] %s160_s26 }
  0x62   :  { %s9448_s0 = sld [smem:[#allocation93_spill]] }
  0x68   :  { %s6816_s30 = scalar_lea.hbm %s9448_s0, 128 }
  0x69   :  { %p6817_p10 = scmp.ne.s32.totalorder %s9448_s0, %s6816_s30  ;;  %p6820_p11 = scmp.lt.u32.totalorder %s6816_s30, %s9448_s0 }
  0x6b   :  { %p6822_p12 = pnand %p6820_p11, %p6817_p10 }
  0x6d   :  { %6825 = shalt.err (!%p6822_p12)
}
  0x6e   :  { %s6826_s4 = scalar_lea.vmem %s137_s1, 128  ;;  %p6831_p0 = scmp.lt.s32.totalorder %s137_s1, %s137_s1 }
  0x6f   :  { %p6827_p13 = scmp.ne.s32.totalorder %s137_s1, %s6826_s4  ;;  %p6832_p1 = scmp.lt.s32.totalorder %s6826_s4, %s6826_s4 }
  0x71   :  { %p6833_p2 = por %p6832_p1, %p6831_p0 }
  0x73   :  { %p6834_p3 = pnand %p6833_p2, %p6827_p13 }
  0x75   :  { %6837 = shalt.err (!%p6834_p3)
}
  0x76   :  { %142 = dma.hbm_to_vmem [thread:$0]  %s9448_s0, 128, %s137_s1, [#allocation15], %s7375_s5, %s7375_s5, %s7376_s10  }
  0x77   :  { %s9449_s6 = sld [smem:[#allocation95_spill]] }
  0x7d   :  { %s6838_s25 = scalar_lea.hbm %s9449_s6, 512 }
  0x7e   :  { %p6839_p4 = scmp.ne.s32.totalorder %s9449_s6, %s6838_s25  ;;  %p6842_p5 = scmp.lt.u32.totalorder %s6838_s25, %s9449_s6 }
  0x80   :  { %p6844_p6 = pnand %p6842_p5, %p6839_p4 }
  0x82   :  { %6847 = shalt.err (!%p6844_p6)
}
  0x83   :  { %s6848_s2 = scalar_lea.vmem %s161_s26, 512  ;;  %p6853_p8 = scmp.lt.s32.totalorder %s161_s26, %s161_s26 }
  0x84   :  { %p6849_p7 = scmp.ne.s32.totalorder %s161_s26, %s6848_s2  ;;  %p6854_p9 = scmp.lt.s32.totalorder %s6848_s2, %s6848_s2 }
  0x86   :  { %p6855_p10 = por %p6854_p9, %p6853_p8 }
  0x88   :  { %p6856_p11 = pnand %p6855_p10, %p6849_p7 }
  0x8a   :  { %6859 = shalt.err (!%p6856_p11)
}
  0x8b   :  { %166 = dma.hbm_to_vmem [thread:$0]  %s9449_s6, 512, %s161_s26, [#allocation18], %s7375_s5, %s7375_s5, %s7376_s10  }
  0x8c   :  { %s7383_s3 = smov [#allocation20]   ;;  %s7384_s27 = smov [#allocation23]  }
  0x8d   :  { %s184_s4 = sshll.u32 %s7383_s3, 4  ;;  %s208_s7 = sshll.u32 %s7384_s27, 4  ;;  %s185_s4 = int_to_ptr.vmem [resolvable:$true] %s184_s4  ;;  %s209_s7 = int_to_ptr.vmem [resolvable:$true] %s208_s7 }
  0x8e   :  { %s6860_s25 = scalar_lea.hbm %s9347_s11, 1024 }
  0x8f   :  { %p6861_p12 = scmp.ne.s32.totalorder %s9347_s11, %s6860_s25  ;;  %p6864_p13 = scmp.lt.u32.totalorder %s6860_s25, %s9347_s11 }
  0x91   :  { %p6866_p0 = pnand %p6864_p13, %p6861_p12 }
  0x93   :  { %6869 = shalt.err (!%p6866_p0)
}
  0x94   :  { %s6870_s26 = scalar_lea.vmem %s185_s4, 1024  ;;  %p6875_p2 = scmp.lt.s32.totalorder %s185_s4, %s185_s4 }
  0x95   :  { %p6871_p1 = scmp.ne.s32.totalorder %s185_s4, %s6870_s26  ;;  %p6876_p3 = scmp.lt.s32.totalorder %s6870_s26, %s6870_s26 }
  0x97   :  { %p6877_p4 = por %p6876_p3, %p6875_p2 }
  0x99   :  { %p6878_p5 = pnand %p6877_p4, %p6871_p1 }
  0x9b   :  { %6881 = shalt.err (!%p6878_p5)
}
  0x9c   :  { %190 = dma.hbm_to_vmem [thread:$0]  %s9347_s11, 1024, %s185_s4, [#allocation21], %s7375_s5, %s7375_s5, %s7376_s10  }
  0x9d   :  { %s6882_s3 = scalar_lea.hbm %s9349_s13, 256 }
  0x9e   :  { %p6883_p6 = scmp.ne.s32.totalorder %s9349_s13, %s6882_s3  ;;  %p6886_p7 = scmp.lt.u32.totalorder %s6882_s3, %s9349_s13 }
  0xa0   :  { %p6888_p8 = pnand %p6886_p7, %p6883_p6 }
  0xa2   :  { %6891 = shalt.err (!%p6888_p8)
}
  0xa3   :  { %s6892_s23 = scalar_lea.vmem %s209_s7, 256  ;;  %p6897_p10 = scmp.lt.s32.totalorder %s209_s7, %s209_s7 }
  0xa4   :  { %p6893_p9 = scmp.ne.s32.totalorder %s209_s7, %s6892_s23  ;;  %p6898_p11 = scmp.lt.s32.totalorder %s6892_s23, %s6892_s23 }
  0xa6   :  { %p6899_p12 = por %p6898_p11, %p6897_p10 }
  0xa8   :  { %p6900_p13 = pnand %p6899_p12, %p6893_p9 }
  0xaa   :  { %6903 = shalt.err (!%p6900_p13)
}
  0xab   :  { %214 = dma.hbm_to_vmem [thread:$0]  %s9349_s13, 256, %s209_s7, [#allocation24], %s7375_s5, %s7375_s5, %s7376_s10  }
  0xac   :  { %s7385_s28 = smov [#allocation26]   ;;  %s7386_s30 = smov [#allocation29]  }
  0xad   :  { %s232_s29 = sshll.u32 %s7385_s28, 4  ;;  %s256_s26 = sshll.u32 %s7386_s30, 4  ;;  %s233_s29 = int_to_ptr.vmem [resolvable:$true] %s232_s29  ;;  %s257_s26 = int_to_ptr.vmem [resolvable:$true] %s256_s26 }
  0xae   :  { %s6904_s1 = scalar_lea.hbm %s9351_s15, 512 }
  0xaf   :  { %p6905_p0 = scmp.ne.s32.totalorder %s9351_s15, %s6904_s1  ;;  %p6908_p1 = scmp.lt.u32.totalorder %s6904_s1, %s9351_s15 }
  0xb1   :  { %p6910_p2 = pnand %p6908_p1, %p6905_p0 }
  0xb3   :  { %6913 = shalt.err (!%p6910_p2)
}
  0xb4   :  { %s6914_s13 = scalar_lea.vmem %s233_s29, 512  ;;  %p6919_p4 = scmp.lt.s32.totalorder %s233_s29, %s233_s29 }
  0xb5   :  { %p6915_p3 = scmp.ne.s32.totalorder %s233_s29, %s6914_s13  ;;  %p6920_p5 = scmp.lt.s32.totalorder %s6914_s13, %s6914_s13 }
  0xb7   :  { %p6921_p6 = por %p6920_p5, %p6919_p4 }
  0xb9   :  { %p6922_p7 = pnand %p6921_p6, %p6915_p3 }
  0xbb   :  { %6925 = shalt.err (!%p6922_p7)
}
  0xbc   :  { %238 = dma.hbm_to_vmem [thread:$0]  %s9351_s15, 512, %s233_s29, [#allocation27], %s7375_s5, %s7375_s5, %s7376_s10  }
  0xbd   :  { %s6926_s11 = scalar_lea.hbm %s9353_s17, 128 }
  0xbe   :  { %p6927_p8 = scmp.ne.s32.totalorder %s9353_s17, %s6926_s11  ;;  %p6930_p9 = scmp.lt.u32.totalorder %s6926_s11, %s9353_s17 }
  0xc0   :  { %p6932_p10 = pnand %p6930_p9, %p6927_p8 }
  0xc2   :  { %6935 = shalt.err (!%p6932_p10)
}
  0xc3   :  { %s6936_s2 = scalar_lea.vmem %s257_s26, 128  ;;  %p6941_p12 = scmp.lt.s32.totalorder %s257_s26, %s257_s26 }
  0xc4   :  { %p6937_p11 = scmp.ne.s32.totalorder %s257_s26, %s6936_s2  ;;  %p6942_p13 = scmp.lt.s32.totalorder %s6936_s2, %s6936_s2 }
  0xc6   :  { %p6943_p0 = por %p6942_p13, %p6941_p12 }
  0xc8   :  { %p6944_p1 = pnand %p6943_p0, %p6937_p11 }
  0xca   :  { %6947 = shalt.err (!%p6944_p1)
}
  0xcb   :  { %262 = dma.hbm_to_vmem [thread:$0]  %s9353_s17, 128, %s257_s26, [#allocation30], %s7375_s5, %s7375_s5, %s7376_s10  }
  0xcc   :  { %s7387_s1 = smov [#allocation32]   ;;  %s7388_s3 = smov [#allocation35]  }
  0xcd   :  { %s279_s0 = sshll.u32 %s7387_s1, 4  ;;  %s299_s27 = sshll.u32 %s7388_s3, 4  ;;  %s280_s0 = int_to_ptr.vmem [resolvable:$true] %s279_s0  ;;  %s300_s27 = int_to_ptr.vmem [resolvable:$true] %s299_s27 }
  0xce   :  { %s6948_s7 = scalar_lea.hbm %s9355_s19, 16 }
  0xcf   :  { %p6949_p2 = scmp.ne.s32.totalorder %s9355_s19, %s6948_s7  ;;  %p6952_p3 = scmp.lt.u32.totalorder %s6948_s7, %s9355_s19 }
  0xd1   :  { %p6954_p4 = pnand %p6952_p3, %p6949_p2 }
  0xd3   :  { %6957 = shalt.err (!%p6954_p4)
}
  0xd4   :  { %s6958_s17 = scalar_lea.vmem %s280_s0, 16  ;;  %s6962_s26 = scalar_lea.vmem %s280_s0, 32 }
  0xd5   :  { %p6959_p5 = scmp.ne.s32.totalorder %s280_s0, %s6958_s17  ;;  %p6963_p6 = scmp.lt.s32.totalorder %s280_s0, %s280_s0 }
  0xd6   :  { %p6964_p7 = scmp.lt.s32.totalorder %s6962_s26, %s6958_s17 }
  0xd8   :  { %p6965_p8 = por %p6964_p7, %p6963_p6 }
  0xda   :  { %p6966_p9 = pnand %p6965_p8, %p6959_p5 }
  0xdc   :  { %6969 = shalt.err (!%p6966_p9)
}
  0xdd   :  { %282 = dma.hbm_to_vmem [thread:$0]  %s9355_s19, 16, %s280_s0, [#allocation33]  }
  0xde   :  { %s6970_s2 = scalar_lea.hbm %s9357_s21, 16 }
  0xdf   :  { %p6971_p10 = scmp.ne.s32.totalorder %s9357_s21, %s6970_s2  ;;  %p6974_p11 = scmp.lt.u32.totalorder %s6970_s2, %s9357_s21 }
  0xe1   :  { %p6976_p12 = pnand %p6974_p11, %p6971_p10 }
  0xe3   :  { %6979 = shalt.err (!%p6976_p12)
}
  0xe4   :  { %s6980_s9 = scalar_lea.vmem %s300_s27, 16  ;;  %s6984_s13 = scalar_lea.vmem %s300_s27, 32 }
  0xe5   :  { %p6981_p13 = scmp.ne.s32.totalorder %s300_s27, %s6980_s9  ;;  %p6985_p0 = scmp.lt.s32.totalorder %s300_s27, %s300_s27 }
  0xe6   :  { %p6986_p1 = scmp.lt.s32.totalorder %s6984_s13, %s6980_s9 }
  0xe8   :  { %p6987_p2 = por %p6986_p1, %p6985_p0 }
  0xea   :  { %p6988_p3 = pnand %p6987_p2, %p6981_p13 }
  0xec   :  { %6991 = shalt.err (!%p6988_p3)
}
  0xed   :  { %302 = dma.hbm_to_vmem [thread:$0]  %s9357_s21, 16, %s300_s27, [#allocation36]  }
  0xee   :  { %s7389_s7 = smov [#allocation2]   ;;  %s7390_s25 = smov [#allocation7]  }
  0xef   :  { %s52_s8 = sshll.u32 %s7389_s7, 4  ;;  %s76_s23 = sshll.u32 %s7390_s25, 4  ;;  %s53_s8 = int_to_ptr.vmem [resolvable:$true] %s52_s8  ;;  %s77_s23 = int_to_ptr.vmem [resolvable:$true] %s76_s23 }
  0xf0   :  { %s9450_s26 = sld [smem:[#allocation86_spill]] }
  0xf6   :  { %s6992_s4 = scalar_lea.hbm %s9450_s26, 1024 }
  0xf7   :  { %p6993_p4 = scmp.ne.s32.totalorder %s9450_s26, %s6992_s4  ;;  %p6996_p5 = scmp.lt.u32.totalorder %s6992_s4, %s9450_s26 }
  0xf9   :  { %p6998_p6 = pnand %p6996_p5, %p6993_p4 }
  0xfb   :  { %7001 = shalt.err (!%p6998_p6)
}
  0xfc   :  { %s7002_s21 = scalar_lea.vmem %s53_s8, 1024  ;;  %p7007_p8 = scmp.lt.s32.totalorder %s53_s8, %s53_s8 }
  0xfd   :  { %p7003_p7 = scmp.ne.s32.totalorder %s53_s8, %s7002_s21  ;;  %p7008_p9 = scmp.lt.s32.totalorder %s7002_s21, %s7002_s21 }
  0xff   :  { %p7009_p10 = por %p7008_p9, %p7007_p8 }
 0x101   :  { %p7010_p11 = pnand %p7009_p10, %p7003_p7 }
 0x103   :  { %7013 = shalt.err (!%p7010_p11)
}
 0x104   :  { %s9451_s27 = smov 8   ;;  %s9452_s15 = smov 128  }
 0x105   :  { %58 = dma.hbm_to_vmem [thread:$0]  %s9450_s26, 1024, %s53_s8, [#allocation3], %s9452_s15, %s9452_s15, %s9451_s27  }
 0x106   :  { %s9453_s13 = sld [smem:[#allocation88_spill]] }
 0x10c   :  { %s7014_s19 = scalar_lea.hbm %s9453_s13, 512 }
 0x10d   :  { %p7015_p12 = scmp.ne.s32.totalorder %s9453_s13, %s7014_s19  ;;  %p7018_p13 = scmp.lt.u32.totalorder %s7014_s19, %s9453_s13 }
 0x10f   :  { %p7020_p0 = pnand %p7018_p13, %p7015_p12 }
 0x111   :  { %7023 = shalt.err (!%p7020_p0)
}
 0x112   :  { %s7024_s17 = scalar_lea.vmem %s77_s23, 512  ;;  %p7029_p2 = scmp.lt.s32.totalorder %s77_s23, %s77_s23 }
 0x113   :  { %p7025_p1 = scmp.ne.s32.totalorder %s77_s23, %s7024_s17  ;;  %p7030_p3 = scmp.lt.s32.totalorder %s7024_s17, %s7024_s17 }
 0x115   :  { %p7031_p4 = por %p7030_p3, %p7029_p2 }
 0x117   :  { %p7032_p5 = pnand %p7031_p4, %p7025_p1 }
 0x119   :  { %7035 = shalt.err (!%p7032_p5)
}
 0x11a   :  { %82 = dma.hbm_to_vmem [thread:$0]  %s9453_s13, 512, %s77_s23, [#allocation6], %s7375_s5, %s7375_s5, %s7376_s10  }
 0x11b   :  { %s7391_s4 = smov [#allocation10]   ;;  %s7392_s30 = smov [#allocation13]  }
 0x11c   :  { %s100_s28 = sshll.u32 %s7391_s4, 4  ;;  %s124_s6 = sshll.u32 %s7392_s30, 4  ;;  %s101_s28 = int_to_ptr.vmem [resolvable:$true] %s100_s28  ;;  %s125_s6 = int_to_ptr.vmem [resolvable:$true] %s124_s6 }
 0x11d   :  { %s9454_s29 = sld [smem:[#allocation90_spill]] }
 0x123   :  { %s7036_s1 = scalar_lea.hbm %s9454_s29, 1024 }
 0x124   :  { %p7037_p6 = scmp.ne.s32.totalorder %s9454_s29, %s7036_s1  ;;  %p7040_p7 = scmp.lt.u32.totalorder %s7036_s1, %s9454_s29 }
 0x126   :  { %p7042_p8 = pnand %p7040_p7, %p7037_p6 }
 0x128   :  { %7045 = shalt.err (!%p7042_p8)
}
 0x129   :  { %s7046_s23 = scalar_lea.vmem %s101_s28, 1024  ;;  %p7051_p10 = scmp.lt.s32.totalorder %s101_s28, %s101_s28 }
 0x12a   :  { %p7047_p9 = scmp.ne.s32.totalorder %s101_s28, %s7046_s23  ;;  %p7052_p11 = scmp.lt.s32.totalorder %s7046_s23, %s7046_s23 }
 0x12c   :  { %p7053_p12 = por %p7052_p11, %p7051_p10 }
 0x12e   :  { %p7054_p13 = pnand %p7053_p12, %p7047_p9 }
 0x130   :  { %7057 = shalt.err (!%p7054_p13)
}
 0x131   :  { %106 = dma.hbm_to_vmem [thread:$0]  %s9454_s29, 1024, %s101_s28, [#allocation9], %s7375_s5, %s7375_s5, %s7376_s10  }
 0x132   :  { %s9455_s17 = sld [smem:[#allocation92_spill]] }
 0x138   :  { %s7058_s8 = scalar_lea.hbm %s9455_s17, 256 }
 0x139   :  { %p7059_p0 = scmp.ne.s32.totalorder %s9455_s17, %s7058_s8  ;;  %p7062_p1 = scmp.lt.u32.totalorder %s7058_s8, %s9455_s17 }
 0x13b   :  { %p7064_p2 = pnand %p7062_p1, %p7059_p0 }
 0x13d   :  { %7067 = shalt.err (!%p7064_p2)
}
 0x13e   :  { %s7068_s21 = scalar_lea.vmem %s125_s6, 256  ;;  %p7073_p4 = scmp.lt.s32.totalorder %s125_s6, %s125_s6 }
 0x13f   :  { %p7069_p3 = scmp.ne.s32.totalorder %s125_s6, %s7068_s21  ;;  %p7074_p5 = scmp.lt.s32.totalorder %s7068_s21, %s7068_s21 }
 0x141   :  { %p7075_p6 = por %p7074_p5, %p7073_p4 }
 0x143   :  { %p7076_p7 = pnand %p7075_p6, %p7069_p3 }
 0x145   :  { %7079 = shalt.err (!%p7076_p7)
}
 0x146   :  { %130 = dma.hbm_to_vmem [thread:$0]  %s9455_s17, 256, %s125_s6, [#allocation12], %s7375_s5, %s7375_s5, %s7376_s10  }
 0x147   :  { %s7393_s1 = smov [#allocation16]   ;;  %s7394_s9 = smov [#allocation19]  }
 0x148   :  { %s148_s3 = sshll.u32 %s7393_s1, 4  ;;  %s172_s19 = sshll.u32 %s7394_s9, 4  ;;  %s149_s3 = int_to_ptr.vmem [resolvable:$true] %s148_s3  ;;  %s173_s19 = int_to_ptr.vmem [resolvable:$true] %s172_s19 }
 0x149   :  { %s9456_s13 = sld [smem:[#allocation94_spill]] }
 0x14f   :  { %s7080_s7 = scalar_lea.hbm %s9456_s13, 256 }
 0x150   :  { %p7081_p8 = scmp.ne.s32.totalorder %s9456_s13, %s7080_s7  ;;  %p7084_p9 = scmp.lt.u32.totalorder %s7080_s7, %s9456_s13 }
 0x152   :  { %p7086_p10 = pnand %p7084_p9, %p7081_p8 }
 0x154   :  { %7089 = shalt.err (!%p7086_p10)
}
 0x155   :  { %s7090_s6 = scalar_lea.vmem %s149_s3, 256  ;;  %p7095_p12 = scmp.lt.s32.totalorder %s149_s3, %s149_s3 }
 0x156   :  { %p7091_p11 = scmp.ne.s32.totalorder %s149_s3, %s7090_s6  ;;  %p7096_p13 = scmp.lt.s32.totalorder %s7090_s6, %s7090_s6 }
 0x158   :  { %p7097_p0 = por %p7096_p13, %p7095_p12 }
 0x15a   :  { %p7098_p1 = pnand %p7097_p0, %p7091_p11 }
 0x15c   :  { %7101 = shalt.err (!%p7098_p1)
}
 0x15d   :  { %154 = dma.hbm_to_vmem [thread:$0]  %s9456_s13, 256, %s149_s3, [#allocation15], %s7375_s5, %s7375_s5, %s7376_s10  }
 0x15e   :  { %s9457_s21 = sld [smem:[#allocation96_spill]] }
 0x164   :  { %s7102_s28 = scalar_lea.hbm %s9457_s21, 1024 }
 0x165   :  { %p7103_p2 = scmp.ne.s32.totalorder %s9457_s21, %s7102_s28  ;;  %p7106_p3 = scmp.lt.u32.totalorder %s7102_s28, %s9457_s21 }
 0x167   :  { %p7108_p4 = pnand %p7106_p3, %p7103_p2 }
 0x169   :  { %7111 = shalt.err (!%p7108_p4)
}
 0x16a   :  { %s7112_s23 = scalar_lea.vmem %s173_s19, 1024  ;;  %p7117_p6 = scmp.lt.s32.totalorder %s173_s19, %s173_s19 }
 0x16b   :  { %p7113_p5 = scmp.ne.s32.totalorder %s173_s19, %s7112_s23  ;;  %p7118_p7 = scmp.lt.s32.totalorder %s7112_s23, %s7112_s23 }
 0x16d   :  { %p7119_p8 = por %p7118_p7, %p7117_p6 }
 0x16f   :  { %p7120_p9 = pnand %p7119_p8, %p7113_p5 }
 0x171   :  { %7123 = shalt.err (!%p7120_p9)
}
 0x172   :  { %178 = dma.hbm_to_vmem [thread:$0]  %s9457_s21, 1024, %s173_s19, [#allocation18], %s7375_s5, %s7375_s5, %s7376_s10  }
 0x173   :  { %s7395_s7 = smov [#allocation22]   ;;  %s7396_s11 = smov [#allocation25]  }
 0x174   :  { %s196_s25 = sshll.u32 %s7395_s7, 4  ;;  %s220_s8 = sshll.u32 %s7396_s11, 4  ;;  %s197_s25 = int_to_ptr.vmem [resolvable:$true] %s196_s25  ;;  %s221_s8 = int_to_ptr.vmem [resolvable:$true] %s220_s8 }
 0x175   :  { %s7124_s17 = scalar_lea.hbm %s9348_s12, 512 }
 0x176   :  { %p7125_p10 = scmp.ne.s32.totalorder %s9348_s12, %s7124_s17  ;;  %p7128_p11 = scmp.lt.u32.totalorder %s7124_s17, %s9348_s12 }
 0x178   :  { %p7130_p12 = pnand %p7128_p11, %p7125_p10 }
 0x17a   :  { %7133 = shalt.err (!%p7130_p12)
}
 0x17b   :  { %s7134_s19 = scalar_lea.vmem %s197_s25, 512  ;;  %p7139_p0 = scmp.lt.s32.totalorder %s197_s25, %s197_s25 }
 0x17c   :  { %p7135_p13 = scmp.ne.s32.totalorder %s197_s25, %s7134_s19  ;;  %p7140_p1 = scmp.lt.s32.totalorder %s7134_s19, %s7134_s19 }
 0x17e   :  { %p7141_p2 = por %p7140_p1, %p7139_p0 }
 0x180   :  { %p7142_p3 = pnand %p7141_p2, %p7135_p13 }
 0x182   :  { %7145 = shalt.err (!%p7142_p3)
}
 0x183   :  { %202 = dma.hbm_to_vmem [thread:$0]  %s9348_s12, 512, %s197_s25, [#allocation21], %s7375_s5, %s7375_s5, %s7376_s10  }
 0x184   :  { %s7146_s0 = scalar_lea.hbm %s9350_s14, 1024 }
 0x185   :  { %p7147_p4 = scmp.ne.s32.totalorder %s9350_s14, %s7146_s0  ;;  %p7150_p5 = scmp.lt.u32.totalorder %s7146_s0, %s9350_s14 }
 0x187   :  { %p7152_p6 = pnand %p7150_p5, %p7147_p4 }
 0x189   :  { %7155 = shalt.err (!%p7152_p6)
}
 0x18a   :  { %s7156_s11 = scalar_lea.vmem %s221_s8, 1024  ;;  %p7161_p8 = scmp.lt.s32.totalorder %s221_s8, %s221_s8 }
 0x18b   :  { %p7157_p7 = scmp.ne.s32.totalorder %s221_s8, %s7156_s11  ;;  %p7162_p9 = scmp.lt.s32.totalorder %s7156_s11, %s7156_s11 }
 0x18d   :  { %p7163_p10 = por %p7162_p9, %p7161_p8 }
 0x18f   :  { %p7164_p11 = pnand %p7163_p10, %p7157_p7 }
 0x191   :  { %7167 = shalt.err (!%p7164_p11)
}
 0x192   :  { %226 = dma.hbm_to_vmem [thread:$0]  %s9350_s14, 1024, %s221_s8, [#allocation24], %s7375_s5, %s7375_s5, %s7376_s10  }
 0x193   :  { %s7397_s26 = smov [#allocation28]   ;;  %s7398_s17 = smov [#allocation31]  }
 0x194   :  { %s244_s6 = sshll.u32 %s7397_s26, 4  ;;  %s269_s4 = sshll.u32 %s7398_s17, 4  ;;  %s245_s6 = int_to_ptr.vmem [resolvable:$true] %s244_s6  ;;  %s270_s4 = int_to_ptr.vmem [resolvable:$true] %s269_s4 }
 0x195   :  { %s7168_s28 = scalar_lea.hbm %s9352_s16, 256 }
 0x196   :  { %p7169_p12 = scmp.ne.s32.totalorder %s9352_s16, %s7168_s28  ;;  %p7172_p13 = scmp.lt.u32.totalorder %s7168_s28, %s9352_s16 }
 0x198   :  { %p7174_p0 = pnand %p7172_p13, %p7169_p12 }
 0x19a   :  { %7177 = shalt.err (!%p7174_p0)
}
 0x19b   :  { %s7178_s14 = scalar_lea.vmem %s245_s6, 256  ;;  %p7183_p2 = scmp.lt.s32.totalorder %s245_s6, %s245_s6 }
 0x19c   :  { %p7179_p1 = scmp.ne.s32.totalorder %s245_s6, %s7178_s14  ;;  %p7184_p3 = scmp.lt.s32.totalorder %s7178_s14, %s7178_s14 }
 0x19e   :  { %p7185_p4 = por %p7184_p3, %p7183_p2 }
 0x1a0   :  { %p7186_p5 = pnand %p7185_p4, %p7179_p1 }
 0x1a2   :  { %7189 = shalt.err (!%p7186_p5)
}
 0x1a3   :  { %250 = dma.hbm_to_vmem [thread:$0]  %s9352_s16, 256, %s245_s6, [#allocation27], %s7375_s5, %s7375_s5, %s7376_s10  }
 0x1a4   :  { %s7190_s3 = scalar_lea.hbm %s9354_s18, 16 }
 0x1a5   :  { %p7191_p6 = scmp.ne.s32.totalorder %s9354_s18, %s7190_s3  ;;  %p7194_p7 = scmp.lt.u32.totalorder %s7190_s3, %s9354_s18 }
 0x1a7   :  { %p7196_p8 = pnand %p7194_p7, %p7191_p6 }
 0x1a9   :  { %7199 = shalt.err (!%p7196_p8)
}
 0x1aa   :  { %s7200_s25 = scalar_lea.vmem %s270_s4, 16  ;;  %s7204_s26 = scalar_lea.vmem %s270_s4, 32 }
 0x1ab   :  { %p7201_p9 = scmp.ne.s32.totalorder %s270_s4, %s7200_s25  ;;  %p7205_p10 = scmp.lt.s32.totalorder %s270_s4, %s270_s4 }
 0x1ac   :  { %p7206_p11 = scmp.lt.s32.totalorder %s7204_s26, %s7200_s25 }
 0x1ae   :  { %p7207_p12 = por %p7206_p11, %p7205_p10 }
 0x1b0   :  { %p7208_p13 = pnand %p7207_p12, %p7201_p9 }
 0x1b2   :  { %7211 = shalt.err (!%p7208_p13)
}
 0x1b3   :  { %272 = dma.hbm_to_vmem [thread:$0]  %s9354_s18, 16, %s270_s4, [#allocation30]  }
 0x1b4   :  { %s7399_s6 = smov [#allocation34]   ;;  %s7400_s30 = smov [#allocation37]  }
 0x1b5   :  { %s289_s17 = sshll.u32 %s7399_s6, 4  ;;  %s308_s2 = sshll.u32 %s7400_s30, 4  ;;  %s290_s17 = int_to_ptr.vmem [resolvable:$true] %s289_s17  ;;  %s309_s2 = int_to_ptr.vmem [resolvable:$true] %s308_s2 }
 0x1b6   :  { %s7212_s21 = scalar_lea.hbm %s9356_s20, 16 }
 0x1b7   :  { %p7213_p0 = scmp.ne.s32.totalorder %s9356_s20, %s7212_s21  ;;  %p7216_p1 = scmp.lt.u32.totalorder %s7212_s21, %s9356_s20 }
 0x1b9   :  { %p7218_p2 = pnand %p7216_p1, %p7213_p0 }
 0x1bb   :  { %7221 = shalt.err (!%p7218_p2)
}
 0x1bc   :  { %s7222_s18 = scalar_lea.vmem %s290_s17, 16  ;;  %s7226_s4 = scalar_lea.vmem %s290_s17, 32 }
 0x1bd   :  { %p7223_p3 = scmp.ne.s32.totalorder %s290_s17, %s7222_s18  ;;  %p7227_p4 = scmp.lt.s32.totalorder %s290_s17, %s290_s17 }
 0x1be   :  { %p7228_p5 = scmp.lt.s32.totalorder %s7226_s4, %s7222_s18 }
 0x1c0   :  { %p7229_p6 = por %p7228_p5, %p7227_p4 }
 0x1c2   :  { %p7230_p7 = pnand %p7229_p6, %p7223_p3 }
 0x1c4   :  { %7233 = shalt.err (!%p7230_p7)
}
 0x1c5   :  { %292 = dma.hbm_to_vmem [thread:$0]  %s9356_s20, 16, %s290_s17, [#allocation33]  }
 0x1c6   :  { %s7234_s13 = scalar_lea.hbm %s9358_s22, 256 }
 0x1c7   :  { %p7235_p8 = scmp.ne.s32.totalorder %s9358_s22, %s7234_s13  ;;  %p7238_p9 = scmp.lt.u32.totalorder %s7234_s13, %s9358_s22 }
 0x1c9   :  { %p7240_p10 = pnand %p7238_p9, %p7235_p8 }
 0x1cb   :  { %7243 = shalt.err (!%p7240_p10)
}
 0x1cc   :  { %s7244_s26 = scalar_lea.vmem %s309_s2, 256  ;;  %p7249_p12 = scmp.lt.s32.totalorder %s309_s2, %s309_s2 }
 0x1cd   :  { %p7245_p11 = scmp.ne.s32.totalorder %s309_s2, %s7244_s26  ;;  %p7250_p13 = scmp.lt.s32.totalorder %s7244_s26, %s7244_s26 }
 0x1cf   :  { %p7251_p0 = por %p7250_p13, %p7249_p12 }
 0x1d1   :  { %p7252_p1 = pnand %p7251_p0, %p7245_p11 }
 0x1d3   :  { %7255 = shalt.err (!%p7252_p1)
}
 0x1d4   :  { %314 = dma.hbm_to_vmem [thread:$0]  %s9358_s22, 256, %s309_s2, [#allocation36], %s9452_s15, %s9452_s15, %s9451_s27  }
 0x1d5   :  { %7344 = dma.done.wait [#allocation3], 1024  }
 0x1d6   :  { %7345 = vsyncadd [#allocation3], 4294966272 }
 0x1d7   :  { %7346 = dma.done.wait [#allocation6], 1024  }
 0x1d8   :  { %7347 = vsyncadd [#allocation6], 4294966272 }
 0x1d9   :  { %7348 = dma.done.wait [#allocation9], 1536  }
 0x1da   :  { %7349 = vsyncadd [#allocation9], 4294965760 }
 0x1db   :  { %7350 = dma.done.wait [#allocation12], 768  }
 0x1dc   :  { %7351 = vsyncadd [#allocation12], 4294966528 }
 0x1dd   :  { %7352 = dma.done.wait [#allocation15], 384  }
 0x1de   :  { %7353 = vsyncadd [#allocation15], 4294966912 }
 0x1df   :  { %7354 = dma.done.wait [#allocation18], 1536  }
 0x1e0   :  { %7355 = vsyncadd [#allocation18], 4294965760 }
 0x1e1   :  { %7356 = dma.done.wait [#allocation21], 1536  }
 0x1e2   :  { %7357 = vsyncadd [#allocation21], 4294965760 }
 0x1e3   :  { %7358 = dma.done.wait [#allocation24], 1280  }
 0x1e4   :  { %7359 = vsyncadd [#allocation24], 4294966016 }
 0x1e5   :  { %7360 = dma.done.wait [#allocation27], 768  }
 0x1e6   :  { %7361 = vsyncadd [#allocation27], 4294966528 }
 0x1e7   :  { %7362 = dma.done.wait [#allocation30], 144  }
 0x1e8   :  { %7363 = vsyncadd [#allocation30], 4294967152 }
 0x1e9   :  { %7364 = dma.done.wait [#allocation33], 32  }
 0x1ea   :  { %7365 = vsyncadd [#allocation33], 4294967264 }
 0x1eb   :  { %7366 = dma.done.wait [#allocation36], 272  }
 0x1ec   :  { %7367 = vsyncadd [#allocation36], 4294967024  ;;  %v7401_v0 = vmov 0   ;;  %v6411_v1 = vld [vmem:[#allocation8 + $0x4] ss:$8 sps:$4 sm:$0xff]   ;;  %vm437_vm0 = vcmask 261120  }
 0x1ed   :  { %482 = vmatprep.mubr.bf16.mxu0 %v7401_v0  ;;  %v6413_v2 = vld [vmem:[#allocation8] ss:$8 sps:$4 sm:$0xff]   ;;  %450 = vmatprep.subr.bf16.mxu0 %v6411_v1  ;;  %v6414_v3 = vld [vmem:[#allocation8 + $0x14] ss:$8 sps:$4 sm:$0xff]   ;;  %v6416_v4 = vld [vmem:[#allocation8 + $0x10] ss:$8 sps:$4 sm:$0xff]  }
 0x1ee   :  { %451 = vmatpush1.bf16.msra.mxu0 %v6413_v2  ;;  %v385_v5 = vld [vmem:[#allocation2] sm:$0xff]  ;;  %v386_v6 = vld [vmem:[#allocation2 + $0x8] sm:$0xff]  ;;  %v387_v8 = vld [vmem:[#allocation2 + $0x10] sm:$0xff]  ;;  %vm551_vm1 = vcmask 523264   ;;  %vm1324_vm2 = vcmask 130048   ;;  %vm2263_vm3 = vcmask 540160  }
 0x1ef   :  { %452 = vmatprep.subr.bf16.mxu0 %v6414_v3  ;;  %v413_v7 = vpack.c.bf16 %v386_v6, %v385_v5  ;;  %v388_v9 = vld [vmem:[#allocation2 + $0x18] sm:$0xff]  ;;  %v389_v11 = vld [vmem:[#allocation2 + $0x20] sm:$0xff]  ;;  %v390_v12 = vld [vmem:[#allocation2 + $0x28] sm:$0xff]  ;;  %vm2344_vm12 = vcmask 15360   ;;  %s7404_s22 = smov 32   ;;  %vm2981_vm13 = vcmask 277760  }
 0x1f0   :  { %v414_v10 = vpack.c.bf16 %v388_v9, %v387_v8  ;;  %v415_v13 = vpack.c.bf16 %v390_v12, %v389_v11  ;;  %v391_v14 = vld [vmem:[#allocation2 + $0x30] sm:$0xff]  ;;  %v392_v15 = vld [vmem:[#allocation2 + $0x38] sm:$0xff]  ;;  %v7897_v17 = vld [vmem:[#allocation5] sm:$0xff]   ;;  %s7408_s10 = smov 16   ;;  %s7409_s6 = smov 112  }
 0x1f1   :  { %v416_v16 = vpack.c.bf16 %v392_v15, %v391_v14  ;;  %5838 = vmatprep.mubr.msk.bf16.mxu1 %vm551_vm1, %v7897_v17  ;;  %v6421_v18 = vld [vmem:[#allocation10] sm:$0xff]   ;;  %v6422_v19 = vld [vmem:[#allocation10 + $0x8] sm:$0xff]   ;;  %v6423_v20 = vld [vmem:[#allocation10 + $0x10] sm:$0xff]   ;;  %s7412_s17 = smov 98   ;;  %s7413_s30 = smov 2  }
 0x1f2   :  { %453 = vmatpush1.bf16.msra.mxu0 %v6416_v4  ;;  %v6424_v21 = vld [vmem:[#allocation10 + $0x18] sm:$0xff]   ;;  %v6425_v22 = vld [vmem:[#allocation10 + $0x20] sm:$0xff]   ;;  %v6426_v23 = vld [vmem:[#allocation10 + $0x28] sm:$0xff]   ;;  %s7414_s2 = smov 126   ;;  %s7420_s28 = smov 121  }
 0x1f3   :  { %5862 = vmatprep.subr.bf16.mxu0 %v6421_v18  ;;  %v7901_v48 = vld [vmem:[#allocation5 + $0x8] sm:$0xff]   ;;  %v7903_v49 = vld [vmem:[#allocation5 + $0x10] sm:$0xff]   ;;  %v7909_v50 = vld [vmem:[#allocation5 + $0x18] sm:$0xff]   ;;  %s7421_s19 = smov [#allocation39]   ;;  %s7422_s29 = smov [#allocation38]  }
 0x1f4   :  { %v6427_v51 = vld [vmem:[#allocation10 + $0x30] sm:$0xff]   ;;  %v6428_v52 = vld [vmem:[#allocation10 + $0x38] sm:$0xff]   ;;  %v7925_v9 = vld [vmem:[#allocation7] sm:$0xff]   ;;  %s5366_s21 = sshll.u32 %s7421_s19, 4  ;;  %s5354_s1 = sshll.u32 %s7422_s29, 4  ;;  %s5367_s21 = int_to_ptr.vmem [resolvable:$true] %s5366_s21  ;;  %s5355_s1 = int_to_ptr.vmem [resolvable:$true] %s5354_s1 }
 0x1f5   :  { %5428 = vmatmul.mubr.msk.bf16.vlgmr.msra.gmra.mrb[0].mxu0 %vm437_vm0, %v413_v7  ;;  %v6431_v11 = vld [vmem:[#allocation7 + $0x10] sm:$0xff]   ;;  %v6432_v12 = vld [vmem:[#allocation7 + $0x18] sm:$0xff]   ;;  %v6434_v14 = vld [vmem:[#allocation11 + $0x8] sm:$0xff]   ;;  %s7256_s14 = scalar_lea.vmem %s5367_s21, 1024  ;;  %p7261_p3 = scmp.lt.s32.totalorder %s5367_s21, %s5367_s21 }
 0x1f6   :  { %492 = vmatprep.mubr.bf16.mxu0 %v7401_v0  ;;  %5863 = vmatpush3.bf16.msra.mxu0 %v6421_v18  ;;  %p7257_p2 = scmp.ne.s32.totalorder %s5367_s21, %s7256_s14  ;;  %p7262_p4 = scmp.lt.s32.totalorder %s7256_s14, %s7256_s14 }
 0x1f7   :  { %5864 = vmatprep.subr.bf16.mxu0 %v6422_v19 }
 0x1f8   :  { %p7263_p5 = por %p7262_p4, %p7261_p3 }
 0x1fa   :  { %5865 = vmatpush3.bf16.msra.mxu0 %v6422_v19  ;;  %p7264_p6 = pnand %p7263_p5, %p7257_p2 }
 0x1fb   :  { %5866 = vmatprep.subr.bf16.mxu0 %v6423_v20 }
 0x1fd   :  { %5429 = vmatmul.mubr.msk.bf16.gmra.mrb[4].mxu0 %vm437_vm0, %v414_v10  ;;  %v6430_v10 = vld [vmem:[#allocation7 + $0x8] sm:$0xff]  }
 0x1fe   :  { %502 = vmatprep.mubr.bf16.mxu0 %v7401_v0  ;;  %5867 = vmatpush3.bf16.msra.mxu0 %v6423_v20 }
 0x1ff   :  { %5868 = vmatprep.subr.bf16.mxu0 %v6424_v21 }
 0x202   :  { %5869 = vmatpush3.bf16.msra.mxu0 %v6424_v21 }
 0x203   :  { %5870 = vmatprep.subr.bf16.mxu0 %v6425_v22 }
 0x205   :  { %5430 = vmatmul.mubr.msk.bf16.gmra.mrb[8].mxu0 %vm437_vm0, %v415_v13  ;;  %v6433_v13 = vld [vmem:[#allocation11] sm:$0xff]  }
 0x206   :  { %512 = vmatprep.mubr.bf16.mxu0 %v7401_v0  ;;  %5871 = vmatpush3.bf16.msra.mxu0 %v6425_v22 }
 0x207   :  { %5872 = vmatprep.subr.bf16.mxu0 %v6426_v23 }
 0x20a   :  { %5873 = vmatpush3.bf16.msra.mxu0 %v6426_v23 }
 0x20b   :  { %5874 = vmatprep.subr.bf16.mxu0 %v6427_v51 }
 0x20d   :  { %5431 = vmatmul.mubr.msk.bf16.gmra.mrb[12].mxu0 %vm437_vm0, %v416_v16 }
 0x20e   :  { %5875 = vmatpush3.bf16.msra.mxu0 %v6427_v51  ;;  %v6435_v51 = vld [vmem:[#allocation11 + $0x10] sm:$0xff]  }
 0x20f   :  { %5876 = vmatprep.subr.bf16.mxu0 %v6428_v52 }
 0x212   :  { %5877 = vmatpush3.bf16.msra.mxu0 %v6428_v52  ;;  %v6436_v52 = vld [vmem:[#allocation11 + $0x18] sm:$0xff]  }
 0x213   :  { %5902 = vmatprep.subr.bf16.mxu0 %v6433_v13 }
 0x2c8   :  { %v484_v24 = vpop.f32.mrb[0].mxu0 }
 0x2c9   :  { %v486_v25 = vpop.f32.mrb[1].mxu0 }
 0x2ca   :  { %v488_v26 = vpop.f32.mrb[2].mxu0 }
 0x2cb   :  { %v523_v27 = vpack.c.bf16 %v488_v26, %v484_v24  ;;  %v490_v28 = vpop.f32.mrb[3].mxu0 }
 0x2cc   :  { %v524_v29 = vpack.c.bf16 %v490_v28, %v486_v25 }
 0x2cd   :  { %5830 = vmatprep.subr.bf16.mxu1 %v523_v27 }
 0x2ce   :  { %5831 = vmatpush3.bf16.msra.mxu1 %v523_v27 }
 0x2d0   :  { %v494_v30 = vpop.f32.mrb[4].mxu0 }
 0x2d1   :  { %v496_v31 = vpop.f32.mrb[5].mxu0 }
 0x2d2   :  { %v498_v32 = vpop.f32.mrb[6].mxu0 }
 0x2d3   :  { %v525_v33 = vpack.c.bf16 %v498_v32, %v494_v30  ;;  %v500_v34 = vpop.f32.mrb[7].mxu0 }
 0x2d4   :  { %v526_v35 = vpack.c.bf16 %v500_v34, %v496_v31 }
 0x2d5   :  { %5832 = vmatprep.subr.bf16.mxu1 %v525_v33 }
 0x2d6   :  { %5833 = vmatpush3.bf16.msra.mxu1 %v525_v33 }
 0x2d8   :  { %v504_v36 = vpop.f32.mrb[8].mxu0 }
 0x2d9   :  { %v506_v37 = vpop.f32.mrb[9].mxu0 }
 0x2da   :  { %v508_v38 = vpop.f32.mrb[10].mxu0 }
 0x2db   :  { %v527_v39 = vpack.c.bf16 %v508_v38, %v504_v36  ;;  %v510_v40 = vpop.f32.mrb[11].mxu0 }
 0x2dc   :  { %v528_v41 = vpack.c.bf16 %v510_v40, %v506_v37 }
 0x2dd   :  { %5834 = vmatprep.subr.bf16.mxu1 %v527_v39 }
 0x2de   :  { %5835 = vmatpush3.bf16.msra.mxu1 %v527_v39 }
 0x2e0   :  { %v514_v42 = vpop.f32.mrb[12].mxu0 }
 0x2e1   :  { %v516_v43 = vpop.f32.mrb[13].mxu0 }
 0x2e2   :  { %v518_v44 = vpop.f32.mrb[14].mxu0 }
 0x2e3   :  { %v529_v45 = vpack.c.bf16 %v518_v44, %v514_v42  ;;  %v520_v46 = vpop.f32.mrb[15].mxu0 }
 0x2e4   :  { %v530_v47 = vpack.c.bf16 %v520_v46, %v516_v43 }
 0x2e5   :  { %5836 = vmatprep.subr.bf16.mxu1 %v529_v45 }
 0x2e6   :  { %5837 = vmatpush3.bf16.msra.mxu1 %v529_v45 }
 0x2e7   :  { %5846 = vmatprep.subr.bf16.mxu1 %v524_v29 }
 0x2e9   :  { %5839 = vmatmul.mubr.msk.bf16.vlgmr.msra.gmra.mrb[0].mxu1 %vm551_vm1, %v7901_v48 }
 0x2ea   :  { %5847 = vmatpush3.bf16.msra.mxu1 %v524_v29  ;;  %5842 = vmatprep.mubr.msk.bf16.mxu1 %vm551_vm1, %v7903_v49 }
 0x2eb   :  { %5848 = vmatprep.subr.bf16.mxu1 %v526_v35 }
 0x2ee   :  { %5849 = vmatpush3.bf16.msra.mxu1 %v526_v35 }
 0x2ef   :  { %5850 = vmatprep.subr.bf16.mxu1 %v528_v41 }
 0x2f1   :  { %5843 = vmatmul.mubr.msk.bf16.gmra.mrb[4].mxu1 %vm551_vm1, %v7909_v50 }
 0x2f2   :  { %5851 = vmatpush3.bf16.msra.mxu1 %v528_v41  ;;  %5854 = vmatprep.mubr.msk.bf16.mxu1 %vm551_vm1, %v7925_v9 }
 0x2f3   :  { %5852 = vmatprep.subr.bf16.mxu1 %v530_v47 }
 0x2f6   :  { %5853 = vmatpush3.bf16.msra.mxu1 %v530_v47 }
 0x2f9   :  { %5855 = vmatmul.mubr.msk.bf16.vlgmr.msra.gmra.mrb[8].mxu1 %vm551_vm1, %v6430_v10 }
 0x2fa   :  { %5858 = vmatprep.mubr.msk.bf16.mxu1 %vm551_vm1, %v6431_v11 }
 0x301   :  { %5859 = vmatmul.mubr.msk.bf16.gmra.mrb[12].mxu1 %vm551_vm1, %v6432_v12 }
 0x302   :  { %5894 = vmatprep.mubr.msk.bf16.mxu1 %vm551_vm1, %v7897_v17 }
 0x3bc   :  { %v5840_v53 = vpop.f32.mrb[0].mxu1 }
 0x3bd   :  { %v598_v54 = vpop.f32.mrb[1].mxu1  ;;  %v631_v56 = vmax.f32 %v5840_v53, 0.0 }
 0x3be   :  { %v5841_v55 = vpop.f32.mrb[2].mxu1  ;;  %v629_v59 = vmax.f32 %v598_v54, 0.0 }
 0x3bf   :  { %v632_v57 = vmax.f32 %v5841_v55, 0.0  ;;  %v601_v58 = vpop.f32.mrb[3].mxu1 }
 0x3c0   :  { %v630_v60 = vmax.f32 %v601_v58, 0.0 }
 0x3c1   :  { %v7913_v61 = vpack.c.bf16 %v632_v57, %v631_v56 }
 0x3c2   :  { %v7915_v62 = vpack.c.bf16 %v630_v60, %v629_v59 }
 0x3c4   :  { %v5844_v63 = vpop.f32.mrb[4].mxu1  ;;  %5878 = vmatprep.mubr.bf16.mxu0 %v7915_v62 }
 0x3c5   :  { %v614_v0 = vpop.f32.mrb[5].mxu1  ;;  %5879 = vmatmul.mubr.bf16.vlgmr.msra.gmra.mrb[16].mxu0 %v7913_v61  ;;  %v635_v2 = vmax.f32 %v5844_v63, 0.0 }
 0x3c6   :  { %v5845_v1 = vpop.f32.mrb[6].mxu1  ;;  %v633_v5 = vmax.f32 %v614_v0, 0.0  ;;  %5903 = vmatpush3.bf16.msra.mxu0 %v6433_v13 }
 0x3c7   :  { %v636_v3 = vmax.f32 %v5845_v1, 0.0  ;;  %v617_v4 = vpop.f32.mrb[7].mxu1  ;;  %5904 = vmatprep.subr.bf16.mxu0 %v6434_v14 }
 0x3c8   :  { %v634_v6 = vmax.f32 %v617_v4, 0.0 }
 0x3c9   :  { %v7919_v7 = vpack.c.bf16 %v636_v3, %v635_v2 }
 0x3ca   :  { %v7921_v8 = vpack.c.bf16 %v634_v6, %v633_v5  ;;  %5905 = vmatpush3.bf16.msra.mxu0 %v6434_v14  ;;  %v6437_v14 = vld [vmem:[#allocation13] sm:$0xff]  }
 0x3cb   :  { %5906 = vmatprep.subr.bf16.mxu0 %v6435_v51 }
 0x3cc   :  { %5882 = vmatprep.mubr.bf16.mxu0 %v7921_v8  ;;  %v5856_v28 = vpop.f32.mrb[8].mxu1 }
 0x3cd   :  { %5883 = vmatmul.mubr.bf16.gmra.mrb[20].mxu0 %v7919_v7  ;;  %v740_v29 = vmax.f32 %v5856_v28, 0.0  ;;  %v707_v30 = vpop.f32.mrb[9].mxu1 }
 0x3ce   :  { %v738_v31 = vmax.f32 %v707_v30, 0.0  ;;  %v5857_v32 = vpop.f32.mrb[10].mxu1  ;;  %5907 = vmatpush3.bf16.msra.mxu0 %v6435_v51 }
 0x3cf   :  { %v741_v33 = vmax.f32 %v5857_v32, 0.0  ;;  %v710_v34 = vpop.f32.mrb[11].mxu1  ;;  %5908 = vmatprep.subr.bf16.mxu0 %v6436_v52 }
 0x3d0   :  { %v739_v35 = vmax.f32 %v710_v34, 0.0 }
 0x3d1   :  { %v7966_v36 = vpack.c.bf16 %v741_v33, %v740_v29 }
 0x3d2   :  { %v7968_v37 = vpack.c.bf16 %v739_v35, %v738_v31  ;;  %5909 = vmatpush3.bf16.msra.mxu0 %v6436_v52 }
 0x3d3   :  { %5934 = vmatprep.subr.bf16.mxu0 %v6437_v14 }
 0x3d4   :  { %v5860_v38 = vpop.f32.mrb[12].mxu1 }
 0x3d5   :  { %v744_v39 = vmax.f32 %v5860_v38, 0.0  ;;  %v723_v40 = vpop.f32.mrb[13].mxu1  ;;  %v6438_v38 = vld [vmem:[#allocation13 + $0x8] sm:$0xff]  }
 0x3d6   :  { %v742_v41 = vmax.f32 %v723_v40, 0.0  ;;  %v5861_v42 = vpop.f32.mrb[14].mxu1 }
 0x3d7   :  { %v745_v43 = vmax.f32 %v5861_v42, 0.0  ;;  %v726_v44 = vpop.f32.mrb[15].mxu1 }
 0x3d8   :  { %v743_v45 = vmax.f32 %v726_v44, 0.0 }
 0x3d9   :  { %v7970_v46 = vpack.c.bf16 %v745_v43, %v744_v39 }
 0x3da   :  { %v7972_v47 = vpack.c.bf16 %v743_v45, %v742_v41 }
 0x498   :  { %v7934_v15 = vpop.f32.mrb[16].mxu0 }
 0x499   :  { %v7936_v16 = vpop.f32.mrb[17].mxu0 }
 0x49a   :  { %v7938_v18 = vpop.f32.mrb[18].mxu0 }
 0x49b   :  { %v880_v19 = vpack.c.bf16 %v7938_v18, %v7934_v15  ;;  %v7942_v20 = vpop.f32.mrb[19].mxu0 }
 0x49c   :  { %v879_v21 = vpack.c.bf16 %v7942_v20, %v7936_v16 }
 0x49e   :  { %5886 = vmatprep.subr.bf16.mxu1 %v879_v21 }
 0x49f   :  { %5887 = vmatpush3.bf16.msra.mxu1 %v879_v21 }
 0x4a0   :  { %v7946_v22 = vpop.f32.mrb[20].mxu0  ;;  %5888 = vmatprep.subr.bf16.mxu1 %v880_v19 }
 0x4a1   :  { %v7948_v23 = vpop.f32.mrb[21].mxu0 }
 0x4a2   :  { %v7950_v24 = vpop.f32.mrb[22].mxu0 }
 0x4a3   :  { %v882_v25 = vpack.c.bf16 %v7950_v24, %v7946_v22  ;;  %v7954_v26 = vpop.f32.mrb[23].mxu0  ;;  %5889 = vmatpush3.bf16.msra.mxu1 %v880_v19 }
 0x4a4   :  { %v881_v27 = vpack.c.bf16 %v7954_v26, %v7948_v23 }
 0x4a6   :  { %5890 = vmatprep.subr.bf16.mxu1 %v881_v27 }
 0x4a7   :  { %5891 = vmatpush3.bf16.msra.mxu1 %v881_v27 }
 0x4a8   :  { %5892 = vmatprep.subr.bf16.mxu1 %v882_v25 }
 0x4ab   :  { %5893 = vmatpush3.bf16.msra.mxu1 %v882_v25 }
 0x4ae   :  { %5895 = vmatmul.mubr.msk.bf16.vlgmr.msra.gmra.mrb[16].mxu1 %vm551_vm1, %v7901_v48 }
 0x4af   :  { %5898 = vmatprep.mubr.msk.bf16.mxu1 %vm551_vm1, %v7903_v49 }
 0x4b6   :  { %5899 = vmatmul.mubr.msk.bf16.gmra.mrb[20].mxu1 %vm551_vm1, %v7909_v50 }
 0x4b7   :  { %5926 = vmatprep.mubr.msk.bf16.mxu1 %vm551_vm1, %v7897_v17 }
 0x581   :  { %v5896_v53 = vpop.f32.mrb[16].mxu1 }
 0x582   :  { %v917_v54 = vpop.f32.mrb[17].mxu1  ;;  %v950_v56 = vmax.f32 %v5896_v53, 0.0 }
 0x583   :  { %v5897_v55 = vpop.f32.mrb[18].mxu1  ;;  %v948_v59 = vmax.f32 %v917_v54, 0.0 }
 0x584   :  { %v951_v57 = vmax.f32 %v5897_v55, 0.0  ;;  %v920_v58 = vpop.f32.mrb[19].mxu1 }
 0x585   :  { %v949_v60 = vmax.f32 %v920_v58, 0.0 }
 0x586   :  { %v7974_v63 = vpack.c.bf16 %v951_v57, %v950_v56 }
 0x587   :  { %v7976_v0 = vpack.c.bf16 %v949_v60, %v948_v59 }
 0x589   :  { %v5900_v1 = vpop.f32.mrb[20].mxu1  ;;  %5910 = vmatprep.mubr.msk.bf16.mxu0 %vm551_vm1, %v7976_v0 }
 0x58a   :  { %v933_v2 = vpop.f32.mrb[21].mxu1  ;;  %5911 = vmatmul.mubr.msk.bf16.vlgmr.msra.gmra.mrb[24].mxu0 %vm551_vm1, %v7974_v63  ;;  %v954_v4 = vmax.f32 %v5900_v1, 0.0 }
 0x58b   :  { %v5901_v3 = vpop.f32.mrb[22].mxu1  ;;  %v952_v10 = vmax.f32 %v933_v2, 0.0  ;;  %5935 = vmatpush3.bf16.msra.mxu0 %v6437_v14 }
 0x58c   :  { %v955_v5 = vmax.f32 %v5901_v3, 0.0  ;;  %v936_v6 = vpop.f32.mrb[23].mxu1  ;;  %5936 = vmatprep.subr.bf16.mxu0 %v6438_v38 }
 0x58d   :  { %v953_v11 = vmax.f32 %v936_v6, 0.0 }
 0x58e   :  { %v7982_v12 = vpack.c.bf16 %v955_v5, %v954_v4  ;;  %v6439_v4 = vld [vmem:[#allocation14] sm:$0xff]  }
 0x58f   :  { %v7984_v13 = vpack.c.bf16 %v953_v11, %v952_v10  ;;  %5937 = vmatpush3.bf16.msra.mxu0 %v6438_v38 }
 0x590   :  { %5962 = vmatprep.subr.bf16.mxu0 %v6439_v4 }
 0x591   :  { %5914 = vmatprep.mubr.msk.bf16.mxu0 %vm551_vm1, %v7984_v13 }
 0x592   :  { %5915 = vmatmul.mubr.msk.bf16.gmra.mrb[28].mxu0 %vm551_vm1, %v7982_v12 }
 0x65d   :  { %v7990_v19 = vpop.f32.mrb[24].mxu0 }
 0x65e   :  { %v7992_v21 = vpop.f32.mrb[25].mxu0 }
 0x65f   :  { %v7994_v25 = vpop.f32.mrb[26].mxu0 }
 0x660   :  { %v1070_v27 = vpack.c.bf16 %v7994_v25, %v7990_v19  ;;  %v7998_v28 = vpop.f32.mrb[27].mxu0 }
 0x661   :  { %v1069_v29 = vpack.c.bf16 %v7998_v28, %v7992_v21 }
 0x663   :  { %5918 = vmatprep.subr.bf16.mxu1 %v1069_v29 }
 0x664   :  { %5919 = vmatpush3.bf16.msra.mxu1 %v1069_v29 }
 0x665   :  { %v8002_v30 = vpop.f32.mrb[28].mxu0  ;;  %5920 = vmatprep.subr.bf16.mxu1 %v1070_v27 }
 0x666   :  { %v8004_v31 = vpop.f32.mrb[29].mxu0 }
 0x667   :  { %v8006_v32 = vpop.f32.mrb[30].mxu0 }
 0x668   :  { %v1072_v33 = vpack.c.bf16 %v8006_v32, %v8002_v30  ;;  %v8010_v34 = vpop.f32.mrb[31].mxu0  ;;  %5921 = vmatpush3.bf16.msra.mxu1 %v1070_v27 }
 0x669   :  { %v1071_v35 = vpack.c.bf16 %v8010_v34, %v8004_v31 }
 0x66b   :  { %5922 = vmatprep.subr.bf16.mxu1 %v1071_v35 }
 0x66c   :  { %5923 = vmatpush3.bf16.msra.mxu1 %v1071_v35 }
 0x66d   :  { %5924 = vmatprep.subr.bf16.mxu1 %v1072_v33 }
 0x670   :  { %5925 = vmatpush3.bf16.msra.mxu1 %v1072_v33 }
 0x673   :  { %5927 = vmatmul.mubr.msk.bf16.vlgmr.msra.gmra.mrb[24].mxu1 %vm551_vm1, %v7901_v48 }
 0x674   :  { %5930 = vmatprep.mubr.msk.bf16.mxu1 %vm551_vm1, %v7903_v49 }
 0x67b   :  { %5931 = vmatmul.mubr.msk.bf16.gmra.mrb[28].mxu1 %vm551_vm1, %v7909_v50 }
 0x67c   :  { %5954 = vmatprep.mubr.msk.bf16.mxu1 %vm551_vm1, %v7897_v17 }
 0x746   :  { %v5928_v39 = vpop.f32.mrb[24].mxu1 }
 0x747   :  { %v1107_v40 = vpop.f32.mrb[25].mxu1  ;;  %v1140_v42 = vmax.f32 %v5928_v39, 0.0 }
 0x748   :  { %v5929_v41 = vpop.f32.mrb[26].mxu1  ;;  %v1138_v45 = vmax.f32 %v1107_v40, 0.0 }
 0x749   :  { %v1141_v43 = vmax.f32 %v5929_v41, 0.0  ;;  %v1110_v44 = vpop.f32.mrb[27].mxu1 }
 0x74a   :  { %v1139_v51 = vmax.f32 %v1110_v44, 0.0 }
 0x74b   :  { %v8022_v52 = vpack.c.bf16 %v1141_v43, %v1140_v42 }
 0x74c   :  { %v8024_v53 = vpack.c.bf16 %v1139_v51, %v1138_v45 }
 0x74d   :  { %9458 = vst [vmem:[#allocation59_spill] sm:$0xff] %v8022_v52 }
 0x74e   :  { %9459 = vst [vmem:[#allocation60_spill] sm:$0xff] %v8024_v53  ;;  %v5932_v54 = vpop.f32.mrb[28].mxu1  ;;  %5938 = vmatprep.mubr.msk.bf16.mxu0 %vm437_vm0, %v8024_v53 }
 0x74f   :  { %v1123_v55 = vpop.f32.mrb[29].mxu1  ;;  %5939 = vmatmul.mubr.msk.bf16.vlgmr.msra.gmra.mrb[32].mxu0 %vm437_vm0, %v8022_v52  ;;  %v1144_v57 = vmax.f32 %v5932_v54, 0.0 }
 0x750   :  { %v5933_v56 = vpop.f32.mrb[30].mxu1  ;;  %v1142_v60 = vmax.f32 %v1123_v55, 0.0  ;;  %5963 = vmatpush3.bf16.msra.mxu0 %v6439_v4 }
 0x751   :  { %v1145_v58 = vmax.f32 %v5933_v56, 0.0  ;;  %v1126_v59 = vpop.f32.mrb[31].mxu1 }
 0x752   :  { %v1143_v1 = vmax.f32 %v1126_v59, 0.0 }
 0x753   :  { %v8030_v2 = vpack.c.bf16 %v1145_v58, %v1144_v57 }
 0x754   :  { %v8032_v3 = vpack.c.bf16 %v1143_v1, %v1142_v60  ;;  %v6440_v60 = vld [vmem:[#allocation16] sm:$0xff]  }
 0x755   :  { %9460 = vst [vmem:[#allocation61_spill] sm:$0xff] %v8030_v2  ;;  %5988 = vmatprep.subr.bf16.mxu0 %v6440_v60 }
 0x756   :  { %9461 = vst [vmem:[#allocation62_spill] sm:$0xff] %v8032_v3  ;;  %5942 = vmatprep.mubr.msk.bf16.mxu0 %vm437_vm0, %v8032_v3 }
 0x757   :  { %5943 = vmatmul.mubr.msk.bf16.gmra.mrb[36].mxu0 %vm437_vm0, %v8030_v2 }
 0x822   :  { %v8038_v5 = vpop.f32.mrb[32].mxu0 }
 0x823   :  { %v8040_v6 = vpop.f32.mrb[33].mxu0 }
 0x824   :  { %v8042_v10 = vpop.f32.mrb[34].mxu0 }
 0x825   :  { %v1244_v11 = vpack.c.bf16 %v8042_v10, %v8038_v5  ;;  %v8046_v14 = vpop.f32.mrb[35].mxu0 }
 0x826   :  { %v1243_v27 = vpack.c.bf16 %v8046_v14, %v8040_v6 }
 0x828   :  { %5946 = vmatprep.subr.bf16.mxu1 %v1243_v27 }
 0x829   :  { %5947 = vmatpush3.bf16.msra.mxu1 %v1243_v27 }
 0x82a   :  { %v8050_v29 = vpop.f32.mrb[36].mxu0  ;;  %5948 = vmatprep.subr.bf16.mxu1 %v1244_v11 }
 0x82b   :  { %v8052_v33 = vpop.f32.mrb[37].mxu0 }
 0x82c   :  { %v8054_v35 = vpop.f32.mrb[38].mxu0 }
 0x82d   :  { %v1246_v38 = vpack.c.bf16 %v8054_v35, %v8050_v29  ;;  %v8058_v39 = vpop.f32.mrb[39].mxu0  ;;  %5949 = vmatpush3.bf16.msra.mxu1 %v1244_v11 }
 0x82e   :  { %v1245_v40 = vpack.c.bf16 %v8058_v39, %v8052_v33 }
 0x830   :  { %5950 = vmatprep.subr.bf16.mxu1 %v1245_v40 }
 0x831   :  { %5951 = vmatpush3.bf16.msra.mxu1 %v1245_v40 }
 0x832   :  { %5952 = vmatprep.subr.bf16.mxu1 %v1246_v38 }
 0x835   :  { %5953 = vmatpush3.bf16.msra.mxu1 %v1246_v38 }
 0x838   :  { %5955 = vmatmul.mubr.msk.bf16.vlgmr.msra.gmra.mrb[32].mxu1 %vm551_vm1, %v7901_v48 }
 0x839   :  { %5958 = vmatprep.mubr.msk.bf16.mxu1 %vm551_vm1, %v7903_v49 }
 0x840   :  { %5959 = vmatmul.mubr.msk.bf16.gmra.mrb[36].mxu1 %vm551_vm1, %v7909_v50 }
 0x841   :  { %5980 = vmatprep.mubr.msk.bf16.mxu1 %vm551_vm1, %v7897_v17 }
 0x90b   :  { %v8070_v41 = vpop.f32.mrb[32].mxu1 }
 0x90c   :  { %9462 = vst [vmem:[#allocation63_spill] sm:$0xff] %v8070_v41  ;;  %5343 = vst.msk [vmem:[#allocation42 + $0x10] sm:$0xff] %vm1324_vm2, %v8070_v41  ;;  %v8074_v42 = vpop.f32.mrb[33].mxu1 }
 0x90d   :  { %9463 = vst [vmem:[#allocation64_spill] sm:$0xff] %v8074_v42  ;;  %5341 = vst.msk [vmem:[#allocation42] sm:$0xff] %vm1324_vm2, %v8074_v42  ;;  %v8078_v43 = vpop.f32.mrb[34].mxu1 }
 0x90e   :  { %9464 = vst [vmem:[#allocation65_spill] sm:$0xff] %v8078_v43  ;;  %v1315_v44 = vpack.c.bf16 %v8078_v43, %v8070_v41  ;;  %5344 = vst.msk [vmem:[#allocation42 + $0x18] sm:$0xff] %vm1324_vm2, %v8078_v43  ;;  %v8084_v45 = vpop.f32.mrb[35].mxu1 }
 0x90f   :  { %9465 = vst [vmem:[#allocation66_spill] sm:$0xff] %v8084_v45  ;;  %v1314_v51 = vpack.c.bf16 %v8084_v45, %v8074_v42  ;;  %5342 = vst.msk [vmem:[#allocation42 + $0x8] sm:$0xff] %vm1324_vm2, %v8084_v45 }
 0x911   :  { %5964 = vmatprep.mubr.msk.bf16.mxu0 %vm1324_vm2, %v1314_v51 }
 0x912   :  { %5965 = vmatmul.mubr.msk.bf16.vlgmr.msra.gmra.mrb[40].mxu0 %vm1324_vm2, %v1315_v44 }
 0x913   :  { %v8092_v54 = vpop.f32.mrb[36].mxu1  ;;  %5989 = vmatpush3.bf16.msra.mxu0 %v6440_v60 }
 0x914   :  { %9466 = vst [vmem:[#allocation67_spill] sm:$0xff] %v8092_v54  ;;  %5347 = vst.msk [vmem:[#allocation42 + $0x30] sm:$0xff] %vm1324_vm2, %v8092_v54  ;;  %v8096_v55 = vpop.f32.mrb[37].mxu1 }
 0x915   :  { %9467 = vst [vmem:[#allocation68_spill] sm:$0xff] %v8096_v55  ;;  %5345 = vst.msk [vmem:[#allocation42 + $0x20] sm:$0xff] %vm1324_vm2, %v8096_v55  ;;  %v8100_v56 = vpop.f32.mrb[38].mxu1 }
 0x916   :  { %9468 = vst [vmem:[#allocation69_spill] sm:$0xff] %v8100_v56  ;;  %v1317_v57 = vpack.c.bf16 %v8100_v56, %v8092_v54  ;;  %5348 = vst.msk [vmem:[#allocation42 + $0x38] sm:$0xff] %vm1324_vm2, %v8100_v56  ;;  %v8106_v58 = vpop.f32.mrb[39].mxu1 }
 0x917   :  { %9469 = vst [vmem:[#allocation70_spill] sm:$0xff] %v8106_v58  ;;  %v1316_v59 = vpack.c.bf16 %v8106_v58, %v8096_v55  ;;  %5346 = vst.msk [vmem:[#allocation42 + $0x28] sm:$0xff] %vm1324_vm2, %v8106_v58 }
 0x919   :  { %5968 = vmatprep.mubr.msk.bf16.mxu0 %vm1324_vm2, %v1316_v59 }
 0x91a   :  { %5969 = vmatmul.mubr.msk.bf16.gmra.mrb[44].mxu0 %vm1324_vm2, %v1317_v57 }
 0x9e5   :  { %v8114_v1 = vpop.f32.mrb[40].mxu0 }
 0x9e6   :  { %9470 = vst [vmem:[#allocation71_spill] sm:$0xff] %v8114_v1  ;;  %v8116_v4 = vpop.f32.mrb[41].mxu0 }
 0x9e7   :  { %9471 = vst [vmem:[#allocation72_spill] sm:$0xff] %v8116_v4  ;;  %v8118_v11 = vpop.f32.mrb[42].mxu0 }
 0x9e8   :  { %9472 = vst [vmem:[#allocation73_spill] sm:$0xff] %v8118_v11  ;;  %v1403_v27 = vpack.c.bf16 %v8118_v11, %v8114_v1  ;;  %v8122_v38 = vpop.f32.mrb[43].mxu0 }
 0x9e9   :  { %9473 = vst [vmem:[#allocation74_spill] sm:$0xff] %v8122_v38  ;;  %v1402_v40 = vpack.c.bf16 %v8122_v38, %v8116_v4 }
 0x9eb   :  { %5972 = vmatprep.subr.bf16.mxu1 %v1402_v40 }
 0x9ec   :  { %5973 = vmatpush3.bf16.msra.mxu1 %v1402_v40 }
 0x9ed   :  { %v8126_v44 = vpop.f32.mrb[44].mxu0  ;;  %5974 = vmatprep.subr.bf16.mxu1 %v1403_v27 }
 0x9ee   :  { %9474 = vst [vmem:[#allocation75_spill] sm:$0xff] %v8126_v44  ;;  %v8128_v51 = vpop.f32.mrb[45].mxu0 }
 0x9ef   :  { %9475 = vst [vmem:[#allocation76_spill] sm:$0xff] %v8128_v51  ;;  %v8130_v57 = vpop.f32.mrb[46].mxu0 }
 0x9f0   :  { %9476 = vst [vmem:[#allocation77_spill] sm:$0xff] %v8130_v57  ;;  %v1405_v59 = vpack.c.bf16 %v8130_v57, %v8126_v44  ;;  %v8134_v60 = vpop.f32.mrb[47].mxu0  ;;  %5975 = vmatpush3.bf16.msra.mxu1 %v1403_v27  ;;  %v6441_v27 = vld [vmem:[#allocation16 + $0x8] sm:$0xff]  }
 0x9f1   :  { %9477 = vst [vmem:[#allocation78_spill] sm:$0xff] %v8134_v60  ;;  %v1404_v56 = vpack.c.bf16 %v8134_v60, %v8128_v51  ;;  %5990 = vmatprep.subr.bf16.mxu0 %v6441_v27 }
 0x9f2   :  { %5991 = vmatpush3.bf16.msra.mxu0 %v6441_v27 }
 0x9f3   :  { %5976 = vmatprep.subr.bf16.mxu1 %v1404_v56 }
 0x9f4   :  { %5977 = vmatpush3.bf16.msra.mxu1 %v1404_v56 }
 0x9f5   :  { %5978 = vmatprep.subr.bf16.mxu1 %v1405_v59 }
 0x9f8   :  { %5979 = vmatpush3.bf16.msra.mxu1 %v1405_v59 }
 0x9fb   :  { %5981 = vmatmul.mubr.msk.bf16.vlgmr.msra.gmra.mrb[40].mxu1 %vm551_vm1, %v7901_v48 }
 0x9fc   :  { %5984 = vmatprep.mubr.msk.bf16.mxu1 %vm551_vm1, %v7903_v49 }
 0xa03   :  { %5985 = vmatmul.mubr.msk.bf16.gmra.mrb[44].mxu1 %vm551_vm1, %v7909_v50 }
 0xa04   :  { %6008 = vmatprep.mubr.msk.bf16.mxu1 %vm551_vm1, %v7897_v17 }
 0xace   :  { %v5982_v40 = vpop.f32.mrb[40].mxu1 }
 0xacf   :  { %v1440_v54 = vpop.f32.mrb[41].mxu1  ;;  %v1473_v44 = vmax.f32 %v5982_v40, 0.0 }
 0xad0   :  { %v5983_v56 = vpop.f32.mrb[42].mxu1  ;;  %v1471_v51 = vmax.f32 %v1440_v54, 0.0  ;;  %v6442_v54 = vld [vmem:[#allocation17] sm:$0xff]  }
 0xad1   :  { %v1474_v59 = vmax.f32 %v5983_v56, 0.0  ;;  %v1443_v57 = vpop.f32.mrb[43].mxu1  ;;  %6016 = vmatprep.subr.bf16.mxu0 %v6442_v54  ;;  %v6445_v56 = vld [vmem:[#allocation17 + $0x18] sm:$0xff]  }
 0xad2   :  { %v1472_v60 = vmax.f32 %v1443_v57, 0.0 }
 0xad3   :  { %v1480_v58 = vpack.c.bf16 %v1474_v59, %v1473_v44  ;;  %v6443_v44 = vld [vmem:[#allocation17 + $0x8] sm:$0xff]  }
 0xad4   :  { %v1479_v55 = vpack.c.bf16 %v1472_v60, %v1471_v51  ;;  %v6444_v60 = vld [vmem:[#allocation17 + $0x10] sm:$0xff]  }
 0xad6   :  { %v5986_v43 = vpop.f32.mrb[44].mxu1  ;;  %5992 = vmatprep.mubr.msk.bf16.mxu0 %vm437_vm0, %v1479_v55 }
 0xad7   :  { %v1456_v41 = vpop.f32.mrb[45].mxu1  ;;  %5993 = vmatmul.mubr.msk.bf16.vlgmr.msra.gmra.mrb[48].mxu0 %vm437_vm0, %v1480_v58  ;;  %v1477_v42 = vmax.f32 %v5986_v43, 0.0 }
 0xad8   :  { %v5987_v45 = vpop.f32.mrb[46].mxu1  ;;  %v1475_v53 = vmax.f32 %v1456_v41, 0.0  ;;  %6017 = vmatpush3.bf16.msra.mxu0 %v6442_v54 }
 0xad9   :  { %v1478_v2 = vmax.f32 %v5987_v45, 0.0  ;;  %v1459_v27 = vpop.f32.mrb[47].mxu1  ;;  %6018 = vmatprep.subr.bf16.mxu0 %v6443_v44 }
 0xada   :  { %v1476_v3 = vmax.f32 %v1459_v27, 0.0 }
 0xadb   :  { %v1482_v52 = vpack.c.bf16 %v1478_v2, %v1477_v42 }
 0xadc   :  { %v1481_v40 = vpack.c.bf16 %v1476_v3, %v1475_v53  ;;  %6019 = vmatpush3.bf16.msra.mxu0 %v6443_v44 }
 0xadd   :  { %6020 = vmatprep.subr.bf16.mxu0 %v6444_v60 }
 0xade   :  { %5996 = vmatprep.mubr.msk.bf16.mxu0 %vm437_vm0, %v1481_v40 }
 0xadf   :  { %5997 = vmatmul.mubr.msk.bf16.gmra.mrb[52].mxu0 %vm437_vm0, %v1482_v52 }
 0xae0   :  { %6021 = vmatpush3.bf16.msra.mxu0 %v6444_v60 }
 0xae1   :  { %6022 = vmatprep.subr.bf16.mxu0 %v6445_v56 }
 0xae4   :  { %6023 = vmatpush3.bf16.msra.mxu0 %v6445_v56 }
 0xbaa   :  { %v5994_v55 = vpop.f32.mrb[48].mxu0 }
 0xbab   :  { %v1545_v58 = vpop.f32.mrb[49].mxu0 }
 0xbac   :  { %v5995_v51 = vpop.f32.mrb[50].mxu0 }
 0xbad   :  { %v1577_v43 = vpack.c.bf16 %v5995_v51, %v5994_v55  ;;  %v1548_v45 = vpop.f32.mrb[51].mxu0 }
 0xbae   :  { %v1576_v57 = vpack.c.bf16 %v1548_v45, %v1545_v58 }
 0xbb0   :  { %6000 = vmatprep.subr.bf16.mxu1 %v1576_v57 }
 0xbb1   :  { %6001 = vmatpush3.bf16.msra.mxu1 %v1576_v57 }
 0xbb2   :  { %v5998_v2 = vpop.f32.mrb[52].mxu0  ;;  %6002 = vmatprep.subr.bf16.mxu1 %v1577_v43 }
 0xbb3   :  { %v1561_v53 = vpop.f32.mrb[53].mxu0 }
 0xbb4   :  { %v5999_v3 = vpop.f32.mrb[54].mxu0 }
 0xbb5   :  { %v1579_v41 = vpack.c.bf16 %v5999_v3, %v5998_v2  ;;  %v1564_v52 = vpop.f32.mrb[55].mxu0  ;;  %6003 = vmatpush3.bf16.msra.mxu1 %v1577_v43 }
 0xbb6   :  { %v1578_v42 = vpack.c.bf16 %v1564_v52, %v1561_v53 }
 0xbb8   :  { %6004 = vmatprep.subr.bf16.mxu1 %v1578_v42 }
 0xbb9   :  { %6005 = vmatpush3.bf16.msra.mxu1 %v1578_v42 }
 0xbba   :  { %6006 = vmatprep.subr.bf16.mxu1 %v1579_v41 }
 0xbbd   :  { %6007 = vmatpush3.bf16.msra.mxu1 %v1579_v41 }
 0xbc0   :  { %6009 = vmatmul.mubr.msk.bf16.vlgmr.msra.gmra.mrb[48].mxu1 %vm551_vm1, %v7901_v48 }
 0xbc1   :  { %6012 = vmatprep.mubr.msk.bf16.mxu1 %vm551_vm1, %v7903_v49 }
 0xbc8   :  { %6013 = vmatmul.mubr.msk.bf16.gmra.mrb[52].mxu1 %vm551_vm1, %v7909_v50 }
 0xbc9   :  { %6040 = vmatprep.mubr.msk.bf16.mxu1 %vm551_vm1, %v7897_v17 }
 0xc93   :  { %v6010_v59 = vpop.f32.mrb[48].mxu1 }
 0xc94   :  { %v1614_v27 = vpop.f32.mrb[49].mxu1  ;;  %v1647_v54 = vmax.f32 %v6010_v59, 0.0 }
 0xc95   :  { %v6011_v40 = vpop.f32.mrb[50].mxu1  ;;  %v1645_v58 = vmax.f32 %v1614_v27, 0.0  ;;  %v6446_v27 = vld [vmem:[#allocation19] sm:$0xff]  }
 0xc96   :  { %v1648_v44 = vmax.f32 %v6011_v40, 0.0  ;;  %v1617_v55 = vpop.f32.mrb[51].mxu1  ;;  %v6447_v40 = vld [vmem:[#allocation19 + $0x8] sm:$0xff]   ;;  %6048 = vmatprep.subr.bf16.mxu0 %v6446_v27 }
 0xc97   :  { %v1646_v51 = vmax.f32 %v1617_v55, 0.0  ;;  %v6450_v55 = vld [vmem:[#allocation19 + $0x20] sm:$0xff]  }
 0xc98   :  { %v1654_v43 = vpack.c.bf16 %v1648_v44, %v1647_v54  ;;  %v6448_v54 = vld [vmem:[#allocation19 + $0x10] sm:$0xff]   ;;  %v6449_v44 = vld [vmem:[#allocation19 + $0x18] sm:$0xff]  }
 0xc99   :  { %v1653_v45 = vpack.c.bf16 %v1646_v51, %v1645_v58  ;;  %v6451_v58 = vld [vmem:[#allocation19 + $0x28] sm:$0xff]  }
 0xc9b   :  { %v6014_v57 = vpop.f32.mrb[52].mxu1  ;;  %6024 = vmatprep.mubr.msk.bf16.mxu0 %vm551_vm1, %v1653_v45 }
 0xc9c   :  { %v1630_v2 = vpop.f32.mrb[53].mxu1  ;;  %6025 = vmatmul.mubr.msk.bf16.vlgmr.msra.gmra.mrb[56].mxu0 %vm551_vm1, %v1654_v43  ;;  %v1651_v3 = vmax.f32 %v6014_v57, 0.0 }
 0xc9d   :  { %v6015_v53 = vpop.f32.mrb[54].mxu1  ;;  %v1649_v42 = vmax.f32 %v1630_v2, 0.0  ;;  %6049 = vmatpush3.bf16.msra.mxu0 %v6446_v27  ;;  %v6453_v27 = vld [vmem:[#allocation19 + $0x38] sm:$0xff]  }
 0xc9e   :  { %v1652_v41 = vmax.f32 %v6015_v53, 0.0  ;;  %v1633_v52 = vpop.f32.mrb[55].mxu1  ;;  %6050 = vmatprep.subr.bf16.mxu0 %v6447_v40 }
 0xc9f   :  { %v1650_v60 = vmax.f32 %v1633_v52, 0.0 }
 0xca0   :  { %v1656_v56 = vpack.c.bf16 %v1652_v41, %v1651_v3 }
 0xca1   :  { %v1655_v59 = vpack.c.bf16 %v1650_v60, %v1649_v42  ;;  %6051 = vmatpush3.bf16.msra.mxu0 %v6447_v40 }
 0xca2   :  { %6052 = vmatprep.subr.bf16.mxu0 %v6448_v54 }
 0xca3   :  { %6028 = vmatprep.mubr.msk.bf16.mxu0 %vm551_vm1, %v1655_v59  ;;  %v6452_v59 = vld [vmem:[#allocation19 + $0x30] sm:$0xff]  }
 0xca4   :  { %6029 = vmatmul.mubr.msk.bf16.gmra.mrb[60].mxu0 %vm551_vm1, %v1656_v56 }
 0xca5   :  { %6053 = vmatpush3.bf16.msra.mxu0 %v6448_v54 }
 0xca6   :  { %6054 = vmatprep.subr.bf16.mxu0 %v6449_v44 }
 0xca9   :  { %6055 = vmatpush3.bf16.msra.mxu0 %v6449_v44 }
 0xcaa   :  { %6056 = vmatprep.subr.bf16.mxu0 %v6450_v55 }
 0xcad   :  { %6057 = vmatpush3.bf16.msra.mxu0 %v6450_v55 }
 0xcae   :  { %6058 = vmatprep.subr.bf16.mxu0 %v6451_v58 }
 0xcb1   :  { %6059 = vmatpush3.bf16.msra.mxu0 %v6451_v58 }
 0xcb2   :  { %6060 = vmatprep.subr.bf16.mxu0 %v6452_v59 }
 0xcb5   :  { %6061 = vmatpush3.bf16.msra.mxu0 %v6452_v59 }
 0xcb6   :  { %6062 = vmatprep.subr.bf16.mxu0 %v6453_v27 }
 0xcb9   :  { %6063 = vmatpush3.bf16.msra.mxu0 %v6453_v27 }
 0xd6f   :  { %v6026_v51 = vpop.f32.mrb[56].mxu0 }
 0xd70   :  { %v1735_v43 = vpop.f32.mrb[57].mxu0 }
 0xd71   :  { %v6027_v45 = vpop.f32.mrb[58].mxu0 }
 0xd72   :  { %v1767_v57 = vpack.c.bf16 %v6027_v45, %v6026_v51  ;;  %v1738_v2 = vpop.f32.mrb[59].mxu0 }
 0xd73   :  { %v1766_v53 = vpack.c.bf16 %v1738_v2, %v1735_v43 }
 0xd75   :  { %6032 = vmatprep.subr.bf16.mxu1 %v1766_v53 }
 0xd76   :  { %6033 = vmatpush3.bf16.msra.mxu1 %v1766_v53 }
 0xd77   :  { %v6030_v3 = vpop.f32.mrb[60].mxu0  ;;  %6034 = vmatprep.subr.bf16.mxu1 %v1767_v57 }
 0xd78   :  { %v1751_v41 = vpop.f32.mrb[61].mxu0 }
 0xd79   :  { %v6031_v52 = vpop.f32.mrb[62].mxu0 }
 0xd7a   :  { %v1769_v42 = vpack.c.bf16 %v6031_v52, %v6030_v3  ;;  %v1754_v60 = vpop.f32.mrb[63].mxu0  ;;  %6035 = vmatpush3.bf16.msra.mxu1 %v1767_v57 }
 0xd7b   :  { %v1768_v56 = vpack.c.bf16 %v1754_v60, %v1751_v41 }
 0xd7d   :  { %6036 = vmatprep.subr.bf16.mxu1 %v1768_v56 }
 0xd7e   :  { %6037 = vmatpush3.bf16.msra.mxu1 %v1768_v56 }
 0xd7f   :  { %6038 = vmatprep.subr.bf16.mxu1 %v1769_v42 }
 0xd82   :  { %6039 = vmatpush3.bf16.msra.mxu1 %v1769_v42 }
 0xd85   :  { %6041 = vmatmul.mubr.msk.bf16.vlgmr.msra.gmra.mrb[56].mxu1 %vm551_vm1, %v7901_v48 }
 0xd86   :  { %6044 = vmatprep.mubr.msk.bf16.mxu1 %vm551_vm1, %v7903_v49 }
 0xd8d   :  { %6045 = vmatmul.mubr.msk.bf16.gmra.mrb[60].mxu1 %vm551_vm1, %v7909_v50 }
 0xd8e   :  { %6080 = vmatprep.mubr.msk.bf16.mxu1 %vm551_vm1, %v7897_v17 }
 0xe58   :  { %v6042_v40 = vpop.f32.mrb[56].mxu1 }
 0xe59   :  { %v1804_v54 = vpop.f32.mrb[57].mxu1  ;;  %v1837_v55 = vmax.f32 %v6042_v40, 0.0 }
 0xe5a   :  { %v6043_v44 = vpop.f32.mrb[58].mxu1  ;;  %v1835_v43 = vmax.f32 %v1804_v54, 0.0 }
 0xe5b   :  { %v1838_v58 = vmax.f32 %v6043_v44, 0.0  ;;  %v1807_v51 = vpop.f32.mrb[59].mxu1 }
 0xe5c   :  { %v1836_v45 = vmax.f32 %v1807_v51, 0.0 }
 0xe5d   :  { %v1844_v57 = vpack.c.bf16 %v1838_v58, %v1837_v55 }
 0xe5e   :  { %v1843_v2 = vpack.c.bf16 %v1836_v45, %v1835_v43 }
 0xe60   :  { %v6046_v53 = vpop.f32.mrb[60].mxu1  ;;  %6064 = vmatprep.mubr.bf16.mxu0 %v1843_v2 }
 0xe61   :  { %v1820_v3 = vpop.f32.mrb[61].mxu1  ;;  %6065 = vmatmul.mubr.bf16.vlgmr.msra.gmra.mrb[64].mxu0 %v1844_v57  ;;  %v1841_v41 = vmax.f32 %v6046_v53, 0.0 }
 0xe62   :  { %v6047_v17 = vpop.f32.mrb[62].mxu1  ;;  %v1839_v60 = vmax.f32 %v1820_v3, 0.0 }
 0xe63   :  { %v1842_v52 = vmax.f32 %v6047_v17, 0.0  ;;  %v1823_v42 = vpop.f32.mrb[63].mxu1  ;;  %v6454_v17 = vld [vmem:[#allocation25] sm:$0xff]  }
 0xe64   :  { %v1840_v56 = vmax.f32 %v1823_v42, 0.0  ;;  %v6457_v42 = vld [vmem:[#allocation25 + $0x18] sm:$0xff]  }
 0xe65   :  { %v1846_v59 = vpack.c.bf16 %v1842_v52, %v1841_v41  ;;  %v6455_v41 = vld [vmem:[#allocation25 + $0x8] sm:$0xff]   ;;  %v6456_v52 = vld [vmem:[#allocation25 + $0x10] sm:$0xff]  }
 0xe66   :  { %v1845_v27 = vpack.c.bf16 %v1840_v56, %v1839_v60  ;;  %v6458_v60 = vld [vmem:[#allocation25 + $0x20] sm:$0xff]   ;;  %v6460_v56 = vld [vmem:[#allocation25 + $0x30] sm:$0xff]  }
 0xe68   :  { %6068 = vmatprep.mubr.bf16.mxu0 %v1845_v27 }
 0xe69   :  { %6069 = vmatmul.mubr.bf16.gmra.mrb[68].mxu0 %v1846_v59 }
 0xf34   :  { %v6066_v40 = vpop.f32.mrb[64].mxu0 }
 0xf35   :  { %v1945_v44 = vpop.f32.mrb[65].mxu0 }
 0xf36   :  { %v6067_v54 = vpop.f32.mrb[66].mxu0 }
 0xf37   :  { %v1977_v51 = vpack.c.bf16 %v6067_v54, %v6066_v40  ;;  %v1948_v55 = vpop.f32.mrb[67].mxu0 }
 0xf38   :  { %v1976_v58 = vpack.c.bf16 %v1948_v55, %v1945_v44 }
 0xf3a   :  { %6072 = vmatprep.subr.bf16.mxu1 %v1976_v58 }
 0xf3b   :  { %6073 = vmatpush3.bf16.msra.mxu1 %v1976_v58 }
 0xf3c   :  { %v6070_v43 = vpop.f32.mrb[68].mxu0  ;;  %6074 = vmatprep.subr.bf16.mxu1 %v1977_v51 }
 0xf3d   :  { %v1961_v45 = vpop.f32.mrb[69].mxu0 }
 0xf3e   :  { %v6071_v57 = vpop.f32.mrb[70].mxu0 }
 0xf3f   :  { %v1979_v2 = vpack.c.bf16 %v6071_v57, %v6070_v43  ;;  %v1964_v53 = vpop.f32.mrb[71].mxu0  ;;  %6075 = vmatpush3.bf16.msra.mxu1 %v1977_v51  ;;  %v5533_v57 = vld [vmem:[#allocation31] ss:$0 sm:$0xff] }
 0xf40   :  { %v1978_v3 = vpack.c.bf16 %v1964_v53, %v1961_v45 }
 0xf42   :  { %6076 = vmatprep.subr.bf16.mxu1 %v1978_v3 }
 0xf43   :  { %6077 = vmatpush3.bf16.msra.mxu1 %v1978_v3 }
 0xf44   :  { %6078 = vmatprep.subr.bf16.mxu1 %v1979_v2 }
 0xf47   :  { %6079 = vmatpush3.bf16.msra.mxu1 %v1979_v2 }
 0xf48   :  { %6088 = vmatprep.subr.bf16.mxu1 %v6454_v17 }
 0xf4a   :  { %6081 = vmatmul.mubr.msk.bf16.vlgmr.msra.gmra.mrb[64].mxu1 %vm551_vm1, %v7901_v48  ;;  %v6459_v48 = vld [vmem:[#allocation25 + $0x28] sm:$0xff]  }
 0xf4b   :  { %6089 = vmatpush3.bf16.msra.mxu1 %v6454_v17  ;;  %6084 = vmatprep.mubr.msk.bf16.mxu1 %vm551_vm1, %v7903_v49  ;;  %v6461_v49 = vld [vmem:[#allocation25 + $0x38] sm:$0xff]  }
 0xf4c   :  { %6090 = vmatprep.subr.bf16.mxu1 %v6455_v41 }
 0xf4f   :  { %6091 = vmatpush3.bf16.msra.mxu1 %v6455_v41 }
 0xf50   :  { %6092 = vmatprep.subr.bf16.mxu1 %v6456_v52 }
 0xf52   :  { %6085 = vmatmul.mubr.msk.bf16.gmra.mrb[68].mxu1 %vm551_vm1, %v7909_v50 }
 0xf53   :  { %6093 = vmatpush3.bf16.msra.mxu1 %v6456_v52  ;;  %6104 = vmatprep.mubr.bf16.mxu1 %v7968_v37 }
 0xf54   :  { %6094 = vmatprep.subr.bf16.mxu1 %v6457_v42 }
 0xf57   :  { %6095 = vmatpush3.bf16.msra.mxu1 %v6457_v42 }
 0xf58   :  { %6096 = vmatprep.subr.bf16.mxu1 %v6458_v60 }
 0xf5b   :  { %6097 = vmatpush3.bf16.msra.mxu1 %v6458_v60 }
 0xf5c   :  { %6098 = vmatprep.subr.bf16.mxu1 %v6459_v48 }
 0xf5f   :  { %6099 = vmatpush3.bf16.msra.mxu1 %v6459_v48 }
 0xf60   :  { %6100 = vmatprep.subr.bf16.mxu1 %v6460_v56 }
 0xf63   :  { %6101 = vmatpush3.bf16.msra.mxu1 %v6460_v56 }
 0xf64   :  { %6102 = vmatprep.subr.bf16.mxu1 %v6461_v49 }
 0xf67   :  { %6103 = vmatpush3.bf16.msra.mxu1 %v6461_v49 }
 0xf6a   :  { %6105 = vmatmul.mubr.bf16.vlgmr.msra.gmra.mrb[72].mxu1 %v7966_v36 }
 0xf6b   :  { %6108 = vmatprep.mubr.bf16.mxu1 %v7972_v47 }
 0xf72   :  { %6109 = vmatmul.mubr.bf16.gmra.mrb[76].mxu1 %v7970_v46 }
 0xf73   :  { %6144 = vmatprep.mubr.msk.bf16.mxu1 %vm551_vm1, %v7925_v9 }
0x101d   :  { %v6082_v50 = vpop.f32.mrb[64].mxu1 }
0x101e   :  { %2047 = vst.msk [vmem:[#allocation38 + $0x10] sm:$0xff] %vm437_vm0, %v6082_v50  ;;  %v2014_v59 = vpop.f32.mrb[65].mxu1 }
0x101f   :  { %2045 = vst.msk [vmem:[#allocation38] sm:$0xff] %vm437_vm0, %v2014_v59  ;;  %v6083_v27 = vpop.f32.mrb[66].mxu1 }
0x1020   :  { %2048 = vst.msk [vmem:[#allocation38 + $0x18] sm:$0xff] %vm437_vm0, %v6083_v27  ;;  %v2017_v40 = vpop.f32.mrb[67].mxu1 }
0x1021   :  { %2046 = vst.msk [vmem:[#allocation38 + $0x8] sm:$0xff] %vm437_vm0, %v2017_v40 }
0x1025   :  { %v6086_v44 = vpop.f32.mrb[68].mxu1 }
0x1026   :  { %2051 = vst.msk [vmem:[#allocation38 + $0x30] sm:$0xff] %vm437_vm0, %v6086_v44  ;;  %v2030_v54 = vpop.f32.mrb[69].mxu1 }
0x1027   :  { %2049 = vst.msk [vmem:[#allocation38 + $0x20] sm:$0xff] %vm437_vm0, %v2030_v54  ;;  %v6087_v51 = vpop.f32.mrb[70].mxu1 }
0x1028   :  { %2052 = vst.msk [vmem:[#allocation38 + $0x38] sm:$0xff] %vm437_vm0, %v6087_v51  ;;  %v2033_v9 = vpop.f32.mrb[71].mxu1 }
0x1029   :  { %2050 = vst.msk [vmem:[#allocation38 + $0x28] sm:$0xff] %vm437_vm0, %v2033_v9 }
0x103d   :  { %v8190_v55 = vpop.f32.mrb[72].mxu1 }
0x103e   :  { %2194 = vrot.lane.b32.xlu1 %v8190_v55, %s7375_s5  ;;  %v8194_v58 = vpop.f32.mrb[73].mxu1 }
0x103f   :  { %2190 = vrot.lane.b32.xlu0 %v8194_v58, %s7375_s5  ;;  %v8198_v43 = vpop.f32.mrb[74].mxu1 }
0x1040   :  { %v8200_v45 = vpop.f32.mrb[75].mxu1 }
0x1041   :  { %9478 = vst [vmem:[#allocation79_spill] sm:$0xff] %v8200_v45 }
0x1042   :  { %2196 = vrot.lane.b32.xlu1 %v8198_v43, %s7375_s5 }
0x1043   :  { %2192 = vrot.lane.b32.xlu0 %v8200_v45, %s7375_s5 }
0x1045   :  { %v8206_v2 = vpop.f32.mrb[76].mxu1 }
0x1046   :  { %v8208_v53 = vpop.f32.mrb[77].mxu1 }
0x1047   :  { %2228 = vrot.lane.b32.xlu0 %v5533_v57, %s7375_s5  ;;  %2198 = vrot.lane.b32.xlu1 %v8208_v53, %s7375_s5  ;;  %v8213_v3 = vpop.f32.mrb[78].mxu1 }
0x1048   :  { %9479 = vst [vmem:[#allocation80_spill] sm:$0xff] %v8213_v3  ;;  %v8215_v17 = vpop.f32.mrb[79].mxu1 }
0x1049   :  { %9480 = vst [vmem:[#allocation81_spill] sm:$0xff] %v8215_v17 }
0x104b   :  { %2202 = vrot.lane.b32.xlu1 %v8206_v2, %s7375_s5  ;;  %2200 = vrot.lane.b32.xlu0 %v8215_v17, %s7375_s5 }
0x104f   :  { %2204 = vrot.lane.b32.xlu0 %v8213_v3, %s7375_s5 }
0x10b0   :  { %v2195_v41 = vpop.permute.xlu1 %2194 }
0x10b1   :  { %v2191_v52 = vpop.permute.xlu0 %2190  ;;  %v2216_v50 = vadd.f32 %v7934_v15, %v2195_v41 }
0x10b2   :  { %v2214_v48 = vadd.f32 %v2191_v52, %v7936_v16 }
0x10b4   :  { %v2197_v42 = vpop.permute.xlu1 %2196 }
0x10b5   :  { %v2193_v60 = vpop.permute.xlu0 %2192  ;;  %v2217_v56 = vadd.f32 %v7938_v18, %v2197_v42 }
0x10b6   :  { %v2215_v49 = vadd.f32 %v2193_v60, %v7942_v20 }
0x10b9   :  { %v2229_v59 = vpop.permute.xlu0 %2228  ;;  %v2199_v27 = vpop.permute.xlu1 %2198 }
0x10ba   :  { %v2218_v40 = vadd.f32 %v2199_v27, %v7948_v23  ;;  %v2231_v44 = vadd.f32 %v2229_v59, %v2214_v48  ;;  %v2232_v54 = vadd.f32 %v2229_v59, %v2215_v49  ;;  %v2234_v51 = vadd.f32 %v2229_v59, %v2217_v56 }
0x10bb   :  { %v2233_v9 = vadd.f32 %v2229_v59, %v2216_v50 }
0x10bc   :  { %v2235_v57 = vadd.f32 %v2229_v59, %v2218_v40  ;;  %vm2239_vm4 = vcmp.gt.f32.partialorder %v2231_v44, 0.0  ;;  %v2247_v1 = vmul.f32 0.01, %v2231_v44  ;;  %vm2240_vm5 = vcmp.gt.f32.partialorder %v2232_v54, 0.0 }
0x10bd   :  { %v2203_v16 = vpop.permute.xlu1 %2202  ;;  %v2201_v52 = vpop.permute.xlu0 %2200  ;;  %v2248_v18 = vmul.f32 0.01, %v2232_v54  ;;  %vm2242_vm6 = vcmp.gt.f32.partialorder %v2234_v51, 0.0  ;;  %v2250_v20 = vmul.f32 0.01, %v2234_v51  ;;  %vm2241_vm7 = vcmp.gt.f32.partialorder %v2233_v9, 0.0 }
0x10be   :  { %v2220_v15 = vadd.f32 %v7946_v22, %v2203_v16  ;;  %v2219_v41 = vadd.f32 %v2201_v52, %v7954_v26  ;;  %v2255_v23 = vsel %vm2239_vm4, %v2231_v44, %v2247_v1  ;;  %v2249_v42 = vmul.f32 0.01, %v2233_v9 }
0x10bf   :  { %v2264_v60 = vsel %vm2263_vm3, %v2255_v23, -inf  ;;  %v2256_v48 = vsel %vm2240_vm5, %v2232_v54, %v2248_v18  ;;  %v2258_v50 = vsel %vm2242_vm6, %v2234_v51, %v2250_v20  ;;  %v2251_v11 = vmul.f32 0.01, %v2235_v57 }
0x10c0   :  { %v2236_v56 = vadd.f32 %v2229_v59, %v2219_v41  ;;  %2265 = vmax.xlane.f32.xlu1 %v2264_v60  ;;  %v2267_v49 = vsel %vm2263_vm3, %v2256_v48, -inf  ;;  %v2237_v27 = vadd.f32 %v2229_v59, %v2220_v15  ;;  %v2257_v38 = vsel %vm2241_vm7, %v2233_v9, %v2249_v42 }
0x10c1   :  { %2268 = vmax.xlane.f32.xlu0 %v2267_v49  ;;  %v2205_v40 = vpop.permute.xlu0 %2204  ;;  %vm2243_vm8 = vcmp.gt.f32.partialorder %v2235_v57, 0.0  ;;  %v2273_v26 = vsel %vm2263_vm3, %v2258_v50, -inf  ;;  %v2270_v44 = vsel %vm2263_vm3, %v2257_v38, -inf }
0x10c2   :  { %v2221_v4 = vadd.f32 %v7950_v24, %v2205_v40  ;;  %vm2244_vm9 = vcmp.gt.f32.partialorder %v2236_v56, 0.0  ;;  %v2252_v22 = vmul.f32 0.01, %v2236_v56  ;;  %v2259_v16 = vsel %vm2243_vm8, %v2235_v57, %v2251_v11 }
0x10c3   :  { %v2253_v51 = vmul.f32 0.01, %v2237_v27  ;;  %vm2245_vm10 = vcmp.gt.f32.partialorder %v2237_v27, 0.0  ;;  %v2276_v24 = vsel %vm2263_vm3, %v2259_v16, -inf }
0x10c4   :  { %v2238_v1 = vadd.f32 %v2229_v59, %v2221_v4  ;;  %2274 = vmax.xlane.f32.xlu1 %v2273_v26  ;;  %v2260_v54 = vsel %vm2244_vm9, %v2236_v56, %v2252_v22  ;;  %vm3662_vm9 = vcmask 146560  }
0x10c5   :  { %2271 = vmax.xlane.f32.xlu0 %v2270_v44  ;;  %v2279_v9 = vsel %vm2263_vm3, %v2260_v54, -inf  ;;  %v2261_v20 = vsel %vm2245_vm10, %v2237_v27, %v2253_v51 }
0x10c6   :  { %vm2246_vm11 = vcmp.gt.f32.partialorder %v2238_v1, 0.0  ;;  %v2254_v52 = vmul.f32 0.01, %v2238_v1  ;;  %v2282_v59 = vsel %vm2263_vm3, %v2261_v20, -inf }
0x10c8   :  { %2280 = vmax.xlane.f32.xlu1 %v2279_v9  ;;  %v2262_v18 = vsel %vm2246_vm11, %v2238_v1, %v2254_v52 }
0x10c9   :  { %2277 = vmax.xlane.f32.xlu0 %v2276_v24  ;;  %v2285_v4 = vsel %vm2263_vm3, %v2262_v18, -inf }
0x10cc   :  { %2286 = vmax.xlane.f32.xlu1 %v2285_v4 }
0x10cd   :  { %2283 = vmax.xlane.f32.xlu0 %v2282_v59 }
0x114d   :  { %v2266_v15 = vpop.xlane.xlu1 %2265 }
0x114e   :  { %v2288_v11 = vsub.f32 %v2255_v23, %v2266_v15  ;;  %v2269_v57 = vpop.xlane.xlu0 %2268 }
0x114f   :  { %v2289_v41 = vsub.f32 %v2256_v48, %v2269_v57 }
0x1150   :  { %v2296_v42 = vmul.f32 1.442695, %v2288_v11 }
0x1151   :  { %v2298_v60 = vmul.f32 1.442695, %v2289_v41  ;;  %v2275_v56 = vpop.xlane.xlu1 %2274 }
0x1152   :  { %6483 = vpow2.f32 %v2296_v42  ;;  %v2291_v49 = vsub.f32 %v2258_v50, %v2275_v56  ;;  %v2272_v40 = vpop.xlane.xlu0 %2271 }
0x1153   :  { %6485 = vpow2.f32 %v2298_v60  ;;  %v2290_v22 = vsub.f32 %v2257_v38, %v2272_v40 }
0x1154   :  { %v2302_v26 = vmul.f32 1.442695, %v2291_v49 }
0x1155   :  { %v2300_v27 = vmul.f32 1.442695, %v2290_v22  ;;  %v2281_v1 = vpop.xlane.xlu1 %2280 }
0x1156   :  { %6487 = vpow2.f32 %v2302_v26  ;;  %v2293_v44 = vsub.f32 %v2260_v54, %v2281_v1  ;;  %v2278_v51 = vpop.xlane.xlu0 %2277 }
0x1157   :  { %6489 = vpow2.f32 %v2300_v27  ;;  %v2292_v52 = vsub.f32 %v2259_v16, %v2278_v51 }
0x1158   :  { %v2306_v9 = vmul.f32 1.442695, %v2293_v44 }
0x1159   :  { %v2304_v23 = vmul.f32 1.442695, %v2292_v52  ;;  %v2287_v24 = vpop.xlane.xlu1 %2286 }
0x115a   :  { %6491 = vpow2.f32 %v2306_v9  ;;  %v2295_v48 = vsub.f32 %v2262_v18, %v2287_v24  ;;  %v2284_v4 = vpop.xlane.xlu0 %2283 }
0x115b   :  { %6493 = vpow2.f32 %v2304_v23  ;;  %v2294_v59 = vsub.f32 %v2261_v20, %v2284_v4 }
0x115c   :  { %v6484_v50 = vpop.eup %6483  ;;  %v2310_v15 = vmul.f32 1.442695, %v2295_v48 }
0x115d   :  { %v6486_v11 = vpop.eup %6485  ;;  %v2308_v38 = vmul.f32 1.442695, %v2294_v59  ;;  %2320 = vrot.lane.b32.xlu0 %v6484_v50, %s7375_s5 }
0x115e   :  { %6495 = vpow2.f32 %v2310_v15  ;;  %2322 = vrot.lane.b32.xlu1 %v6486_v11, %s7375_s5 }
0x115f   :  { %6497 = vpow2.f32 %v2308_v38 }
0x1160   :  { %v6488_v54 = vpop.eup %6487 }
0x1161   :  { %v8241_v16 = vpop.eup %6489  ;;  %2326 = vrot.lane.b32.xlu0 %v6488_v54, %s7375_s5 }
0x1162   :  { %2324 = vrot.lane.b32.xlu1 %v8241_v16, %s7375_s5 }
0x1164   :  { %v8246_v18 = vpop.eup %6491 }
0x1165   :  { %v8248_v20 = vpop.eup %6493  ;;  %2330 = vrot.lane.b32.xlu0 %v8246_v18, %s7375_s5 }
0x1166   :  { %2328 = vrot.lane.b32.xlu1 %v8248_v20, %s7375_s5 }
0x1168   :  { %v8254_v57 = vpop.eup %6495 }
0x1169   :  { %v8256_v41 = vpop.eup %6497  ;;  %2334 = vrot.lane.b32.xlu0 %v8254_v57, %s7375_s5 }
0x116a   :  { %2332 = vrot.lane.b32.xlu1 %v8256_v41, %s7375_s5 }
0x11cf   :  { %v2321_v42 = vpop.permute.xlu0 %2320 }
0x11d0   :  { %v2323_v60 = vpop.permute.xlu1 %2322  ;;  %v2345_v56 = vsel %vm2344_vm12, %v2321_v42, 0.0 }
0x11d1   :  { %v2348_v49 = vsel %vm2344_vm12, %v2323_v60, 0.0  ;;  %2346 = vadd.xlane.f32.xlu1 %v2345_v56 }
0x11d2   :  { %2349 = vadd.xlane.f32.xlu0 %v2348_v49 }
0x11d3   :  { %v2327_v40 = vpop.permute.xlu0 %2326 }
0x11d4   :  { %v2325_v22 = vpop.permute.xlu1 %2324  ;;  %v2354_v26 = vsel %vm2344_vm12, %v2327_v40, 0.0 }
0x11d5   :  { %v2351_v27 = vsel %vm2344_vm12, %v2325_v22, 0.0  ;;  %2355 = vadd.xlane.f32.xlu1 %v2354_v26 }
0x11d6   :  { %2352 = vadd.xlane.f32.xlu0 %v2351_v27 }
0x11d7   :  { %v2331_v1 = vpop.permute.xlu0 %2330 }
0x11d8   :  { %v2329_v44 = vpop.permute.xlu1 %2328  ;;  %v2360_v51 = vsel %vm2344_vm12, %v2331_v1, 0.0 }
0x11d9   :  { %v2357_v52 = vsel %vm2344_vm12, %v2329_v44, 0.0  ;;  %2361 = vadd.xlane.f32.xlu1 %v2360_v51 }
0x11da   :  { %2358 = vadd.xlane.f32.xlu0 %v2357_v52 }
0x11db   :  { %v2335_v9 = vpop.permute.xlu0 %2334 }
0x11dc   :  { %v2333_v23 = vpop.permute.xlu1 %2332  ;;  %v2366_v24 = vsel %vm2344_vm12, %v2335_v9, 0.0 }
0x11dd   :  { %v2363_v48 = vsel %vm2344_vm12, %v2333_v23, 0.0  ;;  %2367 = vadd.xlane.f32.xlu1 %v2366_v24 }
0x11de   :  { %2364 = vadd.xlane.f32.xlu0 %v2363_v48 }
0x125e   :  { %v2347_v4 = vpop.xlane.xlu1 %2346 }
0x125f   :  { %6499 = vrcp.f32 %v2347_v4  ;;  %v2350_v59 = vpop.xlane.xlu0 %2349 }
0x1260   :  { %6501 = vrcp.f32 %v2350_v59 }
0x1262   :  { %v2356_v15 = vpop.xlane.xlu1 %2355 }
0x1263   :  { %6503 = vrcp.f32 %v2356_v15  ;;  %v2353_v38 = vpop.xlane.xlu0 %2352 }
0x1264   :  { %6505 = vrcp.f32 %v2353_v38 }
0x1266   :  { %v2362_v42 = vpop.xlane.xlu1 %2361 }
0x1267   :  { %6507 = vrcp.f32 %v2362_v42  ;;  %v2359_v60 = vpop.xlane.xlu0 %2358 }
0x1268   :  { %6509 = vrcp.f32 %v2359_v60 }
0x1269   :  { %v6500_v56 = vpop.eup %6499 }
0x126a   :  { %v6502_v49 = vpop.eup %6501  ;;  %v2368_v40 = vpop.xlane.xlu1 %2367  ;;  %v8270_v22 = vmul.f32 %v6500_v56, %v6484_v50 }
0x126b   :  { %6511 = vrcp.f32 %v2368_v40  ;;  %v2365_v26 = vpop.xlane.xlu0 %2364  ;;  %v8272_v27 = vmul.f32 %v6502_v49, %v6486_v11 }
0x126c   :  { %6513 = vrcp.f32 %v2365_v26  ;;  %v2385_v1 = vmul.f32 %v8270_v22, %v8270_v22 }
0x126d   :  { %v6504_v44 = vpop.eup %6503  ;;  %v2386_v51 = vmul.f32 %v8272_v27, %v8272_v27 }
0x126e   :  { %v6506_v52 = vpop.eup %6505  ;;  %2401 = vrot.lane.b32.xlu0 %v2385_v1, %s7375_s5  ;;  %v8279_v9 = vmul.f32 %v6504_v44, %v6488_v54 }
0x126f   :  { %2403 = vrot.lane.b32.xlu1 %v2386_v51, %s7375_s5  ;;  %v8283_v50 = vmul.f32 %v6506_v52, %v8241_v16 }
0x1270   :  { %v2388_v11 = vmul.f32 %v8279_v9, %v8279_v9 }
0x1271   :  { %v6508_v23 = vpop.eup %6507  ;;  %v2387_v24 = vmul.f32 %v8283_v50, %v8283_v50 }
0x1272   :  { %v6510_v48 = vpop.eup %6509  ;;  %2407 = vrot.lane.b32.xlu0 %v2388_v11, %s7375_s5  ;;  %v2382_v4 = vmul.f32 %v6508_v23, %v8246_v18 }
0x1273   :  { %2405 = vrot.lane.b32.xlu1 %v2387_v24, %s7375_s5  ;;  %v8293_v54 = vmul.f32 %v6510_v48, %v8248_v20 }
0x1274   :  { %v2390_v59 = vmul.f32 %v2382_v4, %v2382_v4 }
0x1275   :  { %v6512_v16 = vpop.eup %6511  ;;  %v2389_v15 = vmul.f32 %v8293_v54, %v8293_v54 }
0x1276   :  { %v6514_v38 = vpop.eup %6513  ;;  %2411 = vrot.lane.b32.xlu0 %v2390_v59, %s7375_s5  ;;  %v8299_v42 = vmul.f32 %v6512_v16, %v8254_v57 }
0x1277   :  { %2409 = vrot.lane.b32.xlu1 %v2389_v15, %s7375_s5  ;;  %v8303_v18 = vmul.f32 %v6514_v38, %v8256_v41  ;;  %v7402_v15 = vmov 64  }
0x1278   :  { %v2392_v20 = vmul.f32 %v8299_v42, %v8299_v42  ;;  %6341 = vset.pattern.permute.xlu0 %v7402_v15  ;;  %6339 = vset.pattern.permute.xlu1 %v7402_v15 }
0x1279   :  { %v2391_v60 = vmul.f32 %v8303_v18, %v8303_v18 }
0x127a   :  { %2415 = vrot.lane.b32.xlu0 %v2392_v20, %s7375_s5 }
0x127b   :  { %2413 = vrot.lane.b32.xlu1 %v2391_v60, %s7375_s5  ;;  %s7405_s5 = smov 96  }
0x12e0   :  { %v2402_v56 = vpop.permute.xlu0 %2401 }
0x12e1   :  { %v2404_v49 = vpop.permute.xlu1 %2403  ;;  %v2425_v57 = vsel %vm2344_vm12, %v2402_v56, 0.0 }
0x12e2   :  { %v2428_v40 = vsel %vm2344_vm12, %v2404_v49, 0.0  ;;  %2426 = vadd.xlane.f32.xlu1 %v2425_v57 }
0x12e3   :  { %2429 = vadd.xlane.f32.xlu0 %v2428_v40 }
0x12e4   :  { %v2408_v41 = vpop.permute.xlu0 %2407 }
0x12e5   :  { %v2406_v26 = vpop.permute.xlu1 %2405  ;;  %v2434_v1 = vsel %vm2344_vm12, %v2408_v41, 0.0 }
0x12e6   :  { %v2431_v44 = vsel %vm2344_vm12, %v2406_v26, 0.0  ;;  %2435 = vadd.xlane.f32.xlu1 %v2434_v1 }
0x12e7   :  { %2432 = vadd.xlane.f32.xlu0 %v2431_v44 }
0x12e8   :  { %v2412_v51 = vpop.permute.xlu0 %2411 }
0x12e9   :  { %v2410_v52 = vpop.permute.xlu1 %2409  ;;  %v2440_v11 = vsel %vm2344_vm12, %v2412_v51, 0.0 }
0x12ea   :  { %v2437_v23 = vsel %vm2344_vm12, %v2410_v52, 0.0  ;;  %2441 = vadd.xlane.f32.xlu1 %v2440_v11  ;;  %v6462_v11 = vld [vmem:[#allocation20] sm:$0xff]  }
0x12eb   :  { %2438 = vadd.xlane.f32.xlu0 %v2437_v23  ;;  %v7403_v23 = vmov 65   ;;  %6112 = vmatprep.subr.bf16.mxu0 %v6462_v11 }
0x12ec   :  { %v2416_v24 = vpop.permute.xlu0 %2415  ;;  %6113 = vmatpush3.bf16.msra.mxu0 %v6462_v11 }
0x12ed   :  { %v2414_v48 = vpop.permute.xlu1 %2413  ;;  %v2446_v59 = vsel %vm2344_vm12, %v2416_v24, 0.0 }
0x12ee   :  { %v2443_v16 = vsel %vm2344_vm12, %v2414_v48, 0.0  ;;  %2447 = vadd.xlane.f32.xlu1 %v2446_v59  ;;  %v6464_v59 = vld [vmem:[#allocation20 + $0x10] sm:$0xff]  }
0x12ef   :  { %2444 = vadd.xlane.f32.xlu0 %v2443_v16  ;;  %v6465_v16 = vld [vmem:[#allocation20 + $0x18] sm:$0xff]  }
0x136f   :  { %v2427_v38 = vpop.xlane.xlu1 %2426 }
0x1370   :  { %6515 = vrsqrt.f32 %v2427_v38  ;;  %v2430_v20 = vpop.xlane.xlu0 %2429 }
0x1373   :  { %v2436_v60 = vpop.xlane.xlu1 %2435 }
0x1374   :  { %v2433_v56 = vpop.xlane.xlu0 %2432 }
0x1375   :  { %6517 = vrsqrt.f32 %v2433_v56 }
0x1377   :  { %v2442_v49 = vpop.xlane.xlu1 %2441 }
0x1378   :  { %6519 = vrsqrt.f32 %v2442_v49  ;;  %v2439_v57 = vpop.xlane.xlu0 %2438  ;;  %v6469_v49 = vld [vmem:[#allocation20 + $0x38] sm:$0xff]  }
0x137a   :  { %v6516_v40 = vpop.eup %6515 }
0x137b   :  { %v2457_v41 = vmul.f32 %v6516_v40, %v8270_v22  ;;  %v6463_v22 = vld [vmem:[#allocation20 + $0x8] sm:$0xff]   ;;  %v2448_v56 = vpop.xlane.xlu1 %2447 }
0x137c   :  { %v2445_v26 = vpop.xlane.xlu0 %2444  ;;  %6114 = vmatprep.subr.bf16.mxu0 %v6463_v22 }
0x137d   :  { %2475 = vperm.xlu0 %6341, %v2457_v41   ;;  %6521 = vrsqrt.f32 %v2445_v26  ;;  %6115 = vmatpush3.bf16.msra.mxu0 %v6463_v22 }
0x137e   :  { %6523 = vrsqrt.f32 %v2436_v60  ;;  %6116 = vmatprep.subr.bf16.mxu0 %v6464_v59 }
0x137f   :  { %v6518_v1 = vpop.eup %6517  ;;  %6525 = vrsqrt.f32 %v2430_v20  ;;  %v6466_v20 = vld [vmem:[#allocation20 + $0x20] sm:$0xff]  }
0x1380   :  { %v2459_v44 = vmul.f32 %v6518_v1, %v8283_v50  ;;  %6527 = vrsqrt.f32 %v2439_v57 }
0x1381   :  { %6117 = vmatpush3.bf16.msra.mxu0 %v6464_v59  ;;  %6529 = vrsqrt.f32 %v2448_v56  ;;  %v2466_v59 = vunpack.c.h.bf16 %v7968_v37 }
0x1382   :  { %v6520_v51 = vpop.eup %6519  ;;  %2485 = vperm.xlu1 %6339, %v2459_v44   ;;  %6118 = vmatprep.subr.bf16.mxu0 %v6465_v16 }
0x1383   :  { %v2462_v52 = vmul.f32 %v6520_v51, %v2382_v4 }
0x1385   :  { %2500 = vperm.xlu0 %6341, %v2462_v52   ;;  %6119 = vmatpush3.bf16.msra.mxu0 %v6465_v16  ;;  %v2467_v16 = vunpack.c.l.bf16 %v7966_v36 }
0x1386   :  { %6340 = vset.pattern.permute.xlu1 %v7403_v23  ;;  %6120 = vmatprep.subr.bf16.mxu0 %v6466_v20 }
0x1387   :  { %2538 = vperm.xlu1 %6340, %v2459_v44   ;;  %v6522_v24 = vpop.eup %6521 }
0x1388   :  { %v6524_v48 = vpop.eup %6523  ;;  %v2463_v50 = vmul.f32 %v6522_v24, %v8303_v18  ;;  %v6468_v18 = vld [vmem:[#allocation20 + $0x30] sm:$0xff]   ;;  %v2524_v24 = vunpack.c.h.bf16 %v7913_v61 }
0x1389   :  { %6349 = vset.pattern.permute.xlu0 %v7403_v23  ;;  %v2460_v4 = vmul.f32 %v6524_v48, %v8279_v9  ;;  %v6526_v38 = vpop.eup %6525  ;;  %6121 = vmatpush3.bf16.msra.mxu0 %v6466_v20  ;;  %v6467_v9 = vld [vmem:[#allocation20 + $0x28] sm:$0xff]   ;;  %v2523_v48 = vunpack.c.l.bf16 %v7913_v61 }
0x138a   :  { %2550 = vperm.xlu0 %6349, %v2462_v52   ;;  %v2458_v60 = vmul.f32 %v6526_v38, %v8272_v27  ;;  %6122 = vmatprep.subr.bf16.mxu0 %v6467_v9  ;;  %v6528_v40 = vpop.eup %6527 }
0x138b   :  { %2530 = vperm.xlu1 %6340, %v2457_v41   ;;  %v2461_v27 = vmul.f32 %v6528_v40, %v8293_v54  ;;  %v6530_v57 = vpop.eup %6529  ;;  %v2521_v54 = vunpack.c.l.bf16 %v7915_v62 }
0x138c   :  { %v2464_v41 = vmul.f32 %v6530_v57, %v8299_v42  ;;  %v2468_v42 = vunpack.c.h.bf16 %v7966_v36  ;;  %v2526_v36 = vunpack.c.h.bf16 %v7921_v8 }
0x138d   :  { %6123 = vmatpush3.bf16.msra.mxu0 %v6467_v9 }
0x138e   :  { %2554 = vperm.xlu0 %6349, %v2463_v50   ;;  %6124 = vmatprep.subr.bf16.mxu0 %v6468_v18 }
0x138f   :  { %6342 = vset.pattern.permute.xlu1 %v7402_v15 }
0x1390   :  { %2490 = vperm.xlu1 %6342, %v2460_v4  }
0x1391   :  { %6125 = vmatpush3.bf16.msra.mxu0 %v6468_v18 }
0x1392   :  { %6126 = vmatprep.subr.bf16.mxu0 %v6469_v49 }
0x1394   :  { %6343 = vset.pattern.permute.xlu1 %v7403_v23 }
0x1395   :  { %2542 = vperm.xlu1 %6343, %v2460_v4   ;;  %6127 = vmatpush3.bf16.msra.mxu0 %v6469_v49  ;;  %v2522_v4 = vunpack.c.h.bf16 %v7915_v62 }
0x1399   :  { %6344 = vset.pattern.permute.xlu1 %v7402_v15 }
0x139a   :  { %2480 = vperm.xlu1 %6344, %v2458_v60  }
0x139e   :  { %6345 = vset.pattern.permute.xlu1 %v7403_v23 }
0x139f   :  { %2534 = vperm.xlu1 %6345, %v2458_v60  }
0x13a3   :  { %6346 = vset.pattern.permute.xlu1 %v7402_v15 }
0x13a4   :  { %2505 = vperm.xlu1 %6346, %v2463_v50  }
0x13a8   :  { %2495 = vperm.xlu1 %6346, %v2461_v27  }
0x13ac   :  { %6347 = vset.pattern.permute.xlu1 %v7403_v23 }
0x13ad   :  { %2546 = vperm.xlu1 %6347, %v2461_v27  }
0x13b1   :  { %6348 = vset.pattern.permute.xlu1 %v7402_v15  ;;  %v2465_v15 = vunpack.c.l.bf16 %v7968_v37 }
0x13b2   :  { %2510 = vperm.xlu1 %6348, %v2464_v41  }
0x13b6   :  { %6350 = vset.pattern.permute.xlu1 %v7403_v23 }
0x13b7   :  { %2558 = vperm.xlu1 %6350, %v2464_v41  }
0x13fc   :  { %v2476_v22 = vpop.permute.xlu0 %2475 }
0x13fd   :  { %v2513_v9 = vmul.f32 %v2476_v22, %v2465_v15 }
0x1401   :  { %v2486_v26 = vpop.permute.xlu1 %2485 }
0x1402   :  { %v2515_v49 = vmul.f32 %v2486_v26, %v2467_v16  ;;  %v2525_v26 = vunpack.c.l.bf16 %v7921_v8 }
0x1404   :  { %v2501_v57 = vpop.permute.xlu0 %2500 }
0x1406   :  { %v2539_v1 = vpop.permute.xlu1 %2538 }
0x1407   :  { %v2563_v38 = vmul.f32 %v2539_v1, %v2523_v48  ;;  %v2470_v1 = vunpack.c.h.bf16 %v7972_v47 }
0x1409   :  { %v2571_v41 = vadd.f32 %v2563_v38, %v2515_v49  ;;  %v2551_v37 = vpop.permute.xlu0 %2550  ;;  %v2518_v22 = vmul.f32 %v2501_v57, %v2470_v1  ;;  %v2527_v38 = vunpack.c.l.bf16 %v7919_v7  ;;  %v6471_v57 = vld [vmem:[#allocation26 + $0x8] sm:$0xff]  }
0x140a   :  { %v2531_v44 = vpop.permute.xlu1 %2530 }
0x140b   :  { %v2561_v23 = vmul.f32 %v2531_v44, %v2521_v54 }
0x140d   :  { %v2569_v40 = vadd.f32 %v2561_v23, %v2513_v9  ;;  %v2555_v16 = vpop.permute.xlu0 %2554 }
0x140e   :  { %v2567_v9 = vmul.f32 %v2555_v16, %v2527_v38 }
0x140f   :  { %v2491_v51 = vpop.permute.xlu1 %2490 }
0x1410   :  { %v2516_v20 = vmul.f32 %v2491_v51, %v2468_v42  ;;  %v2566_v51 = vmul.f32 %v2551_v37, %v2526_v36 }
0x1414   :  { %v2543_v52 = vpop.permute.xlu1 %2542 }
0x1415   :  { %v2564_v50 = vmul.f32 %v2543_v52, %v2524_v24 }
0x1417   :  { %v2572_v61 = vadd.f32 %v2564_v50, %v2516_v20  ;;  %v2574_v50 = vadd.f32 %v2566_v51, %v2518_v22  ;;  %v8356_v22 = vld [vmem:[#allocation7 + $0x18] sm:$0xff]  }
0x1419   :  { %v2481_v11 = vpop.permute.xlu1 %2480  ;;  %v2594_v24 = vpack.c.bf16 %v2572_v61, %v2571_v41 }
0x141a   :  { %v2514_v18 = vmul.f32 %v2481_v11, %v2466_v59  ;;  %v2469_v11 = vunpack.c.l.bf16 %v7972_v47  ;;  %v2528_v47 = vunpack.c.h.bf16 %v7919_v7 }
0x141e   :  { %v2535_v60 = vpop.permute.xlu1 %2534 }
0x141f   :  { %v2562_v56 = vmul.f32 %v2535_v60, %v2522_v4  ;;  %v2471_v4 = vunpack.c.l.bf16 %v7970_v46  ;;  %v2472_v60 = vunpack.c.h.bf16 %v7970_v46 }
0x1421   :  { %v2570_v27 = vadd.f32 %v2562_v56, %v2514_v18 }
0x1423   :  { %v2506_v52 = vpop.permute.xlu1 %2505  ;;  %v2593_v44 = vpack.c.bf16 %v2570_v27, %v2569_v40  ;;  %v6470_v27 = vld [vmem:[#allocation26] sm:$0xff]  }
0x1424   :  { %v2519_v20 = vmul.f32 %v2506_v52, %v2471_v4  ;;  %6152 = vmatprep.subr.bf16.mxu0 %v6470_v27 }
0x1425   :  { %6128 = vmatprep.mubr.bf16.mxu0 %v2593_v44 }
0x1426   :  { %6129 = vmatmul.mubr.bf16.vlgmr.msra.gmra.mrb[72].mxu0 %v2594_v24  ;;  %v2575_v49 = vadd.f32 %v2567_v9, %v2519_v20 }
0x1427   :  { %v2496_v62 = vpop.permute.xlu1 %2495  ;;  %6153 = vmatpush3.bf16.msra.mxu0 %v6470_v27 }
0x1428   :  { %v2517_v48 = vmul.f32 %v2496_v62, %v2469_v11  ;;  %6154 = vmatprep.subr.bf16.mxu0 %v6471_v57 }
0x142b   :  { %6155 = vmatpush3.bf16.msra.mxu0 %v6471_v57 }
0x142c   :  { %v2547_v54 = vpop.permute.xlu1 %2546 }
0x142d   :  { %v2565_v42 = vmul.f32 %v2547_v54, %v2525_v26  ;;  %v8348_v26 = vld [vmem:[#allocation7 + $0x8] sm:$0xff]   ;;  %v8352_v54 = vld [vmem:[#allocation7 + $0x10] sm:$0xff]  }
0x142f   :  { %v2573_v15 = vadd.f32 %v2565_v42, %v2517_v48  ;;  %v6472_v48 = vld [vmem:[#allocation26 + $0x10] sm:$0xff]   ;;  %v6473_v42 = vld [vmem:[#allocation26 + $0x18] sm:$0xff]  }
0x1430   :  { %6156 = vmatprep.subr.bf16.mxu0 %v6472_v48 }
0x1431   :  { %v2511_v23 = vpop.permute.xlu1 %2510  ;;  %v2595_v59 = vpack.c.bf16 %v2574_v50, %v2573_v15  ;;  %6157 = vmatpush3.bf16.msra.mxu0 %v6472_v48 }
0x1432   :  { %v2520_v18 = vmul.f32 %v2511_v23, %v2472_v60  ;;  %6158 = vmatprep.subr.bf16.mxu0 %v6473_v42 }
0x1433   :  { %6132 = vmatprep.mubr.bf16.mxu0 %v2595_v59 }
0x1435   :  { %6159 = vmatpush3.bf16.msra.mxu0 %v6473_v42 }
0x1436   :  { %v2559_v8 = vpop.permute.xlu1 %2558 }
0x1437   :  { %v2568_v56 = vmul.f32 %v2559_v8, %v2528_v47 }
0x1439   :  { %v2576_v61 = vadd.f32 %v2568_v56, %v2520_v18 }
0x143b   :  { %v2596_v40 = vpack.c.bf16 %v2576_v61, %v2575_v49 }
0x143d   :  { %6133 = vmatmul.mubr.bf16.gmra.mrb[76].mxu0 %v2596_v40 }
0x14f9   :  { %v6130_v41 = vpop.f32.mrb[72].mxu0 }
0x14fa   :  { %v2679_v52 = vpop.f32.mrb[73].mxu0 }
0x14fb   :  { %v6131_v44 = vpop.f32.mrb[74].mxu0 }
0x14fc   :  { %v2711_v46 = vpack.c.bf16 %v6131_v44, %v6130_v41  ;;  %v2682_v24 = vpop.f32.mrb[75].mxu0 }
0x14fd   :  { %v2710_v7 = vpack.c.bf16 %v2682_v24, %v2679_v52  ;;  %v8376_v52 = vld [vmem:[#allocation7] sm:$0xff]  }
0x14ff   :  { %6136 = vmatprep.subr.bf16.mxu1 %v2710_v7 }
0x1500   :  { %6137 = vmatpush3.bf16.msra.mxu1 %v2710_v7 }
0x1501   :  { %6138 = vmatprep.subr.bf16.mxu1 %v2711_v46 }
0x1504   :  { %6139 = vmatpush3.bf16.msra.mxu1 %v2711_v46 }
0x1510   :  { %v6134_v62 = vpop.f32.mrb[76].mxu0 }
0x1511   :  { %v2695_v37 = vpop.f32.mrb[77].mxu0 }
0x1512   :  { %v6135_v36 = vpop.f32.mrb[78].mxu0 }
0x1513   :  { %v2713_v1 = vpack.c.bf16 %v6135_v36, %v6134_v62  ;;  %v2698_v51 = vpop.f32.mrb[79].mxu0 }
0x1514   :  { %v2712_v11 = vpack.c.bf16 %v2698_v51, %v2695_v37  ;;  %v5554_v51 = vld [vmem:[#allocation32] ss:$0 sm:$0xff] }
0x1516   :  { %6140 = vmatprep.subr.bf16.mxu1 %v2712_v11 }
0x1517   :  { %6141 = vmatpush3.bf16.msra.mxu1 %v2712_v11 }
0x1518   :  { %6142 = vmatprep.subr.bf16.mxu1 %v2713_v1 }
0x151b   :  { %6143 = vmatpush3.bf16.msra.mxu1 %v2713_v1 }
0x151e   :  { %6145 = vmatmul.mubr.msk.bf16.vlgmr.msra.gmra.mrb[80].mxu1 %vm551_vm1, %v8348_v26 }
0x151f   :  { %6148 = vmatprep.mubr.msk.bf16.mxu1 %vm551_vm1, %v8352_v54 }
0x1526   :  { %6149 = vmatmul.mubr.msk.bf16.gmra.mrb[84].mxu1 %vm551_vm1, %v8356_v22 }
0x15f1   :  { %v6146_v50 = vpop.f32.mrb[80].mxu1 }
0x15f2   :  { %v2748_v15 = vpop.f32.mrb[81].mxu1  ;;  %v2781_v59 = vmax.f32 %v6146_v50, 0.0 }
0x15f3   :  { %v6147_v23 = vpop.f32.mrb[82].mxu1  ;;  %v2779_v38 = vmax.f32 %v2748_v15, 0.0 }
0x15f4   :  { %v2782_v4 = vmax.f32 %v6147_v23, 0.0  ;;  %v2751_v16 = vpop.f32.mrb[83].mxu1 }
0x15f5   :  { %v2780_v20 = vmax.f32 %v2751_v16, 0.0 }
0x15f6   :  { %v8360_v60 = vpack.c.bf16 %v2782_v4, %v2781_v59 }
0x15f7   :  { %v8362_v47 = vpack.c.bf16 %v2780_v20, %v2779_v38 }
0x15f9   :  { %v6150_v8 = vpop.f32.mrb[84].mxu1  ;;  %6160 = vmatprep.mubr.msk.bf16.mxu0 %vm551_vm1, %v8362_v47 }
0x15fa   :  { %v2785_v9 = vmax.f32 %v6150_v8, 0.0  ;;  %v2764_v18 = vpop.f32.mrb[85].mxu1  ;;  %6161 = vmatmul.mubr.msk.bf16.vlgmr.msra.gmra.mrb[80].mxu0 %vm551_vm1, %v8360_v60 }
0x15fb   :  { %v2783_v56 = vmax.f32 %v2764_v18, 0.0  ;;  %v6151_v49 = vpop.f32.mrb[86].mxu1 }
0x15fc   :  { %v2786_v61 = vmax.f32 %v6151_v49, 0.0  ;;  %v2767_v40 = vpop.f32.mrb[87].mxu1 }
0x15fd   :  { %v2784_v27 = vmax.f32 %v2767_v40, 0.0 }
0x15fe   :  { %v8368_v57 = vpack.c.bf16 %v2786_v61, %v2785_v9 }
0x15ff   :  { %v8370_v41 = vpack.c.bf16 %v2784_v27, %v2783_v56 }
0x1601   :  { %6164 = vmatprep.mubr.msk.bf16.mxu0 %vm551_vm1, %v8370_v41 }
0x1602   :  { %6165 = vmatmul.mubr.msk.bf16.gmra.mrb[84].mxu0 %vm551_vm1, %v8368_v57 }
0x1603   :  { %6192 = vmatprep.mubr.msk.bf16.mxu0 %vm551_vm1, %v8376_v52 }
0x16cd   :  { %v8380_v44 = vpop.f32.mrb[80].mxu0 }
0x16ce   :  { %v8384_v46 = vadd.f32 %v8380_v44, %v8190_v55  ;;  %2912 = vrot.lane.b32.xlu0 %v8380_v44, %s7404_s22  ;;  %v8387_v24 = vpop.f32.mrb[81].mxu0 }
0x16cf   :  { %v8391_v7 = vadd.f32 %v8387_v24, %v8194_v58  ;;  %v8393_v62 = vpop.f32.mrb[82].mxu0 }
0x16d0   :  { %v8397_v37 = vadd.f32 %v8393_v62, %v8198_v43  ;;  %v8399_v36 = vpop.f32.mrb[83].mxu0 }
0x16d1   :  { %v8403_v1 = vadd.f32 %v8399_v36, %v8200_v45  ;;  %2910 = vrot.lane.b32.xlu1 %v8399_v36, %s7404_s22 }
0x16d2   :  { %2908 = vrot.lane.b32.xlu0 %v8387_v24, %s7404_s22 }
0x16d5   :  { %2914 = vrot.lane.b32.xlu1 %v8393_v62, %s7404_s22  ;;  %v8408_v11 = vpop.f32.mrb[84].mxu0 }
0x16d6   :  { %9481 = vst [vmem:[#allocation82_spill] sm:$0xff] %v8408_v11  ;;  %v8412_v48 = vadd.f32 %v8408_v11, %v8206_v2  ;;  %2946 = vrot.lane.b32.xlu0 %v5554_v51, %s7404_s22  ;;  %v8414_v42 = vpop.f32.mrb[85].mxu0 }
0x16d7   :  { %9482 = vst [vmem:[#allocation83_spill] sm:$0xff] %v8414_v42  ;;  %v8418_v50 = vadd.f32 %v8414_v42, %v8208_v53  ;;  %v8420_v15 = vpop.f32.mrb[86].mxu0 }
0x16d8   :  { %9483 = vst [vmem:[#allocation84_spill] sm:$0xff] %v8420_v15  ;;  %v8424_v23 = vadd.f32 %v8420_v15, %v8213_v3  ;;  %v8426_v59 = vpop.f32.mrb[87].mxu0 }
0x16d9   :  { %9484 = vst [vmem:[#allocation85_spill] sm:$0xff] %v8426_v59  ;;  %v8430_v4 = vadd.f32 %v8426_v59, %v8215_v17  ;;  %2916 = vrot.lane.b32.xlu1 %v8414_v42, %s7404_s22 }
0x16da   :  { %2918 = vrot.lane.b32.xlu0 %v8426_v59, %s7404_s22 }
0x16dd   :  { %2920 = vrot.lane.b32.xlu1 %v8408_v11, %s7404_s22 }
0x16de   :  { %2922 = vrot.lane.b32.xlu0 %v8420_v15, %s7404_s22 }
0x1740   :  { %v2913_v16 = vpop.permute.xlu0 %2912 }
0x1741   :  { %v2934_v8 = vadd.f32 %v7990_v19, %v2913_v16 }
0x1743   :  { %v2911_v38 = vpop.permute.xlu1 %2910 }
0x1744   :  { %v2909_v20 = vpop.permute.xlu0 %2908  ;;  %v2933_v9 = vadd.f32 %v2911_v38, %v7998_v28 }
0x1745   :  { %v2932_v18 = vadd.f32 %v2909_v20, %v7992_v21 }
0x1747   :  { %v2915_v56 = vpop.permute.xlu1 %2914 }
0x1748   :  { %v2935_v49 = vadd.f32 %v7994_v25, %v2915_v56  ;;  %v2947_v61 = vpop.permute.xlu0 %2946 }
0x1749   :  { %v2949_v40 = vadd.f32 %v2947_v61, %v2932_v18  ;;  %v2950_v27 = vadd.f32 %v2947_v61, %v2933_v9  ;;  %v2951_v51 = vadd.f32 %v2947_v61, %v2934_v8 }
0x174a   :  { %v2952_v17 = vadd.f32 %v2947_v61, %v2935_v49 }
0x174b   :  { %v2917_v59 = vpop.permute.xlu1 %2916  ;;  %vm2957_vm14 = vcmp.gt.f32.partialorder %v2949_v40, 0.0  ;;  %v2965_v11 = vmul.f32 0.01, %v2949_v40  ;;  %vm2958_vm15 = vcmp.gt.f32.partialorder %v2950_v27, 0.0  ;;  %v2966_v3 = vmul.f32 0.01, %v2950_v27 }
0x174c   :  { %v2936_v19 = vadd.f32 %v2917_v59, %v8004_v31  ;;  %v2919_v16 = vpop.permute.xlu0 %2918  ;;  %vm2960_vm3 = vcmp.gt.f32.partialorder %v2952_v17, 0.0  ;;  %v2968_v28 = vmul.f32 0.01, %v2952_v17  ;;  %vm2959_vm4 = vcmp.gt.f32.partialorder %v2951_v51, 0.0 }
0x174d   :  { %v2937_v21 = vadd.f32 %v2919_v16, %v8010_v34  ;;  %v2973_v25 = vsel %vm2957_vm14, %v2949_v40, %v2965_v11  ;;  %v2974_v38 = vsel %vm2958_vm15, %v2950_v27, %v2966_v3  ;;  %v2967_v20 = vmul.f32 0.01, %v2951_v51 }
0x174e   :  { %v2953_v9 = vadd.f32 %v2947_v61, %v2936_v19  ;;  %v2982_v8 = vsel %vm2981_vm13, %v2973_v25, -inf  ;;  %v2985_v18 = vsel %vm2981_vm13, %v2974_v38, -inf  ;;  %v2976_v15 = vsel %vm2960_vm3, %v2952_v17, %v2968_v28 }
0x174f   :  { %v2954_v56 = vadd.f32 %v2947_v61, %v2937_v21  ;;  %2983 = vmax.xlane.f32.xlu1 %v2982_v8  ;;  %v2921_v49 = vpop.permute.xlu1 %2920  ;;  %2986 = vmax.xlane.f32.xlu0 %v2985_v18  ;;  %v2975_v31 = vsel %vm2959_vm4, %v2951_v51, %v2967_v20  ;;  %v2991_v40 = vsel %vm2981_vm13, %v2976_v15, -inf }
0x1750   :  { %v2938_v59 = vadd.f32 %v8002_v30, %v2921_v49  ;;  %v2923_v42 = vpop.permute.xlu0 %2922  ;;  %vm2961_vm5 = vcmp.gt.f32.partialorder %v2953_v9, 0.0  ;;  %v2969_v45 = vmul.f32 0.01, %v2953_v9  ;;  %v2988_v27 = vsel %vm2981_vm13, %v2975_v31, -inf }
0x1751   :  { %v2939_v34 = vadd.f32 %v8006_v32, %v2923_v42  ;;  %vm2962_vm6 = vcmp.gt.f32.partialorder %v2954_v56, 0.0  ;;  %v2970_v3 = vmul.f32 0.01, %v2954_v56 }
0x1752   :  { %v2955_v11 = vadd.f32 %v2947_v61, %v2938_v59  ;;  %v2977_v16 = vsel %vm2961_vm5, %v2953_v9, %v2969_v45 }
0x1753   :  { %v2956_v19 = vadd.f32 %v2947_v61, %v2939_v34  ;;  %2992 = vmax.xlane.f32.xlu1 %v2991_v40  ;;  %2989 = vmax.xlane.f32.xlu0 %v2988_v27  ;;  %v2978_v17 = vsel %vm2962_vm6, %v2954_v56, %v2970_v3  ;;  %v2994_v28 = vsel %vm2981_vm13, %v2977_v16, -inf  ;;  %vm4375_vm6 = vcmask 56336  }
0x1754   :  { %vm2963_vm7 = vcmp.gt.f32.partialorder %v2955_v11, 0.0  ;;  %v2971_v51 = vmul.f32 0.01, %v2955_v11  ;;  %v2997_v32 = vsel %vm2981_vm13, %v2978_v17, -inf }
0x1755   :  { %vm2964_vm8 = vcmp.gt.f32.partialorder %v2956_v19, 0.0  ;;  %v2972_v30 = vmul.f32 0.01, %v2956_v19 }
0x1756   :  { %v2979_v42 = vsel %vm2963_vm7, %v2955_v11, %v2971_v51 }
0x1757   :  { %2995 = vmax.xlane.f32.xlu0 %v2994_v28  ;;  %2998 = vmax.xlane.f32.xlu1 %v2997_v32  ;;  %v2980_v21 = vsel %vm2964_vm8, %v2956_v19, %v2972_v30  ;;  %v3000_v20 = vsel %vm2981_vm13, %v2979_v42, -inf }
0x1758   :  { %v3003_v61 = vsel %vm2981_vm13, %v2980_v21, -inf }
0x175b   :  { %3001 = vmax.xlane.f32.xlu0 %v3000_v20  ;;  %3004 = vmax.xlane.f32.xlu1 %v3003_v61 }
0x17dc   :  { %v2984_v45 = vpop.xlane.xlu1 %2983  ;;  %v2987_v9 = vpop.xlane.xlu0 %2986 }
0x17dd   :  { %v3006_v8 = vsub.f32 %v2973_v25, %v2984_v45  ;;  %v3007_v18 = vsub.f32 %v2974_v38, %v2987_v9 }
0x17df   :  { %v3014_v56 = vmul.f32 1.442695, %v3006_v8  ;;  %v3016_v49 = vmul.f32 1.442695, %v3007_v18 }
0x17e0   :  { %v2993_v59 = vpop.xlane.xlu1 %2992  ;;  %v2990_v34 = vpop.xlane.xlu0 %2989 }
0x17e1   :  { %6531 = vpow2.f32 %v3014_v56  ;;  %v3009_v3 = vsub.f32 %v2976_v15, %v2993_v59  ;;  %v3008_v40 = vsub.f32 %v2975_v31, %v2990_v34 }
0x17e2   :  { %6533 = vpow2.f32 %v3016_v49 }
0x17e3   :  { %v3020_v11 = vmul.f32 1.442695, %v3009_v3  ;;  %v3018_v27 = vmul.f32 1.442695, %v3008_v40 }
0x17e4   :  { %v2999_v19 = vpop.xlane.xlu1 %2998  ;;  %v2996_v51 = vpop.xlane.xlu0 %2995 }
0x17e5   :  { %6535 = vpow2.f32 %v3020_v11  ;;  %v3011_v30 = vsub.f32 %v2978_v17, %v2999_v19  ;;  %v3010_v28 = vsub.f32 %v2977_v16, %v2996_v51 }
0x17e6   :  { %6537 = vpow2.f32 %v3018_v27 }
0x17e7   :  { %v3024_v32 = vmul.f32 1.442695, %v3011_v30  ;;  %v3022_v20 = vmul.f32 1.442695, %v3010_v28 }
0x17e8   :  { %v3005_v25 = vpop.xlane.xlu1 %3004  ;;  %v3002_v38 = vpop.xlane.xlu0 %3001 }
0x17e9   :  { %6539 = vpow2.f32 %v3024_v32  ;;  %v3013_v61 = vsub.f32 %v2980_v21, %v3005_v25  ;;  %v3012_v45 = vsub.f32 %v2979_v42, %v3002_v38 }
0x17ea   :  { %6541 = vpow2.f32 %v3022_v20 }
0x17eb   :  { %v6532_v9 = vpop.eup %6531  ;;  %v3028_v15 = vmul.f32 1.442695, %v3013_v61  ;;  %v3026_v31 = vmul.f32 1.442695, %v3012_v45 }
0x17ec   :  { %v6534_v8 = vpop.eup %6533  ;;  %3038 = vrot.lane.b32.xlu0 %v6532_v9, %s7405_s5 }
0x17ed   :  { %6543 = vpow2.f32 %v3028_v15  ;;  %3040 = vrot.lane.b32.xlu1 %v6534_v8, %s7405_s5 }
0x17ee   :  { %6545 = vpow2.f32 %v3026_v31 }
0x17ef   :  { %v6536_v16 = vpop.eup %6535 }
0x17f0   :  { %v6538_v17 = vpop.eup %6537  ;;  %3044 = vrot.lane.b32.xlu0 %v6536_v16, %s7405_s5 }
0x17f1   :  { %3042 = vrot.lane.b32.xlu1 %v6538_v17, %s7405_s5 }
0x17f3   :  { %v8456_v21 = vpop.eup %6539 }
0x17f4   :  { %v8458_v42 = vpop.eup %6541  ;;  %3048 = vrot.lane.b32.xlu0 %v8456_v21, %s7405_s5 }
0x17f5   :  { %3046 = vrot.lane.b32.xlu1 %v8458_v42, %s7405_s5 }
0x17f7   :  { %v8464_v18 = vpop.eup %6543 }
0x17f8   :  { %v8466_v56 = vpop.eup %6545  ;;  %3052 = vrot.lane.b32.xlu0 %v8464_v18, %s7405_s5 }
0x17f9   :  { %3050 = vrot.lane.b32.xlu1 %v8466_v56, %s7405_s5 }
0x185e   :  { %v3039_v49 = vpop.permute.xlu0 %3038 }
0x185f   :  { %v3041_v59 = vpop.permute.xlu1 %3040  ;;  %v3062_v34 = vsel %vm2344_vm12, %v3039_v49, 0.0 }
0x1860   :  { %v3065_v3 = vsel %vm2344_vm12, %v3041_v59, 0.0  ;;  %3063 = vadd.xlane.f32.xlu1 %v3062_v34 }
0x1861   :  { %3066 = vadd.xlane.f32.xlu0 %v3065_v3 }
0x1862   :  { %v3045_v40 = vpop.permute.xlu0 %3044 }
0x1863   :  { %v3043_v11 = vpop.permute.xlu1 %3042  ;;  %v3071_v27 = vsel %vm2344_vm12, %v3045_v40, 0.0 }
0x1864   :  { %v3068_v19 = vsel %vm2344_vm12, %v3043_v11, 0.0  ;;  %3072 = vadd.xlane.f32.xlu1 %v3071_v27 }
0x1865   :  { %3069 = vadd.xlane.f32.xlu0 %v3068_v19 }
0x1866   :  { %v3049_v51 = vpop.permute.xlu0 %3048 }
0x1867   :  { %v3047_v30 = vpop.permute.xlu1 %3046  ;;  %v3077_v28 = vsel %vm2344_vm12, %v3049_v51, 0.0 }
0x1868   :  { %v3074_v32 = vsel %vm2344_vm12, %v3047_v30, 0.0  ;;  %3078 = vadd.xlane.f32.xlu1 %v3077_v28 }
0x1869   :  { %3075 = vadd.xlane.f32.xlu0 %v3074_v32 }
0x186a   :  { %v3053_v20 = vpop.permute.xlu0 %3052 }
0x186b   :  { %v3051_v25 = vpop.permute.xlu1 %3050  ;;  %v3083_v38 = vsel %vm2344_vm12, %v3053_v20, 0.0 }
0x186c   :  { %v3080_v61 = vsel %vm2344_vm12, %v3051_v25, 0.0  ;;  %3084 = vadd.xlane.f32.xlu1 %v3083_v38 }
0x186d   :  { %3081 = vadd.xlane.f32.xlu0 %v3080_v61 }
0x18ed   :  { %v3064_v45 = vpop.xlane.xlu1 %3063 }
0x18ee   :  { %6547 = vrcp.f32 %v3064_v45  ;;  %v3067_v15 = vpop.xlane.xlu0 %3066 }
0x18ef   :  { %6549 = vrcp.f32 %v3067_v15 }
0x18f1   :  { %v3073_v31 = vpop.xlane.xlu1 %3072 }
0x18f2   :  { %6551 = vrcp.f32 %v3073_v31  ;;  %v3070_v49 = vpop.xlane.xlu0 %3069 }
0x18f3   :  { %6553 = vrcp.f32 %v3070_v49 }
0x18f5   :  { %v3079_v59 = vpop.xlane.xlu1 %3078 }
0x18f6   :  { %6555 = vrcp.f32 %v3079_v59  ;;  %v3076_v34 = vpop.xlane.xlu0 %3075 }
0x18f7   :  { %6557 = vrcp.f32 %v3076_v34 }
0x18f8   :  { %v6548_v3 = vpop.eup %6547 }
0x18f9   :  { %v6550_v40 = vpop.eup %6549  ;;  %v3085_v11 = vpop.xlane.xlu1 %3084  ;;  %v8480_v27 = vmul.f32 %v6548_v3, %v6532_v9 }
0x18fa   :  { %6559 = vrcp.f32 %v3085_v11  ;;  %v3082_v19 = vpop.xlane.xlu0 %3081  ;;  %v8482_v51 = vmul.f32 %v6550_v40, %v6534_v8 }
0x18fb   :  { %6561 = vrcp.f32 %v3082_v19  ;;  %v3102_v30 = vmul.f32 %v8480_v27, %v8480_v27 }
0x18fc   :  { %v6552_v28 = vpop.eup %6551  ;;  %v3103_v32 = vmul.f32 %v8482_v51, %v8482_v51 }
0x18fd   :  { %v6554_v20 = vpop.eup %6553  ;;  %3118 = vrot.lane.b32.xlu0 %v3102_v30, %s7405_s5  ;;  %v8489_v25 = vmul.f32 %v6552_v28, %v6536_v16 }
0x18fe   :  { %3120 = vrot.lane.b32.xlu1 %v3103_v32, %s7405_s5  ;;  %v8492_v9 = vmul.f32 %v6554_v20, %v6538_v17 }
0x18ff   :  { %v3105_v8 = vmul.f32 %v8489_v25, %v8489_v25 }
0x1900   :  { %v6556_v38 = vpop.eup %6555  ;;  %v3104_v61 = vmul.f32 %v8492_v9, %v8492_v9 }
0x1901   :  { %v6558_v45 = vpop.eup %6557  ;;  %3124 = vrot.lane.b32.xlu0 %v3105_v8, %s7405_s5  ;;  %v8500_v15 = vmul.f32 %v6556_v38, %v8456_v21 }
0x1902   :  { %3122 = vrot.lane.b32.xlu1 %v3104_v61, %s7405_s5  ;;  %v3098_v16 = vmul.f32 %v6558_v45, %v8458_v42 }
0x1903   :  { %v3107_v17 = vmul.f32 %v8500_v15, %v8500_v15 }
0x1904   :  { %v6560_v31 = vpop.eup %6559  ;;  %v3106_v49 = vmul.f32 %v3098_v16, %v3098_v16 }
0x1905   :  { %v6562_v59 = vpop.eup %6561  ;;  %3128 = vrot.lane.b32.xlu0 %v3107_v17, %s7405_s5  ;;  %v8508_v34 = vmul.f32 %v6560_v31, %v8464_v18 }
0x1906   :  { %3126 = vrot.lane.b32.xlu1 %v3106_v49, %s7405_s5  ;;  %v8512_v21 = vmul.f32 %v6562_v59, %v8466_v56  ;;  %v7406_v59 = vmov 32  }
0x1907   :  { %v3109_v3 = vmul.f32 %v8508_v34, %v8508_v34  ;;  %6353 = vset.pattern.permute.xlu0 %v7406_v59  ;;  %6351 = vset.pattern.permute.xlu1 %v7406_v59 }
0x1908   :  { %v3108_v42 = vmul.f32 %v8512_v21, %v8512_v21 }
0x1909   :  { %3132 = vrot.lane.b32.xlu0 %v3109_v3, %s7405_s5 }
0x190a   :  { %3130 = vrot.lane.b32.xlu1 %v3108_v42, %s7405_s5 }
0x196f   :  { %v3119_v40 = vpop.permute.xlu0 %3118 }
0x1970   :  { %v3121_v11 = vpop.permute.xlu1 %3120  ;;  %v3142_v18 = vsel %vm2344_vm12, %v3119_v40, 0.0 }
0x1971   :  { %v3145_v19 = vsel %vm2344_vm12, %v3121_v11, 0.0  ;;  %3143 = vadd.xlane.f32.xlu1 %v3142_v18 }
0x1972   :  { %3146 = vadd.xlane.f32.xlu0 %v3145_v19 }
0x1973   :  { %v3125_v56 = vpop.permute.xlu0 %3124 }
0x1974   :  { %v3123_v30 = vpop.permute.xlu1 %3122  ;;  %v3151_v28 = vsel %vm2344_vm12, %v3125_v56, 0.0 }
0x1975   :  { %v3148_v32 = vsel %vm2344_vm12, %v3123_v30, 0.0  ;;  %3152 = vadd.xlane.f32.xlu1 %v3151_v28 }
0x1976   :  { %3149 = vadd.xlane.f32.xlu0 %v3148_v32 }
0x1977   :  { %v3129_v20 = vpop.permute.xlu0 %3128 }
0x1978   :  { %v3127_v8 = vpop.permute.xlu1 %3126  ;;  %v3157_v38 = vsel %vm2344_vm12, %v3129_v20, 0.0 }
0x1979   :  { %v3154_v61 = vsel %vm2344_vm12, %v3127_v8, 0.0  ;;  %3158 = vadd.xlane.f32.xlu1 %v3157_v38 }
0x197a   :  { %3155 = vadd.xlane.f32.xlu0 %v3154_v61  ;;  %v7407_v61 = vmov 33  }
0x197b   :  { %v3133_v45 = vpop.permute.xlu0 %3132 }
0x197c   :  { %v3131_v17 = vpop.permute.xlu1 %3130  ;;  %v3163_v31 = vsel %vm2344_vm12, %v3133_v45, 0.0 }
0x197d   :  { %v3160_v49 = vsel %vm2344_vm12, %v3131_v17, 0.0  ;;  %3164 = vadd.xlane.f32.xlu1 %v3163_v31 }
0x197e   :  { %3161 = vadd.xlane.f32.xlu0 %v3160_v49  ;;  %v6474_v49 = vld [vmem:[#allocation22] sm:$0xff]  }
0x197f   :  { %6168 = vmatprep.subr.bf16.mxu1 %v6474_v49 }
0x1980   :  { %6169 = vmatpush3.bf16.msra.mxu1 %v6474_v49 }
0x19fe   :  { %v3144_v3 = vpop.xlane.xlu1 %3143 }
0x19ff   :  { %6563 = vrsqrt.f32 %v3144_v3  ;;  %v3147_v42 = vpop.xlane.xlu0 %3146 }
0x1a02   :  { %v3153_v40 = vpop.xlane.xlu1 %3152 }
0x1a03   :  { %v3150_v11 = vpop.xlane.xlu0 %3149 }
0x1a04   :  { %6565 = vrsqrt.f32 %v3150_v11 }
0x1a06   :  { %v3159_v18 = vpop.xlane.xlu1 %3158 }
0x1a07   :  { %v3156_v19 = vpop.xlane.xlu0 %3155 }
0x1a08   :  { %6567 = vrsqrt.f32 %v3156_v19 }
0x1a09   :  { %v6564_v56 = vpop.eup %6563  ;;  %6569 = vrsqrt.f32 %v3153_v40  ;;  %v6477_v40 = vld [vmem:[#allocation22 + $0x18] sm:$0xff]  }
0x1a0a   :  { %v3174_v30 = vmul.f32 %v6564_v56, %v8480_v27  ;;  %v3165_v28 = vpop.xlane.xlu1 %3164 }
0x1a0b   :  { %6571 = vrsqrt.f32 %v3165_v28  ;;  %v3240_v28 = vunpack.c.l.bf16 %v7974_v63 }
0x1a0c   :  { %3192 = vperm.xlu0 %6353, %v3174_v30   ;;  %6573 = vrsqrt.f32 %v3147_v42 }
0x1a0e   :  { %v6566_v32 = vpop.eup %6565 }
0x1a0f   :  { %v3176_v20 = vmul.f32 %v6566_v32, %v8492_v9  ;;  %v3162_v9 = vpop.xlane.xlu0 %3161 }
0x1a10   :  { %6575 = vrsqrt.f32 %v3162_v9 }
0x1a11   :  { %3202 = vperm.xlu1 %6351, %v3176_v20   ;;  %6577 = vrsqrt.f32 %v3159_v18 }
0x1a12   :  { %v6568_v8 = vpop.eup %6567 }
0x1a13   :  { %v3178_v38 = vmul.f32 %v6568_v8, %v3098_v16  ;;  %v6570_v45 = vpop.eup %6569 }
0x1a14   :  { %v3177_v27 = vmul.f32 %v6570_v45, %v8489_v25  ;;  %v6475_v25 = vld [vmem:[#allocation22 + $0x8] sm:$0xff]  }
0x1a15   :  { %6352 = vset.pattern.permute.xlu1 %v7407_v61  ;;  %3212 = vperm.xlu0 %6353, %v3178_v38   ;;  %v6572_v17 = vpop.eup %6571 }
0x1a16   :  { %3255 = vperm.xlu1 %6352, %v3176_v20   ;;  %v3181_v31 = vmul.f32 %v6572_v17, %v8508_v34  ;;  %v6574_v16 = vpop.eup %6573  ;;  %v6476_v34 = vld [vmem:[#allocation22 + $0x10] sm:$0xff]   ;;  %6170 = vmatprep.subr.bf16.mxu1 %v6475_v25 }
0x1a17   :  { %v3175_v3 = vmul.f32 %v6574_v16, %v8482_v51  ;;  %6171 = vmatpush3.bf16.msra.mxu1 %v6475_v25 }
0x1a18   :  { %6172 = vmatprep.subr.bf16.mxu1 %v6476_v34 }
0x1a19   :  { %6359 = vset.pattern.permute.xlu0 %v7407_v61 }
0x1a1a   :  { %3247 = vperm.xlu1 %6352, %v3174_v30   ;;  %3263 = vperm.xlu0 %6359, %v3178_v38   ;;  %v6576_v42 = vpop.eup %6575  ;;  %v3238_v38 = vunpack.c.l.bf16 %v7976_v0 }
0x1a1b   :  { %6173 = vmatpush3.bf16.msra.mxu1 %v6476_v34  ;;  %v3180_v11 = vmul.f32 %v6576_v42, %v8512_v21  ;;  %v6578_v51 = vpop.eup %6577  ;;  %v3184_v21 = vunpack.c.l.bf16 %v8360_v60  ;;  %v3185_v42 = vunpack.c.h.bf16 %v8360_v60  ;;  %v3244_v60 = vunpack.c.l.bf16 %v7982_v12 }
0x1a1c   :  { %6174 = vmatprep.subr.bf16.mxu1 %v6477_v40  ;;  %v3179_v19 = vmul.f32 %v6578_v51, %v8500_v15  ;;  %v3182_v15 = vunpack.c.l.bf16 %v8362_v47 }
0x1a1e   :  { %6354 = vset.pattern.permute.xlu1 %v7406_v59  ;;  %6360 = vset.pattern.permute.xlu0 %v7406_v59 }
0x1a1f   :  { %3207 = vperm.xlu1 %6354, %v3177_v27   ;;  %3227 = vperm.xlu0 %6360, %v3181_v31  }
0x1a20   :  { %6175 = vmatpush3.bf16.msra.mxu1 %v6477_v40  ;;  %v3241_v40 = vunpack.c.h.bf16 %v7974_v63  ;;  %v3188_v63 = vunpack.c.l.bf16 %v8368_v57 }
0x1a23   :  { %6355 = vset.pattern.permute.xlu1 %v7407_v61 }
0x1a24   :  { %3259 = vperm.xlu1 %6355, %v3177_v27  }
0x1a28   :  { %6356 = vset.pattern.permute.xlu1 %v7406_v59 }
0x1a29   :  { %3197 = vperm.xlu1 %6356, %v3175_v3  }
0x1a2d   :  { %6357 = vset.pattern.permute.xlu1 %v7407_v61 }
0x1a2e   :  { %3251 = vperm.xlu1 %6357, %v3175_v3  }
0x1a32   :  { %6358 = vset.pattern.permute.xlu1 %v7406_v59 }
0x1a33   :  { %3222 = vperm.xlu1 %6358, %v3180_v11  }
0x1a37   :  { %6361 = vset.pattern.permute.xlu1 %v7407_v61 }
0x1a38   :  { %3271 = vperm.xlu1 %6361, %v3180_v11  }
0x1a3c   :  { %6362 = vset.pattern.permute.xlu1 %v7406_v59  ;;  %v3186_v59 = vunpack.c.l.bf16 %v8370_v41 }
0x1a3d   :  { %3217 = vperm.xlu1 %6362, %v3179_v19  }
0x1a41   :  { %6363 = vset.pattern.permute.xlu1 %v7407_v61  ;;  %v3242_v61 = vunpack.c.l.bf16 %v7984_v13 }
0x1a42   :  { %3267 = vperm.xlu1 %6363, %v3179_v19  }
0x1a46   :  { %3275 = vperm.xlu1 %6363, %v3181_v31  }
0x1a8b   :  { %v3193_v18 = vpop.permute.xlu0 %3192 }
0x1a8c   :  { %v3230_v31 = vmul.f32 %v3193_v18, %v3182_v15  ;;  %v3239_v18 = vunpack.c.h.bf16 %v7976_v0  ;;  %v3187_v0 = vunpack.c.h.bf16 %v8370_v41 }
0x1a90   :  { %v3203_v56 = vpop.permute.xlu1 %3202 }
0x1a91   :  { %v3232_v20 = vmul.f32 %v3203_v56, %v3184_v21 }
0x1a94   :  { %v3213_v30 = vpop.permute.xlu0 %3212 }
0x1a95   :  { %v3256_v32 = vpop.permute.xlu1 %3255  ;;  %v3234_v9 = vmul.f32 %v3213_v30, %v3186_v59 }
0x1a96   :  { %v3280_v8 = vmul.f32 %v3256_v32, %v3240_v28  ;;  %v3183_v32 = vunpack.c.h.bf16 %v8362_v47 }
0x1a98   :  { %v3288_v45 = vadd.f32 %v3280_v8, %v3232_v20 }
0x1a99   :  { %v3248_v17 = vpop.permute.xlu1 %3247  ;;  %v3264_v27 = vpop.permute.xlu0 %3263 }
0x1a9a   :  { %v3278_v16 = vmul.f32 %v3248_v17, %v3238_v38  ;;  %v3282_v49 = vmul.f32 %v3264_v27, %v3242_v61 }
0x1a9c   :  { %v3286_v3 = vadd.f32 %v3278_v16, %v3230_v31  ;;  %v3290_v25 = vadd.f32 %v3282_v49, %v3234_v9  ;;  %v3243_v31 = vunpack.c.h.bf16 %v7984_v13  ;;  %v6478_v13 = vld [vmem:[#allocation28] sm:$0xff]  }
0x1a9d   :  { %6200 = vmatprep.subr.bf16.mxu1 %v6478_v13 }
0x1a9e   :  { %v3208_v34 = vpop.permute.xlu1 %3207 }
0x1a9f   :  { %v3233_v51 = vmul.f32 %v3208_v34, %v3185_v42  ;;  %v3189_v34 = vunpack.c.h.bf16 %v8368_v57 }
0x1aa3   :  { %v3260_v11 = vpop.permute.xlu1 %3259 }
0x1aa4   :  { %v3281_v19 = vmul.f32 %v3260_v11, %v3241_v40  ;;  %v3245_v40 = vunpack.c.h.bf16 %v7982_v12 }
0x1aa6   :  { %v3289_v56 = vadd.f32 %v3281_v19, %v3233_v51 }
0x1aa8   :  { %v3303_v21 = vpack.c.bf16 %v3289_v56, %v3288_v45  ;;  %v3198_v28 = vpop.permute.xlu1 %3197 }
0x1aa9   :  { %v3231_v20 = vmul.f32 %v3198_v28, %v3183_v32 }
0x1aad   :  { %v3252_v30 = vpop.permute.xlu1 %3251 }
0x1aae   :  { %v3279_v8 = vmul.f32 %v3252_v30, %v3239_v18 }
0x1ab0   :  { %v3287_v38 = vadd.f32 %v3279_v8, %v3231_v20 }
0x1ab2   :  { %v3302_v15 = vpack.c.bf16 %v3287_v38, %v3286_v3  ;;  %v3223_v59 = vpop.permute.xlu1 %3222  ;;  %v3228_v3 = vpop.permute.xlu0 %3227 }
0x1ab3   :  { %v3236_v61 = vmul.f32 %v3223_v59, %v3188_v63  ;;  %v3237_v51 = vmul.f32 %v3228_v3, %v3189_v34  ;;  %v6479_v63 = vld [vmem:[#allocation28 + $0x8] sm:$0xff]  }
0x1ab4   :  { %6176 = vmatprep.mubr.msk.bf16.mxu1 %vm551_vm1, %v3302_v15 }
0x1ab5   :  { %6177 = vmatmul.mubr.msk.bf16.vlgmr.msra.gmra.mrb[88].mxu1 %vm551_vm1, %v3303_v21 }
0x1ab6   :  { %6201 = vmatpush3.bf16.msra.mxu1 %v6478_v13 }
0x1ab7   :  { %v3272_v45 = vpop.permute.xlu1 %3271  ;;  %6202 = vmatprep.subr.bf16.mxu1 %v6479_v63 }
0x1ab8   :  { %v3284_v17 = vmul.f32 %v3272_v45, %v3244_v60 }
0x1aba   :  { %v3292_v47 = vadd.f32 %v3284_v17, %v3236_v61  ;;  %6203 = vmatpush3.bf16.msra.mxu1 %v6479_v63 }
0x1abc   :  { %v3218_v27 = vpop.permute.xlu1 %3217 }
0x1abd   :  { %v3235_v16 = vmul.f32 %v3218_v27, %v3187_v0 }
0x1ac1   :  { %v3268_v9 = vpop.permute.xlu1 %3267 }
0x1ac2   :  { %v3283_v49 = vmul.f32 %v3268_v9, %v3243_v31 }
0x1ac4   :  { %v3291_v42 = vadd.f32 %v3283_v49, %v3235_v16 }
0x1ac5   :  { %v3276_v11 = vpop.permute.xlu1 %3275 }
0x1ac6   :  { %v3304_v19 = vpack.c.bf16 %v3291_v42, %v3290_v25  ;;  %v3285_v56 = vmul.f32 %v3276_v11, %v3245_v40 }
0x1ac8   :  { %v3293_v21 = vadd.f32 %v3285_v56, %v3237_v51  ;;  %6180 = vmatprep.mubr.msk.bf16.mxu1 %vm551_vm1, %v3304_v19 }
0x1aca   :  { %v3305_v28 = vpack.c.bf16 %v3293_v21, %v3292_v47 }
0x1acc   :  { %6181 = vmatmul.mubr.msk.bf16.gmra.mrb[92].mxu1 %vm551_vm1, %v3305_v28 }
0x1b88   :  { %v6178_v41 = vpop.f32.mrb[88].mxu1 }
0x1b89   :  { %v3376_v32 = vpop.f32.mrb[89].mxu1 }
0x1b8a   :  { %v6179_v18 = vpop.f32.mrb[90].mxu1 }
0x1b8b   :  { %v3408_v57 = vpack.c.bf16 %v6179_v18, %v6178_v41  ;;  %v3379_v30 = vpop.f32.mrb[91].mxu1 }
0x1b8c   :  { %v3407_v20 = vpack.c.bf16 %v3379_v30, %v3376_v32  ;;  %v5573_v32 = vld [vmem:[#allocation34] ss:$0 sm:$0xff] }
0x1b8e   :  { %6184 = vmatprep.subr.bf16.mxu0 %v3407_v20 }
0x1b8f   :  { %6185 = vmatpush3.bf16.msra.mxu0 %v3407_v20 }
0x1b90   :  { %6186 = vmatprep.subr.bf16.mxu0 %v3408_v57 }
0x1b93   :  { %6187 = vmatpush3.bf16.msra.mxu0 %v3408_v57 }
0x1b9f   :  { %v6182_v12 = vpop.f32.mrb[92].mxu1 }
0x1ba0   :  { %v3392_v25 = vpop.f32.mrb[93].mxu1 }
0x1ba1   :  { %v6183_v8 = vpop.f32.mrb[94].mxu1 }
0x1ba2   :  { %v3410_v38 = vpack.c.bf16 %v6183_v8, %v6182_v12  ;;  %v3395_v15 = vpop.f32.mrb[95].mxu1 }
0x1ba3   :  { %v3409_v59 = vpack.c.bf16 %v3395_v15, %v3392_v25 }
0x1ba5   :  { %6188 = vmatprep.subr.bf16.mxu0 %v3409_v59 }
0x1ba6   :  { %6189 = vmatpush3.bf16.msra.mxu0 %v3409_v59 }
0x1ba7   :  { %6190 = vmatprep.subr.bf16.mxu0 %v3410_v38 }
0x1baa   :  { %6191 = vmatpush3.bf16.msra.mxu0 %v3410_v38 }
0x1bad   :  { %6193 = vmatmul.mubr.msk.bf16.vlgmr.msra.gmra.mrb[88].mxu0 %vm551_vm1, %v8348_v26 }
0x1bae   :  { %6196 = vmatprep.mubr.msk.bf16.mxu0 %vm551_vm1, %v8352_v54 }
0x1bb5   :  { %6197 = vmatmul.mubr.msk.bf16.gmra.mrb[92].mxu0 %vm551_vm1, %v8356_v22 }
0x1c80   :  { %v6194_v60 = vpop.f32.mrb[88].mxu0 }
0x1c81   :  { %v3445_v45 = vpop.f32.mrb[89].mxu0  ;;  %v3478_v17 = vmax.f32 %v6194_v60, 0.0 }
0x1c82   :  { %v6195_v61 = vpop.f32.mrb[90].mxu0  ;;  %v3476_v0 = vmax.f32 %v3445_v45, 0.0 }
0x1c83   :  { %v3479_v47 = vmax.f32 %v6195_v61, 0.0  ;;  %v3448_v27 = vpop.f32.mrb[91].mxu0 }
0x1c84   :  { %v3477_v31 = vmax.f32 %v3448_v27, 0.0 }
0x1c85   :  { %v8568_v9 = vpack.c.bf16 %v3479_v47, %v3478_v17 }
0x1c86   :  { %v8570_v26 = vpack.c.bf16 %v3477_v31, %v3476_v0 }
0x1c88   :  { %v6198_v16 = vpop.f32.mrb[92].mxu0  ;;  %6204 = vmatprep.mubr.msk.bf16.mxu1 %vm437_vm0, %v8570_v26 }
0x1c89   :  { %v3482_v54 = vmax.f32 %v6198_v16, 0.0  ;;  %v3461_v22 = vpop.f32.mrb[93].mxu0  ;;  %6205 = vmatmul.mubr.msk.bf16.vlgmr.msra.gmra.mrb[96].mxu1 %vm437_vm0, %v8568_v9 }
0x1c8a   :  { %v3480_v49 = vmax.f32 %v3461_v22, 0.0  ;;  %v6199_v3 = vpop.f32.mrb[94].mxu0 }
0x1c8b   :  { %v3483_v34 = vmax.f32 %v6199_v3, 0.0  ;;  %v3464_v42 = vpop.f32.mrb[95].mxu0 }
0x1c8c   :  { %v3481_v40 = vmax.f32 %v3464_v42, 0.0 }
0x1c8d   :  { %v8576_v11 = vpack.c.bf16 %v3483_v34, %v3482_v54 }
0x1c8e   :  { %v8578_v51 = vpack.c.bf16 %v3481_v40, %v3480_v49 }
0x1c90   :  { %6208 = vmatprep.mubr.msk.bf16.mxu1 %vm437_vm0, %v8578_v51 }
0x1c91   :  { %6209 = vmatmul.mubr.msk.bf16.gmra.mrb[100].mxu1 %vm437_vm0, %v8576_v11 }
0x1c92   :  { %6232 = vmatprep.mubr.msk.bf16.mxu1 %vm551_vm1, %v8376_v52 }
0x1d5c   :  { %v8586_v19 = vpop.f32.mrb[96].mxu1 }
0x1d5d   :  { %v8590_v56 = vadd.f32 %v8586_v19, %v8384_v46  ;;  %3593 = vrot.lane.b32.xlu0 %v8586_v19, %s7408_s10  ;;  %v8593_v21 = vpop.f32.mrb[97].mxu1 }
0x1d5e   :  { %v8597_v28 = vadd.f32 %v8391_v7, %v8593_v21  ;;  %v8599_v13 = vpop.f32.mrb[98].mxu1 }
0x1d5f   :  { %v8603_v52 = vadd.f32 %v8599_v13, %v8397_v37  ;;  %v8605_v41 = vpop.f32.mrb[99].mxu1 }
0x1d60   :  { %v8609_v46 = vadd.f32 %v8403_v1, %v8605_v41  ;;  %3591 = vrot.lane.b32.xlu1 %v8605_v41, %s7408_s10 }
0x1d61   :  { %3589 = vrot.lane.b32.xlu0 %v8593_v21, %s7408_s10 }
0x1d64   :  { %3595 = vrot.lane.b32.xlu1 %v8599_v13, %s7408_s10  ;;  %v8614_v7 = vpop.f32.mrb[100].mxu1 }
0x1d65   :  { %v8618_v18 = vadd.f32 %v8614_v7, %v8412_v48  ;;  %3627 = vrot.lane.b32.xlu0 %v5573_v32, %s7408_s10  ;;  %v8620_v37 = vpop.f32.mrb[101].mxu1 }
0x1d66   :  { %v8624_v1 = vadd.f32 %v8418_v50, %v8620_v37  ;;  %v8626_v57 = vpop.f32.mrb[102].mxu1 }
0x1d67   :  { %v8630_v30 = vadd.f32 %v8626_v57, %v8424_v23  ;;  %v8632_v20 = vpop.f32.mrb[103].mxu1 }
0x1d68   :  { %v8636_v12 = vadd.f32 %v8430_v4, %v8632_v20  ;;  %3597 = vrot.lane.b32.xlu1 %v8620_v37, %s7408_s10 }
0x1d69   :  { %3599 = vrot.lane.b32.xlu0 %v8632_v20, %s7408_s10 }
0x1d6c   :  { %3601 = vrot.lane.b32.xlu1 %v8614_v7, %s7408_s10 }
0x1d6d   :  { %3603 = vrot.lane.b32.xlu0 %v8626_v57, %s7408_s10 }
0x1dcf   :  { %v3594_v48 = vpop.permute.xlu0 %3593 }
0x1dd0   :  { %v3615_v23 = vadd.f32 %v8038_v5, %v3594_v48 }
0x1dd2   :  { %v3592_v50 = vpop.permute.xlu1 %3591 }
0x1dd3   :  { %v3590_v25 = vpop.permute.xlu0 %3589  ;;  %v3614_v8 = vadd.f32 %v3592_v50, %v8046_v14 }
0x1dd4   :  { %v3613_v38 = vadd.f32 %v3590_v25, %v8040_v6 }
0x1dd6   :  { %v3596_v15 = vpop.permute.xlu1 %3595 }
0x1dd7   :  { %v3616_v4 = vadd.f32 %v8042_v10, %v3596_v15  ;;  %v3628_v59 = vpop.permute.xlu0 %3627 }
0x1dd8   :  { %v3630_v63 = vadd.f32 %v3628_v59, %v3613_v38  ;;  %v3631_v60 = vadd.f32 %v3628_v59, %v3614_v8  ;;  %v3632_v45 = vadd.f32 %v3628_v59, %v3615_v23 }
0x1dd9   :  { %v3633_v61 = vadd.f32 %v3628_v59, %v3616_v4 }
0x1dda   :  { %v3598_v17 = vpop.permute.xlu1 %3597  ;;  %vm3638_vm10 = vcmp.gt.f32.partialorder %v3630_v63, 0.0  ;;  %v3646_v47 = vmul.f32 0.01, %v3630_v63  ;;  %vm3639_vm11 = vcmp.gt.f32.partialorder %v3631_v60, 0.0  ;;  %v3647_v27 = vmul.f32 0.01, %v3631_v60 }
0x1ddb   :  { %v3617_v5 = vadd.f32 %v3598_v17, %v8052_v33  ;;  %v3600_v0 = vpop.permute.xlu0 %3599  ;;  %vm3641_vm13 = vcmp.gt.f32.partialorder %v3633_v61, 0.0  ;;  %v3649_v14 = vmul.f32 0.01, %v3633_v61  ;;  %vm3640_vm14 = vcmp.gt.f32.partialorder %v3632_v45, 0.0 }
0x1ddc   :  { %v3618_v6 = vadd.f32 %v3600_v0, %v8058_v39  ;;  %v3654_v10 = vsel %vm3638_vm10, %v3630_v63, %v3646_v47  ;;  %v3655_v31 = vsel %vm3639_vm11, %v3631_v60, %v3647_v27  ;;  %v3648_v16 = vmul.f32 0.01, %v3632_v45 }
0x1ddd   :  { %v3634_v54 = vadd.f32 %v3628_v59, %v3617_v5  ;;  %v3663_v22 = vsel %vm3662_vm9, %v3654_v10, -inf  ;;  %v3666_v49 = vsel %vm3662_vm9, %v3655_v31, -inf  ;;  %v3657_v42 = vsel %vm3641_vm13, %v3633_v61, %v3649_v14 }
0x1dde   :  { %v3635_v3 = vadd.f32 %v3628_v59, %v3618_v6  ;;  %3664 = vmax.xlane.f32.xlu1 %v3663_v22  ;;  %v3602_v34 = vpop.permute.xlu1 %3601  ;;  %3667 = vmax.xlane.f32.xlu0 %v3666_v49  ;;  %v3656_v33 = vsel %vm3640_vm14, %v3632_v45, %v3648_v16  ;;  %v3672_v23 = vsel %vm3662_vm9, %v3657_v42, -inf }
0x1ddf   :  { %v3619_v40 = vadd.f32 %v8050_v29, %v3602_v34  ;;  %v3604_v32 = vpop.permute.xlu0 %3603  ;;  %vm3642_vm15 = vcmp.gt.f32.partialorder %v3634_v54, 0.0  ;;  %v3650_v48 = vmul.f32 0.01, %v3634_v54  ;;  %v3669_v8 = vsel %vm3662_vm9, %v3656_v33, -inf }
0x1de0   :  { %v3620_v39 = vadd.f32 %v8054_v35, %v3604_v32  ;;  %vm3643_vm3 = vcmp.gt.f32.partialorder %v3635_v3, 0.0  ;;  %v3651_v50 = vmul.f32 0.01, %v3635_v3 }
0x1de1   :  { %v3636_v25 = vadd.f32 %v3628_v59, %v3619_v40  ;;  %v3658_v15 = vsel %vm3642_vm15, %v3634_v54, %v3650_v48  ;;  %vm4456_vm15 = vcmask 39936  }
0x1de2   :  { %v3637_v38 = vadd.f32 %v3628_v59, %v3620_v39  ;;  %3673 = vmax.xlane.f32.xlu1 %v3672_v23  ;;  %3670 = vmax.xlane.f32.xlu0 %v3669_v8  ;;  %v3659_v4 = vsel %vm3643_vm3, %v3635_v3, %v3651_v50  ;;  %v3675_v60 = vsel %vm3662_vm9, %v3658_v15, -inf }
0x1de3   :  { %vm3644_vm4 = vcmp.gt.f32.partialorder %v3636_v25, 0.0  ;;  %v3652_v63 = vmul.f32 0.01, %v3636_v25  ;;  %v3678_v35 = vsel %vm3662_vm9, %v3659_v4, -inf }
0x1de4   :  { %vm3645_vm5 = vcmp.gt.f32.partialorder %v3637_v38, 0.0  ;;  %v3653_v29 = vmul.f32 0.01, %v3637_v38 }
0x1de5   :  { %v3660_v45 = vsel %vm3644_vm4, %v3636_v25, %v3652_v63 }
0x1de6   :  { %3676 = vmax.xlane.f32.xlu0 %v3675_v60  ;;  %3679 = vmax.xlane.f32.xlu1 %v3678_v35  ;;  %v3661_v61 = vsel %vm3645_vm5, %v3637_v38, %v3653_v29  ;;  %v3681_v17 = vsel %vm3662_vm9, %v3660_v45, -inf }
0x1de7   :  { %v3684_v59 = vsel %vm3662_vm9, %v3661_v61, -inf }
0x1dea   :  { %3682 = vmax.xlane.f32.xlu0 %v3681_v17  ;;  %3685 = vmax.xlane.f32.xlu1 %v3684_v59 }
0x1e6b   :  { %v3665_v47 = vpop.xlane.xlu1 %3664  ;;  %v3668_v27 = vpop.xlane.xlu0 %3667 }
0x1e6c   :  { %v3687_v5 = vsub.f32 %v3654_v10, %v3665_v47  ;;  %v3688_v0 = vsub.f32 %v3655_v31, %v3668_v27 }
0x1e6e   :  { %v3695_v14 = vmul.f32 1.442695, %v3687_v5  ;;  %v3697_v6 = vmul.f32 1.442695, %v3688_v0 }
0x1e6f   :  { %v3674_v16 = vpop.xlane.xlu1 %3673  ;;  %v3671_v54 = vpop.xlane.xlu0 %3670 }
0x1e70   :  { %6579 = vpow2.f32 %v3695_v14  ;;  %v3690_v22 = vsub.f32 %v3657_v42, %v3674_v16  ;;  %v3689_v49 = vsub.f32 %v3656_v33, %v3671_v54 }
0x1e71   :  { %6581 = vpow2.f32 %v3697_v6 }
0x1e72   :  { %v3701_v3 = vmul.f32 1.442695, %v3690_v22  ;;  %v3699_v34 = vmul.f32 1.442695, %v3689_v49 }
0x1e73   :  { %v3680_v40 = vpop.xlane.xlu1 %3679  ;;  %v3677_v32 = vpop.xlane.xlu0 %3676 }
0x1e74   :  { %6583 = vpow2.f32 %v3701_v3  ;;  %v3692_v48 = vsub.f32 %v3659_v4, %v3680_v40  ;;  %v3691_v39 = vsub.f32 %v3658_v15, %v3677_v32 }
0x1e75   :  { %6585 = vpow2.f32 %v3699_v34 }
0x1e76   :  { %v3705_v50 = vmul.f32 1.442695, %v3692_v48  ;;  %v3703_v25 = vmul.f32 1.442695, %v3691_v39 }
0x1e77   :  { %v3686_v10 = vpop.xlane.xlu1 %3685  ;;  %v3683_v31 = vpop.xlane.xlu0 %3682 }
0x1e78   :  { %6587 = vpow2.f32 %v3705_v50  ;;  %v3694_v23 = vsub.f32 %v3661_v61, %v3686_v10  ;;  %v3693_v8 = vsub.f32 %v3660_v45, %v3683_v31 }
0x1e79   :  { %6589 = vpow2.f32 %v3703_v25 }
0x1e7a   :  { %v6580_v38 = vpop.eup %6579  ;;  %v3709_v42 = vmul.f32 1.442695, %v3694_v23  ;;  %v3707_v33 = vmul.f32 1.442695, %v3693_v8 }
0x1e7b   :  { %v6582_v63 = vpop.eup %6581  ;;  %3719 = vrot.lane.b32.xlu0 %v6580_v38, %s7409_s6 }
0x1e7c   :  { %6591 = vpow2.f32 %v3709_v42  ;;  %3721 = vrot.lane.b32.xlu1 %v6582_v63, %s7409_s6 }
0x1e7d   :  { %6593 = vpow2.f32 %v3707_v33 }
0x1e7e   :  { %v6584_v15 = vpop.eup %6583 }
0x1e7f   :  { %v6586_v4 = vpop.eup %6585  ;;  %3725 = vrot.lane.b32.xlu0 %v6584_v15, %s7409_s6 }
0x1e80   :  { %3723 = vrot.lane.b32.xlu1 %v6586_v4, %s7409_s6 }
0x1e82   :  { %v8662_v29 = vpop.eup %6587 }
0x1e83   :  { %v8664_v60 = vpop.eup %6589  ;;  %3729 = vrot.lane.b32.xlu0 %v8662_v29, %s7409_s6 }
0x1e84   :  { %3727 = vrot.lane.b32.xlu1 %v8664_v60, %s7409_s6 }
0x1e86   :  { %v8670_v35 = vpop.eup %6591 }
0x1e87   :  { %v8672_v45 = vpop.eup %6593  ;;  %3733 = vrot.lane.b32.xlu0 %v8670_v35, %s7409_s6 }
0x1e88   :  { %3731 = vrot.lane.b32.xlu1 %v8672_v45, %s7409_s6 }
0x1eed   :  { %v3720_v61 = vpop.permute.xlu0 %3719 }
0x1eee   :  { %v3722_v17 = vpop.permute.xlu1 %3721  ;;  %v3743_v59 = vsel %vm2344_vm12, %v3720_v61, 0.0 }
0x1eef   :  { %v3746_v47 = vsel %vm2344_vm12, %v3722_v17, 0.0  ;;  %3744 = vadd.xlane.f32.xlu1 %v3743_v59 }
0x1ef0   :  { %3747 = vadd.xlane.f32.xlu0 %v3746_v47 }
0x1ef1   :  { %v3726_v27 = vpop.permute.xlu0 %3725 }
0x1ef2   :  { %v3724_v5 = vpop.permute.xlu1 %3723  ;;  %v3752_v0 = vsel %vm2344_vm12, %v3726_v27, 0.0 }
0x1ef3   :  { %v3749_v14 = vsel %vm2344_vm12, %v3724_v5, 0.0  ;;  %3753 = vadd.xlane.f32.xlu1 %v3752_v0 }
0x1ef4   :  { %3750 = vadd.xlane.f32.xlu0 %v3749_v14 }
0x1ef5   :  { %v3730_v6 = vpop.permute.xlu0 %3729 }
0x1ef6   :  { %v3728_v16 = vpop.permute.xlu1 %3727  ;;  %v3758_v54 = vsel %vm2344_vm12, %v3730_v6, 0.0 }
0x1ef7   :  { %v3755_v22 = vsel %vm2344_vm12, %v3728_v16, 0.0  ;;  %3759 = vadd.xlane.f32.xlu1 %v3758_v54 }
0x1ef8   :  { %3756 = vadd.xlane.f32.xlu0 %v3755_v22 }
0x1ef9   :  { %v3734_v49 = vpop.permute.xlu0 %3733 }
0x1efa   :  { %v3732_v3 = vpop.permute.xlu1 %3731  ;;  %v3764_v34 = vsel %vm2344_vm12, %v3734_v49, 0.0 }
0x1efb   :  { %v3761_v40 = vsel %vm2344_vm12, %v3732_v3, 0.0  ;;  %3765 = vadd.xlane.f32.xlu1 %v3764_v34 }
0x1efc   :  { %3762 = vadd.xlane.f32.xlu0 %v3761_v40 }
0x1f7c   :  { %v3745_v32 = vpop.xlane.xlu1 %3744 }
0x1f7d   :  { %6595 = vrcp.f32 %v3745_v32  ;;  %v3748_v48 = vpop.xlane.xlu0 %3747 }
0x1f7e   :  { %6597 = vrcp.f32 %v3748_v48 }
0x1f80   :  { %v3754_v39 = vpop.xlane.xlu1 %3753 }
0x1f81   :  { %6599 = vrcp.f32 %v3754_v39  ;;  %v3751_v50 = vpop.xlane.xlu0 %3750 }
0x1f82   :  { %6601 = vrcp.f32 %v3751_v50 }
0x1f84   :  { %v3760_v25 = vpop.xlane.xlu1 %3759 }
0x1f85   :  { %6603 = vrcp.f32 %v3760_v25  ;;  %v3757_v10 = vpop.xlane.xlu0 %3756 }
0x1f86   :  { %6605 = vrcp.f32 %v3757_v10 }
0x1f87   :  { %v6596_v31 = vpop.eup %6595 }
0x1f88   :  { %v6598_v23 = vpop.eup %6597  ;;  %v3766_v8 = vpop.xlane.xlu1 %3765  ;;  %v8686_v42 = vmul.f32 %v6596_v31, %v6580_v38 }
0x1f89   :  { %6607 = vrcp.f32 %v3766_v8  ;;  %v3763_v33 = vpop.xlane.xlu0 %3762  ;;  %v8688_v61 = vmul.f32 %v6598_v23, %v6582_v63 }
0x1f8a   :  { %6609 = vrcp.f32 %v3763_v33  ;;  %v3783_v17 = vmul.f32 %v8686_v42, %v8686_v42 }
0x1f8b   :  { %v6600_v59 = vpop.eup %6599  ;;  %v3784_v47 = vmul.f32 %v8688_v61, %v8688_v61 }
0x1f8c   :  { %v6602_v27 = vpop.eup %6601  ;;  %3799 = vrot.lane.b32.xlu0 %v3783_v17, %s7409_s6  ;;  %v8695_v5 = vmul.f32 %v6600_v59, %v6584_v15 }
0x1f8d   :  { %3801 = vrot.lane.b32.xlu1 %v3784_v47, %s7409_s6  ;;  %v8698_v38 = vmul.f32 %v6602_v27, %v6586_v4  ;;  %v7410_v27 = vmov 16  }
0x1f8e   :  { %v3786_v63 = vmul.f32 %v8695_v5, %v8695_v5  ;;  %6366 = vset.pattern.permute.xlu0 %v7410_v27  ;;  %6364 = vset.pattern.permute.xlu1 %v7410_v27 }
0x1f8f   :  { %v6604_v0 = vpop.eup %6603  ;;  %v3785_v14 = vmul.f32 %v8698_v38, %v8698_v38 }
0x1f90   :  { %v6606_v6 = vpop.eup %6605  ;;  %3805 = vrot.lane.b32.xlu0 %v3786_v63, %s7409_s6  ;;  %v3780_v16 = vmul.f32 %v6604_v0, %v8662_v29 }
0x1f91   :  { %3803 = vrot.lane.b32.xlu1 %v3785_v14, %s7409_s6  ;;  %v8708_v15 = vmul.f32 %v6606_v6, %v8664_v60 }
0x1f92   :  { %v3788_v54 = vmul.f32 %v3780_v16, %v3780_v16 }
0x1f93   :  { %v6608_v4 = vpop.eup %6607  ;;  %v3787_v22 = vmul.f32 %v8708_v15, %v8708_v15 }
0x1f94   :  { %v6610_v49 = vpop.eup %6609  ;;  %3809 = vrot.lane.b32.xlu0 %v3788_v54, %s7409_s6  ;;  %v8714_v3 = vmul.f32 %v6608_v4, %v8670_v35 }
0x1f95   :  { %3807 = vrot.lane.b32.xlu1 %v3787_v22, %s7409_s6  ;;  %v3781_v29 = vmul.f32 %v6610_v49, %v8672_v45 }
0x1f96   :  { %v3790_v34 = vmul.f32 %v8714_v3, %v8714_v3 }
0x1f97   :  { %v3789_v60 = vmul.f32 %v3781_v29, %v3781_v29 }
0x1f98   :  { %3813 = vrot.lane.b32.xlu0 %v3790_v34, %s7409_s6 }
0x1f99   :  { %3811 = vrot.lane.b32.xlu1 %v3789_v60, %s7409_s6 }
0x1ffe   :  { %v3800_v40 = vpop.permute.xlu0 %3799 }
0x1fff   :  { %v3802_v32 = vpop.permute.xlu1 %3801  ;;  %v3823_v48 = vsel %vm2344_vm12, %v3800_v40, 0.0 }
0x2000   :  { %v3826_v39 = vsel %vm2344_vm12, %v3802_v32, 0.0  ;;  %3824 = vadd.xlane.f32.xlu1 %v3823_v48 }
0x2001   :  { %3827 = vadd.xlane.f32.xlu0 %v3826_v39  ;;  %v7411_v39 = vmov 17  }
0x2002   :  { %v3806_v35 = vpop.permute.xlu0 %3805 }
0x2003   :  { %v3804_v50 = vpop.permute.xlu1 %3803  ;;  %v3832_v45 = vsel %vm2344_vm12, %v3806_v35, 0.0 }
0x2004   :  { %v3829_v25 = vsel %vm2344_vm12, %v3804_v50, 0.0  ;;  %3833 = vadd.xlane.f32.xlu1 %v3832_v45 }
0x2005   :  { %3830 = vadd.xlane.f32.xlu0 %v3829_v25 }
0x2006   :  { %v3810_v10 = vpop.permute.xlu0 %3809 }
0x2007   :  { %v3808_v31 = vpop.permute.xlu1 %3807  ;;  %v3838_v23 = vsel %vm2344_vm12, %v3810_v10, 0.0 }
0x2008   :  { %v3835_v8 = vsel %vm2344_vm12, %v3808_v31, 0.0  ;;  %3839 = vadd.xlane.f32.xlu1 %v3838_v23  ;;  %v6481_v23 = vld [vmem:[#allocation23 + $0x8] sm:$0xff]  }
0x2009   :  { %3836 = vadd.xlane.f32.xlu0 %v3835_v8 }
0x200a   :  { %v3814_v33 = vpop.permute.xlu0 %3813 }
0x200b   :  { %v3812_v17 = vpop.permute.xlu1 %3811  ;;  %v3844_v59 = vsel %vm2344_vm12, %v3814_v33, 0.0 }
0x200c   :  { %v3841_v47 = vsel %vm2344_vm12, %v3812_v17, 0.0  ;;  %3845 = vadd.xlane.f32.xlu1 %v3844_v59  ;;  %v9487_v59 = vld [vmem:[#allocation74_spill] sm:$0xff] }
0x200d   :  { %3842 = vadd.xlane.f32.xlu0 %v3841_v47  ;;  %v9488_v47 = vld [vmem:[#allocation71_spill] sm:$0xff] }
0x208d   :  { %v3825_v63 = vpop.xlane.xlu1 %3824 }
0x208e   :  { %6611 = vrsqrt.f32 %v3825_v63  ;;  %v3828_v0 = vpop.xlane.xlu0 %3827 }
0x2091   :  { %v3834_v14 = vpop.xlane.xlu1 %3833 }
0x2092   :  { %v3831_v6 = vpop.xlane.xlu0 %3830 }
0x2093   :  { %6613 = vrsqrt.f32 %v3831_v6  ;;  %v9489_v6 = vld [vmem:[#allocation59_spill] sm:$0xff] }
0x2095   :  { %v3840_v54 = vpop.xlane.xlu1 %3839 }
0x2096   :  { %6615 = vrsqrt.f32 %v3840_v54  ;;  %v3837_v4 = vpop.xlane.xlu0 %3836  ;;  %v3921_v54 = vunpack.c.l.bf16 %v9489_v6 }
0x2098   :  { %v6612_v22 = vpop.eup %6611 }
0x2099   :  { %v3855_v49 = vmul.f32 %v6612_v22, %v8686_v42  ;;  %v3846_v31 = vpop.xlane.xlu1 %3845 }
0x209a   :  { %v3843_v34 = vpop.xlane.xlu0 %3842 }
0x209b   :  { %3873 = vperm.xlu0 %6366, %v3855_v49   ;;  %6617 = vrsqrt.f32 %v3843_v34 }
0x209c   :  { %6619 = vrsqrt.f32 %v3834_v14  ;;  %v3865_v14 = vunpack.c.l.bf16 %v8568_v9 }
0x209d   :  { %v6614_v60 = vpop.eup %6613  ;;  %6621 = vrsqrt.f32 %v3828_v0 }
0x209e   :  { %v3857_v40 = vmul.f32 %v6614_v60, %v8698_v38  ;;  %v9485_v38 = vld [vmem:[#allocation72_spill] sm:$0xff]  ;;  %6623 = vrsqrt.f32 %v3837_v4  ;;  %v3863_v60 = vunpack.c.l.bf16 %v8570_v26 }
0x209f   :  { %6625 = vrsqrt.f32 %v3846_v31  ;;  %v3866_v31 = vunpack.c.h.bf16 %v8568_v9  ;;  %v3869_v9 = vunpack.c.l.bf16 %v8576_v11 }
0x20a0   :  { %v6616_v32 = vpop.eup %6615  ;;  %3883 = vperm.xlu1 %6364, %v3857_v40  }
0x20a1   :  { %v3860_v48 = vmul.f32 %v6616_v32, %v3780_v16  ;;  %v5589_v16 = vld [vmem:[#allocation35] ss:$0 sm:$0xff] }
0x20a2   :  { %v9491_v32 = vld [vmem:[#allocation60_spill] sm:$0xff] }
0x20a3   :  { %3898 = vperm.xlu0 %6366, %v3860_v48  }
0x20a4   :  { %6365 = vset.pattern.permute.xlu1 %v7411_v39 }
0x20a5   :  { %3936 = vperm.xlu1 %6365, %v3857_v40   ;;  %v6618_v35 = vpop.eup %6617 }
0x20a6   :  { %v6620_v50 = vpop.eup %6619  ;;  %v3861_v42 = vmul.f32 %v6618_v35, %v3781_v29  ;;  %v6480_v29 = vld [vmem:[#allocation23] sm:$0xff]  }
0x20a7   :  { %6374 = vset.pattern.permute.xlu0 %v7411_v39  ;;  %v3858_v45 = vmul.f32 %v6620_v50, %v8695_v5  ;;  %v6622_v25 = vpop.eup %6621  ;;  %v9486_v5 = vld [vmem:[#allocation73_spill] sm:$0xff]  ;;  %6212 = vmatprep.subr.bf16.mxu0 %v6480_v29 }
0x20a8   :  { %3948 = vperm.xlu0 %6374, %v3860_v48   ;;  %v3856_v10 = vmul.f32 %v6622_v25, %v8688_v61  ;;  %6213 = vmatpush3.bf16.msra.mxu0 %v6480_v29  ;;  %v6624_v8 = vpop.eup %6623  ;;  %v3919_v48 = vunpack.c.l.bf16 %v9491_v32 }
0x20a9   :  { %3928 = vperm.xlu1 %6365, %v3855_v49   ;;  %6214 = vmatprep.subr.bf16.mxu0 %v6481_v23  ;;  %v3859_v61 = vmul.f32 %v6624_v8, %v8708_v15  ;;  %v6626_v33 = vpop.eup %6625  ;;  %v9490_v49 = vld [vmem:[#allocation62_spill] sm:$0xff] }
0x20aa   :  { %v3862_v17 = vmul.f32 %v6626_v33, %v8714_v3  ;;  %v3924_v34 = vunpack.c.h.bf16 %v9490_v49 }
0x20ac   :  { %3952 = vperm.xlu0 %6374, %v3861_v42   ;;  %6215 = vmatpush3.bf16.msra.mxu0 %v6481_v23  ;;  %v3922_v23 = vunpack.c.h.bf16 %v9489_v6 }
0x20ad   :  { %6367 = vset.pattern.permute.xlu1 %v7410_v27 }
0x20ae   :  { %3888 = vperm.xlu1 %6367, %v3858_v45  }
0x20b0   :  { %4302 = vrot.lane.b32.xlu0 %v9485_v38, %s7412_s17 }
0x20b2   :  { %6368 = vset.pattern.permute.xlu1 %v7411_v39 }
0x20b3   :  { %3940 = vperm.xlu1 %6368, %v3858_v45  }
0x20b4   :  { %4340 = vrot.lane.b32.xlu0 %v5589_v16, %s7413_s30 }
0x20b7   :  { %6369 = vset.pattern.permute.xlu1 %v7410_v27 }
0x20b8   :  { %3878 = vperm.xlu1 %6369, %v3856_v10   ;;  %4308 = vrot.lane.b32.xlu0 %v9486_v5, %s7412_s17 }
0x20bc   :  { %6370 = vset.pattern.permute.xlu1 %v7411_v39 }
0x20bd   :  { %3932 = vperm.xlu1 %6370, %v3856_v10  }
0x20c1   :  { %6371 = vset.pattern.permute.xlu1 %v7410_v27 }
0x20c2   :  { %3903 = vperm.xlu1 %6371, %v3861_v42  }
0x20c6   :  { %3893 = vperm.xlu1 %6371, %v3859_v61  }
0x20ca   :  { %6372 = vset.pattern.permute.xlu1 %v7411_v39 }
0x20cb   :  { %3944 = vperm.xlu1 %6372, %v3859_v61  }
0x20cf   :  { %6373 = vset.pattern.permute.xlu1 %v7410_v27  ;;  %v3868_v27 = vunpack.c.h.bf16 %v8578_v51 }
0x20d0   :  { %3908 = vperm.xlu1 %6373, %v3862_v17  }
0x20d4   :  { %6375 = vset.pattern.permute.xlu1 %v7411_v39 }
0x20d5   :  { %3956 = vperm.xlu1 %6375, %v3862_v17  }
0x20d9   :  { %4304 = vrot.lane.b32.xlu1 %v9487_v59, %s7412_s17 }
0x20dd   :  { %4306 = vrot.lane.b32.xlu1 %v9488_v47, %s7412_s17 }
0x211a   :  { %v3874_v63 = vpop.permute.xlu0 %3873 }
0x211b   :  { %v3911_v45 = vmul.f32 %v3874_v63, %v3863_v60 }
0x211f   :  { %v3884_v0 = vpop.permute.xlu1 %3883 }
0x2120   :  { %v3913_v3 = vmul.f32 %v3884_v0, %v3865_v14 }
0x2122   :  { %v3899_v15 = vpop.permute.xlu0 %3898 }
0x2123   :  { %v3916_v35 = vmul.f32 %v3899_v15, %v3868_v27  ;;  %v3920_v15 = vunpack.c.h.bf16 %v9491_v32  ;;  %v3867_v32 = vunpack.c.l.bf16 %v8578_v51  ;;  %v6482_v51 = vld [vmem:[#allocation29] sm:$0xff]  }
0x2124   :  { %v3937_v4 = vpop.permute.xlu1 %3936  ;;  %6240 = vmatprep.subr.bf16.mxu0 %v6482_v51 }
0x2125   :  { %v3961_v22 = vmul.f32 %v3937_v4, %v3921_v54  ;;  %v3864_v54 = vunpack.c.h.bf16 %v8570_v26 }
0x2127   :  { %v3969_v40 = vadd.f32 %v3961_v22, %v3913_v3  ;;  %v3949_v39 = vpop.permute.xlu0 %3948 }
0x2128   :  { %v3929_v50 = vpop.permute.xlu1 %3928  ;;  %v3964_v42 = vmul.f32 %v3949_v39, %v3924_v34  ;;  %v9492_v34 = vld [vmem:[#allocation61_spill] sm:$0xff] }
0x2129   :  { %v3959_v16 = vmul.f32 %v3929_v50, %v3919_v48  ;;  %v3925_v60 = vunpack.c.l.bf16 %v9492_v34  ;;  %v3923_v50 = vunpack.c.l.bf16 %v9490_v49 }
0x212a   :  { %v3972_v25 = vadd.f32 %v3964_v42, %v3916_v35 }
0x212b   :  { %v3967_v10 = vadd.f32 %v3959_v16, %v3911_v45  ;;  %v3953_v22 = vpop.permute.xlu0 %3952 }
0x212c   :  { %v3965_v39 = vmul.f32 %v3953_v22, %v3925_v60 }
0x212d   :  { %v3889_v29 = vpop.permute.xlu1 %3888 }
0x212e   :  { %v3914_v61 = vmul.f32 %v3889_v29, %v3866_v31 }
0x2132   :  { %v3941_v8 = vpop.permute.xlu1 %3940 }
0x2133   :  { %v3962_v33 = vmul.f32 %v3941_v8, %v3922_v23  ;;  %v3926_v8 = vunpack.c.h.bf16 %v9492_v34 }
0x2135   :  { %v3970_v17 = vadd.f32 %v3962_v33, %v3914_v61 }
0x2137   :  { %v3980_v0 = vpack.c.bf16 %v3970_v17, %v3969_v40  ;;  %v3879_v14 = vpop.permute.xlu1 %3878 }
0x2138   :  { %v3912_v63 = vmul.f32 %v3879_v14, %v3864_v54 }
0x213c   :  { %v3933_v4 = vpop.permute.xlu1 %3932 }
0x213d   :  { %v3960_v3 = vmul.f32 %v3933_v4, %v3920_v15 }
0x213f   :  { %v3968_v27 = vadd.f32 %v3960_v3, %v3912_v63 }
0x2141   :  { %v3979_v6 = vpack.c.bf16 %v3968_v27, %v3967_v10  ;;  %v3904_v48 = vpop.permute.xlu1 %3903  ;;  %v3870_v10 = vunpack.c.h.bf16 %v8576_v11 }
0x2142   :  { %v3917_v35 = vmul.f32 %v3904_v48, %v3869_v9  ;;  %v6743_v9 = vld [vmem:[#allocation7 + $0x8] sm:$0xff]   ;;  %v6745_v48 = vld [vmem:[#allocation7 + $0x18] sm:$0xff]  }
0x2143   :  { %6216 = vmatprep.mubr.msk.bf16.mxu0 %vm437_vm0, %v3979_v6  ;;  %v6744_v6 = vld [vmem:[#allocation7 + $0x10] sm:$0xff]  }
0x2144   :  { %v3973_v40 = vadd.f32 %v3965_v39, %v3917_v35  ;;  %6217 = vmatmul.mubr.msk.bf16.vlgmr.msra.gmra.mrb[96].mxu0 %vm437_vm0, %v3980_v0  ;;  %v6746_v39 = vld [vmem:[#allocation7] sm:$0xff]   ;;  %v5063_v35 = vld [vmem:[#allocation37] sm:$0xff] }
0x2145   :  { %v3894_v26 = vpop.permute.xlu1 %3893  ;;  %6241 = vmatpush3.bf16.msra.mxu0 %v6482_v51 }
0x2146   :  { %v3915_v45 = vmul.f32 %v3894_v26, %v3867_v32  ;;  %v5097_v26 = vmul.f32 %v5063_v35, %v5063_v35 }
0x214a   :  { %v3945_v42 = vpop.permute.xlu1 %3944 }
0x214b   :  { %v3963_v16 = vmul.f32 %v3945_v42, %v3923_v50 }
0x214d   :  { %v3971_v29 = vadd.f32 %v3963_v16, %v3915_v45 }
0x214f   :  { %v3981_v31 = vpack.c.bf16 %v3972_v25, %v3971_v29  ;;  %v3909_v23 = vpop.permute.xlu1 %3908 }
0x2150   :  { %v3918_v33 = vmul.f32 %v3909_v23, %v3870_v10 }
0x2151   :  { %6220 = vmatprep.mubr.msk.bf16.mxu0 %vm437_vm0, %v3981_v31 }
0x2154   :  { %v3957_v61 = vpop.permute.xlu1 %3956 }
0x2155   :  { %v3966_v17 = vmul.f32 %v3957_v61, %v3926_v8 }
0x2157   :  { %v3974_v0 = vadd.f32 %v3966_v17, %v3918_v33 }
0x2159   :  { %v3982_v14 = vpack.c.bf16 %v3974_v0, %v3973_v40  ;;  %v5064_v40 = vld [vmem:[#allocation37 + $0x8] sm:$0xff] }
0x215a   :  { %v5098_v32 = vmul.f32 %v5064_v40, %v5064_v40  ;;  %v8775_v50 = vpack.c.bf16 %v5064_v40, %v5063_v35 }
0x215b   :  { %6221 = vmatmul.mubr.msk.bf16.gmra.mrb[100].mxu0 %vm437_vm0, %v3982_v14  ;;  %vm4966_vm0 = vcmask 64512  }
0x215c   :  { %9493 = vst [vmem:[#allocation72_spill] sm:$0xff] %v8775_v50  ;;  %v5099_v42 = vsel %vm4966_vm0, %v5097_v26, 0.0  ;;  %v5100_v45 = vsel %vm4966_vm0, %v5098_v32, 0.0  ;;  %6283 = vmatprep.subr.bf16.mxu0 %v8775_v50 }
0x215d   :  { %v8780_v16 = vadd.f32 %v5100_v45, %v5099_v42  ;;  %v9501_v42 = vld [vmem:[#allocation78_spill] sm:$0xff] }
0x215f   :  { %9494 = vst [vmem:[#allocation73_spill] sm:$0xff] %v8780_v16 }
0x2217   :  { %v6218_v49 = vpop.f32.mrb[96].mxu0 }
0x2218   :  { %v4041_v54 = vpop.f32.mrb[97].mxu0 }
0x2219   :  { %v6219_v25 = vpop.f32.mrb[98].mxu0 }
0x221a   :  { %v4073_v15 = vpack.c.bf16 %v6219_v25, %v6218_v49  ;;  %v4044_v4 = vpop.f32.mrb[99].mxu0 }
0x221b   :  { %v4072_v63 = vpack.c.bf16 %v4044_v4, %v4041_v54 }
0x221d   :  { %6224 = vmatprep.subr.bf16.mxu1 %v4072_v63 }
0x221e   :  { %6225 = vmatpush3.bf16.msra.mxu1 %v4072_v63 }
0x221f   :  { %6226 = vmatprep.subr.bf16.mxu1 %v4073_v15 }
0x2222   :  { %6227 = vmatpush3.bf16.msra.mxu1 %v4073_v15 }
0x222e   :  { %v6222_v11 = vpop.f32.mrb[100].mxu0 }
0x222f   :  { %v4057_v3 = vpop.f32.mrb[101].mxu0 }
0x2230   :  { %v6223_v22 = vpop.f32.mrb[102].mxu0 }
0x2231   :  { %v4075_v27 = vpack.c.bf16 %v6223_v22, %v6222_v11  ;;  %v4060_v34 = vpop.f32.mrb[103].mxu0 }
0x2232   :  { %v4074_v60 = vpack.c.bf16 %v4060_v34, %v4057_v3  ;;  %v9496_v34 = vld [vmem:[#allocation66_spill] sm:$0xff] }
0x2234   :  { %6228 = vmatprep.subr.bf16.mxu1 %v4074_v60 }
0x2235   :  { %6229 = vmatpush3.bf16.msra.mxu1 %v4074_v60  ;;  %v9497_v60 = vld [vmem:[#allocation63_spill] sm:$0xff] }
0x2236   :  { %6230 = vmatprep.subr.bf16.mxu1 %v4075_v27 }
0x2239   :  { %6231 = vmatpush3.bf16.msra.mxu1 %v4075_v27  ;;  %v9495_v27 = vld [vmem:[#allocation64_spill] sm:$0xff] }
0x223c   :  { %6233 = vmatmul.mubr.msk.bf16.vlgmr.msra.gmra.mrb[104].mxu1 %vm551_vm1, %v6743_v9  ;;  %v9498_v9 = vld [vmem:[#allocation65_spill] sm:$0xff] }
0x223d   :  { %6236 = vmatprep.mubr.msk.bf16.mxu1 %vm551_vm1, %v6744_v6  ;;  %v9499_v6 = vld [vmem:[#allocation68_spill] sm:$0xff] }
0x2244   :  { %6237 = vmatmul.mubr.msk.bf16.gmra.mrb[108].mxu1 %vm551_vm1, %v6745_v48  ;;  %v9500_v48 = vld [vmem:[#allocation70_spill] sm:$0xff] }
0x2245   :  { %6258 = vmatprep.mubr.msk.bf16.mxu1 %vm551_vm1, %v6746_v39 }
0x230f   :  { %v6234_v29 = vpop.f32.mrb[104].mxu1 }
0x2310   :  { %v4110_v31 = vpop.f32.mrb[105].mxu1  ;;  %v4143_v10 = vmax.f32 %v6234_v29, 0.0 }
0x2311   :  { %v6235_v23 = vpop.f32.mrb[106].mxu1  ;;  %v4141_v33 = vmax.f32 %v4110_v31, 0.0  ;;  %v9502_v31 = vld [vmem:[#allocation76_spill] sm:$0xff] }
0x2312   :  { %v4144_v8 = vmax.f32 %v6235_v23, 0.0  ;;  %v4113_v61 = vpop.f32.mrb[107].mxu1 }
0x2313   :  { %v4142_v17 = vmax.f32 %v4113_v61, 0.0 }
0x2314   :  { %v4150_v0 = vpack.c.bf16 %v4144_v8, %v4143_v10 }
0x2315   :  { %v4149_v14 = vpack.c.bf16 %v4142_v17, %v4141_v33  ;;  %v9506_v33 = vld [vmem:[#allocation77_spill] sm:$0xff] }
0x2317   :  { %v6238_v51 = vpop.f32.mrb[108].mxu1  ;;  %6242 = vmatprep.mubr.msk.bf16.mxu0 %vm1324_vm2, %v4149_v14 }
0x2318   :  { %v4147_v49 = vmax.f32 %v6238_v51, 0.0  ;;  %v4126_v54 = vpop.f32.mrb[109].mxu1  ;;  %6243 = vmatmul.mubr.msk.bf16.vlgmr.msra.gmra.mrb[104].mxu0 %vm1324_vm2, %v4150_v0  ;;  %v9508_v0 = vld [vmem:[#allocation75_spill] sm:$0xff] }
0x2319   :  { %v4145_v25 = vmax.f32 %v4126_v54, 0.0  ;;  %v6239_v15 = vpop.f32.mrb[110].mxu1  ;;  %6285 = vmatpush3.bf16.msra.mxu0 %v8775_v50 }
0x231a   :  { %v4148_v4 = vmax.f32 %v6239_v15, 0.0  ;;  %v4129_v63 = vpop.f32.mrb[111].mxu1 }
0x231b   :  { %v4146_v11 = vmax.f32 %v4129_v63, 0.0 }
0x231c   :  { %v4152_v3 = vpack.c.bf16 %v4148_v4, %v4147_v49  ;;  %v4303_v49 = vpop.permute.xlu0 %4302 }
0x231d   :  { %v4151_v22 = vpack.c.bf16 %v4146_v11, %v4145_v25  ;;  %v4305_v25 = vpop.permute.xlu1 %4304 }
0x231f   :  { %6246 = vmatprep.mubr.msk.bf16.mxu0 %vm1324_vm2, %v4151_v22 }
0x2320   :  { %6247 = vmatmul.mubr.msk.bf16.gmra.mrb[108].mxu0 %vm1324_vm2, %v4152_v3  ;;  %v8851_v54 = vpop.permute.xlu0 %4340 }
0x2321   :  { %6270 = vmatprep.mubr.msk.f32.mxu0 %vm1324_vm2, %v9495_v27  ;;  %v4307_v4 = vpop.permute.xlu1 %4306 }
0x2324   :  { %v4309_v15 = vpop.permute.xlu0 %4308 }
0x2328   :  { %6271 = vmatmul.mubr.msk.f32.vlgmr.msra.gmra.mrb[112].mxu0 %vm1324_vm2, %v9496_v34 }
0x2329   :  { %6273 = vmatprep.mubr.msk.f32.mxu0 %vm1324_vm2, %v9497_v60 }
0x232c   :  { %6274 = vmatmul.mubr.msk.f32.gmra.mrb[114].mxu0 %vm1324_vm2, %v9498_v9 }
0x232d   :  { %6276 = vmatprep.mubr.msk.f32.mxu0 %vm1324_vm2, %v9499_v6 }
0x2330   :  { %6277 = vmatmul.mubr.msk.f32.gmra.mrb[116].mxu0 %vm1324_vm2, %v9500_v48 }
0x23eb   :  { %v8799_v39 = vpop.f32.mrb[104].mxu0 }
0x23ec   :  { %4266 = vrot.lane.b32.xlu0 %v8799_v39, %s7413_s30  ;;  %v8803_v35 = vpop.f32.mrb[105].mxu0 }
0x23ed   :  { %v8805_v40 = vpop.f32.mrb[106].mxu0 }
0x23ee   :  { %4268 = vrot.lane.b32.xlu1 %v8805_v40, %s7413_s30  ;;  %v8809_v26 = vpop.f32.mrb[107].mxu0 }
0x23f0   :  { %4262 = vrot.lane.b32.xlu0 %v8803_v35, %s7413_s30 }
0x23f2   :  { %4264 = vrot.lane.b32.xlu1 %v8809_v26, %s7413_s30 }
0x23f3   :  { %v8815_v32 = vpop.f32.mrb[108].mxu0 }
0x23f4   :  { %4312 = vrot.lane.b32.xlu0 %v9501_v42, %s7412_s17  ;;  %v8819_v45 = vpop.f32.mrb[109].mxu0 }
0x23f5   :  { %v8821_v29 = vpop.f32.mrb[110].mxu0 }
0x23f6   :  { %4310 = vrot.lane.b32.xlu1 %v9502_v31, %s7412_s17  ;;  %v8825_v23 = vpop.f32.mrb[111].mxu0 }
0x23f8   :  { %4272 = vrot.lane.b32.xlu0 %v8825_v23, %s7413_s30 }
0x23fa   :  { %4270 = vrot.lane.b32.xlu1 %v8819_v45, %s7413_s30 }
0x23fb   :  { %v8831_v10 = vpop.f32.mrb[112].mxu0 }
0x23fc   :  { %9503 = vst [vmem:[#allocation74_spill] sm:$0xff] %v8831_v10  ;;  %4276 = vrot.lane.b32.xlu0 %v8821_v29, %s7413_s30  ;;  %v8835_v8 = vpop.f32.mrb[113].mxu0 }
0x23fd   :  { %9504 = vst [vmem:[#allocation71_spill] sm:$0xff] %v8835_v8 }
0x23fe   :  { %4274 = vrot.lane.b32.xlu1 %v8815_v32, %s7413_s30 }
0x23ff   :  { %v8839_v61 = vpop.f32.mrb[114].mxu0 }
0x2400   :  { %9505 = vst [vmem:[#allocation59_spill] sm:$0xff] %v8839_v61  ;;  %4316 = vrot.lane.b32.xlu0 %v9506_v33, %s7412_s17  ;;  %v8843_v17 = vpop.f32.mrb[115].mxu0 }
0x2401   :  { %9507 = vst [vmem:[#allocation62_spill] sm:$0xff] %v8843_v17 }
0x2402   :  { %4314 = vrot.lane.b32.xlu1 %v9508_v0, %s7412_s17 }
0x2403   :  { %v8847_v14 = vpop.f32.mrb[116].mxu0 }
0x2404   :  { %9509 = vst [vmem:[#allocation60_spill] sm:$0xff] %v8847_v14  ;;  %v8849_v51 = vpop.f32.mrb[117].mxu0 }
0x2405   :  { %9510 = vst [vmem:[#allocation61_spill] sm:$0xff] %v8849_v51 }
0x245e   :  { %v4267_v63 = vpop.permute.xlu0 %4266 }
0x245f   :  { %v4288_v11 = vadd.f32 %v4267_v63, %v8590_v56 }
0x2460   :  { %v4269_v3 = vpop.permute.xlu1 %4268 }
0x2461   :  { %v4289_v22 = vadd.f32 %v4269_v3, %v8603_v52  ;;  %v4328_v61 = vadd.f32 %v4307_v4, %v4288_v11 }
0x2462   :  { %v4263_v17 = vpop.permute.xlu0 %4262 }
0x2463   :  { %v4329_v8 = vadd.f32 %v4309_v15, %v4289_v22  ;;  %v4286_v10 = vadd.f32 %v4263_v17, %v8597_v28  ;;  %v4345_v48 = vadd.f32 %v8851_v54, %v4328_v61 }
0x2464   :  { %v4265_v14 = vpop.permute.xlu1 %4264 }
0x2465   :  { %v4346_v51 = vadd.f32 %v8851_v54, %v4329_v8  ;;  %v4326_v16 = vadd.f32 %v4303_v49, %v4286_v10  ;;  %v4287_v50 = vadd.f32 %v4265_v14, %v8609_v46  ;;  %v4361_v28 = vmul.f32 0.01, %v4345_v48 }
0x2466   :  { %v4313_v6 = vpop.permute.xlu0 %4312  ;;  %vm4353_vm9 = vcmp.gt.f32.partialorder %v4345_v48, 0.0 }
0x2467   :  { %v4343_v9 = vadd.f32 %v8851_v54, %v4326_v16  ;;  %v4327_v56 = vadd.f32 %v4305_v25, %v4287_v50  ;;  %v4362_v15 = vmul.f32 0.01, %v4346_v51  ;;  %vm4354_vm7 = vcmp.gt.f32.partialorder %v4346_v51, 0.0 }
0x2468   :  { %v4311_v63 = vpop.permute.xlu1 %4310 }
0x2469   :  { %v4344_v52 = vadd.f32 %v8851_v54, %v4327_v56  ;;  %vm4351_vm12 = vcmp.gt.f32.partialorder %v4343_v9, 0.0  ;;  %v4359_v4 = vmul.f32 0.01, %v4343_v9  ;;  %v4370_v49 = vsel %vm4354_vm7, %v4346_v51, %v4362_v15 }
0x246a   :  { %v4273_v11 = vpop.permute.xlu0 %4272 }
0x246b   :  { %v4291_v10 = vadd.f32 %v4273_v11, %v8636_v12  ;;  %v4367_v8 = vsel %vm4351_vm12, %v4343_v9, %v4359_v4  ;;  %vm4352_vm8 = vcmp.gt.f32.partialorder %v4344_v52, 0.0  ;;  %v4360_v46 = vmul.f32 0.01, %v4344_v52 }
0x246c   :  { %v4271_v61 = vpop.permute.xlu1 %4270  ;;  %v4376_v17 = vsel %vm4375_vm6, %v4367_v8, -inf  ;;  %v4369_v12 = vsel %vm4353_vm9, %v4345_v48, %v4361_v28  ;;  %v4385_v4 = vsel %vm4375_vm6, %v4370_v49, -inf }
0x246d   :  { %v4331_v50 = vadd.f32 %v4313_v6, %v4291_v10  ;;  %v4290_v16 = vadd.f32 %v4271_v61, %v8624_v1  ;;  %4377 = vmax.xlane.f32.xlu1 %v4376_v17  ;;  %v4368_v14 = vsel %vm4352_vm8, %v4344_v52, %v4360_v46  ;;  %v4382_v15 = vsel %vm4375_vm6, %v4369_v12, -inf }
0x246e   :  { %v4277_v25 = vpop.permute.xlu0 %4276  ;;  %v4379_v3 = vsel %vm4375_vm6, %v4368_v14, -inf }
0x246f   :  { %v4348_v22 = vadd.f32 %v8851_v54, %v4331_v50  ;;  %v4330_v56 = vadd.f32 %v4311_v63, %v4290_v16  ;;  %4380 = vmax.xlane.f32.xlu0 %v4379_v3  ;;  %v4293_v6 = vadd.f32 %v4277_v25, %v8630_v30 }
0x2470   :  { %v4275_v9 = vpop.permute.xlu1 %4274 }
0x2471   :  { %v4347_v11 = vadd.f32 %v8851_v54, %v4330_v56  ;;  %4386 = vmax.xlane.f32.xlu1 %v4385_v4  ;;  %vm4356_vm10 = vcmp.gt.f32.partialorder %v4348_v22, 0.0  ;;  %v4364_v1 = vmul.f32 0.01, %v4348_v22  ;;  %v4292_v51 = vadd.f32 %v4275_v9, %v8618_v18 }
0x2472   :  { %v4317_v52 = vpop.permute.xlu0 %4316 }
0x2473   :  { %v4333_v10 = vadd.f32 %v4317_v52, %v4293_v6  ;;  %4383 = vmax.xlane.f32.xlu0 %v4382_v15  ;;  %v4372_v63 = vsel %vm4356_vm10, %v4348_v22, %v4364_v1  ;;  %vm4355_vm11 = vcmp.gt.f32.partialorder %v4347_v11, 0.0  ;;  %v4363_v48 = vmul.f32 0.01, %v4347_v11 }
0x2474   :  { %v4315_v28 = vpop.permute.xlu1 %4314  ;;  %v4391_v46 = vsel %vm4375_vm6, %v4372_v63, -inf }
0x2475   :  { %v4350_v61 = vadd.f32 %v8851_v54, %v4333_v10  ;;  %v4332_v17 = vadd.f32 %v4315_v28, %v4292_v51  ;;  %4392 = vmax.xlane.f32.xlu1 %v4391_v46  ;;  %v4371_v30 = vsel %vm4355_vm11, %v4347_v11, %v4363_v48 }
0x2476   :  { %v4388_v50 = vsel %vm4375_vm6, %v4371_v30, -inf }
0x2477   :  { %v4349_v18 = vadd.f32 %v8851_v54, %v4332_v17  ;;  %4389 = vmax.xlane.f32.xlu0 %v4388_v50  ;;  %vm4358_vm13 = vcmp.gt.f32.partialorder %v4350_v61, 0.0  ;;  %v4366_v16 = vmul.f32 0.01, %v4350_v61 }
0x2479   :  { %v4374_v25 = vsel %vm4358_vm13, %v4350_v61, %v4366_v16  ;;  %vm4357_vm14 = vcmp.gt.f32.partialorder %v4349_v18, 0.0  ;;  %v4365_v3 = vmul.f32 0.01, %v4349_v18 }
0x247a   :  { %v4397_v22 = vsel %vm4375_vm6, %v4374_v25, -inf }
0x247b   :  { %4398 = vmax.xlane.f32.xlu1 %v4397_v22  ;;  %v4373_v56 = vsel %vm4357_vm14, %v4349_v18, %v4365_v3 }
0x247c   :  { %v4394_v9 = vsel %vm4375_vm6, %v4373_v56, -inf }
0x247d   :  { %4395 = vmax.xlane.f32.xlu0 %v4394_v9 }
0x24fa   :  { %v4378_v4 = vpop.xlane.xlu1 %4377 }
0x24fb   :  { %v4400_v6 = vsub.f32 %v4367_v8, %v4378_v4 }
0x24fc   :  { %v4381_v11 = vpop.xlane.xlu0 %4380 }
0x24fd   :  { %v4408_v1 = vmul.f32 1.442695, %v4400_v6  ;;  %v4401_v51 = vsub.f32 %v4368_v14, %v4381_v11 }
0x24fe   :  { %v4387_v52 = vpop.xlane.xlu1 %4386 }
0x24ff   :  { %6627 = vpow2.f32 %v4408_v1  ;;  %v4410_v54 = vmul.f32 1.442695, %v4401_v51  ;;  %v4403_v15 = vsub.f32 %v4370_v49, %v4387_v52 }
0x2500   :  { %v4384_v10 = vpop.xlane.xlu0 %4383 }
0x2501   :  { %6629 = vpow2.f32 %v4410_v54  ;;  %v4414_v48 = vmul.f32 1.442695, %v4403_v15  ;;  %v4402_v28 = vsub.f32 %v4369_v12, %v4384_v10 }
0x2502   :  { %v4393_v46 = vpop.xlane.xlu1 %4392 }
0x2503   :  { %6631 = vpow2.f32 %v4414_v48  ;;  %v4412_v61 = vmul.f32 1.442695, %v4402_v28  ;;  %v4405_v17 = vsub.f32 %v4372_v63, %v4393_v46 }
0x2504   :  { %v4390_v50 = vpop.xlane.xlu0 %4389 }
0x2505   :  { %6633 = vpow2.f32 %v4412_v61  ;;  %v4418_v18 = vmul.f32 1.442695, %v4405_v17  ;;  %v4404_v16 = vsub.f32 %v4371_v30, %v4390_v50 }
0x2507   :  { %6635 = vpow2.f32 %v4418_v18  ;;  %v4416_v8 = vmul.f32 1.442695, %v4404_v16 }
0x2508   :  { %v4399_v3 = vpop.xlane.xlu1 %4398 }
0x2509   :  { %v8877_v14 = vpop.eup %6627  ;;  %6637 = vpow2.f32 %v4416_v8  ;;  %v4407_v22 = vsub.f32 %v4374_v25, %v4399_v3 }
0x250a   :  { %4432 = vrot.lane.b32.xlu0 %v8877_v14, %s7414_s2  ;;  %v4396_v49 = vpop.xlane.xlu0 %4395 }
0x250b   :  { %v6630_v12 = vpop.eup %6629  ;;  %v4422_v9 = vmul.f32 1.442695, %v4407_v22  ;;  %v4406_v4 = vsub.f32 %v4373_v56, %v4396_v49 }
0x250c   :  { %4434 = vrot.lane.b32.xlu1 %v6630_v12, %s7414_s2 }
0x250d   :  { %v8882_v63 = vpop.eup %6631  ;;  %6639 = vpow2.f32 %v4422_v9  ;;  %v4420_v30 = vmul.f32 1.442695, %v4406_v4 }
0x250e   :  { %4438 = vrot.lane.b32.xlu0 %v8882_v63, %s7414_s2 }
0x250f   :  { %v8886_v6 = vpop.eup %6633  ;;  %6641 = vpow2.f32 %v4420_v30 }
0x2510   :  { %4436 = vrot.lane.b32.xlu1 %v8886_v6, %s7414_s2 }
0x2511   :  { %v8890_v25 = vpop.eup %6635 }
0x2512   :  { %4442 = vrot.lane.b32.xlu0 %v8890_v25, %s7414_s2 }
0x2513   :  { %v8894_v56 = vpop.eup %6637 }
0x2514   :  { %4440 = vrot.lane.b32.xlu1 %v8894_v56, %s7414_s2 }
0x2517   :  { %v8898_v11 = vpop.eup %6639 }
0x2518   :  { %4446 = vrot.lane.b32.xlu0 %v8898_v11, %s7414_s2 }
0x2519   :  { %v8902_v1 = vpop.eup %6641 }
0x251a   :  { %4444 = vrot.lane.b32.xlu1 %v8902_v1, %s7414_s2 }
0x257c   :  { %v4433_v51 = vpop.permute.xlu0 %4432 }
0x257d   :  { %v4457_v52 = vsel %vm4456_vm15, %v4433_v51, 0.0 }
0x257e   :  { %4458 = vadd.xlane.f32.xlu1 %v4457_v52  ;;  %v4435_v54 = vpop.permute.xlu1 %4434 }
0x257f   :  { %v4460_v15 = vsel %vm4456_vm15, %v4435_v54, 0.0 }
0x2580   :  { %v4439_v10 = vpop.permute.xlu0 %4438  ;;  %4461 = vadd.xlane.f32.xlu0 %v4460_v15 }
0x2581   :  { %v4466_v48 = vsel %vm4456_vm15, %v4439_v10, 0.0 }
0x2582   :  { %4467 = vadd.xlane.f32.xlu1 %v4466_v48  ;;  %v4437_v28 = vpop.permute.xlu1 %4436 }
0x2583   :  { %v4463_v46 = vsel %vm4456_vm15, %v4437_v28, 0.0 }
0x2584   :  { %v4443_v61 = vpop.permute.xlu0 %4442  ;;  %4464 = vadd.xlane.f32.xlu0 %v4463_v46 }
0x2585   :  { %v4472_v17 = vsel %vm4456_vm15, %v4443_v61, 0.0 }
0x2586   :  { %4473 = vadd.xlane.f32.xlu1 %v4472_v17  ;;  %v4441_v50 = vpop.permute.xlu1 %4440 }
0x2587   :  { %v4469_v18 = vsel %vm4456_vm15, %v4441_v50, 0.0 }
0x2588   :  { %4470 = vadd.xlane.f32.xlu0 %v4469_v18 }
0x258a   :  { %v4447_v16 = vpop.permute.xlu0 %4446 }
0x258b   :  { %v4478_v8 = vsel %vm4456_vm15, %v4447_v16, 0.0 }
0x258c   :  { %4479 = vadd.xlane.f32.xlu1 %v4478_v8  ;;  %v4445_v3 = vpop.permute.xlu1 %4444 }
0x258d   :  { %v4475_v22 = vsel %vm4456_vm15, %v4445_v3, 0.0 }
0x258e   :  { %4476 = vadd.xlane.f32.xlu0 %v4475_v22 }
0x260b   :  { %v4459_v49 = vpop.xlane.xlu1 %4458 }
0x260c   :  { %6643 = vrcp.f32 %v4459_v49 }
0x260d   :  { %v4462_v9 = vpop.xlane.xlu0 %4461 }
0x260e   :  { %6645 = vrcp.f32 %v4462_v9 }
0x260f   :  { %v4468_v4 = vpop.xlane.xlu1 %4467 }
0x2610   :  { %6647 = vrcp.f32 %v4468_v4 }
0x2611   :  { %v4465_v30 = vpop.xlane.xlu0 %4464 }
0x2612   :  { %6649 = vrcp.f32 %v4465_v30 }
0x2613   :  { %v4474_v51 = vpop.xlane.xlu1 %4473 }
0x2614   :  { %6651 = vrcp.f32 %v4474_v51 }
0x2615   :  { %v4471_v52 = vpop.xlane.xlu0 %4470 }
0x2616   :  { %v6644_v54 = vpop.eup %6643  ;;  %6653 = vrcp.f32 %v4471_v52 }
0x2617   :  { %v8915_v15 = vmul.f32 %v6644_v54, %v8877_v14 }
0x2618   :  { %v6646_v10 = vpop.eup %6645 }
0x2619   :  { %v4480_v48 = vpop.xlane.xlu1 %4479  ;;  %v4497_v28 = vmul.f32 %v8915_v15, %v8915_v15  ;;  %v8919_v46 = vmul.f32 %v6646_v10, %v6630_v12 }
0x261a   :  { %v6648_v61 = vpop.eup %6647  ;;  %6655 = vrcp.f32 %v4480_v48 }
0x261b   :  { %v4477_v17 = vpop.xlane.xlu0 %4476  ;;  %4513 = vrot.lane.b32.xlu0 %v4497_v28, %s7414_s2  ;;  %v4498_v50 = vmul.f32 %v8919_v46, %v8919_v46  ;;  %v8925_v18 = vmul.f32 %v6648_v61, %v8882_v63 }
0x261c   :  { %v6650_v14 = vpop.eup %6649  ;;  %6657 = vrcp.f32 %v4477_v17 }
0x261d   :  { %4515 = vrot.lane.b32.xlu1 %v4498_v50, %s7414_s2  ;;  %v4500_v16 = vmul.f32 %v8925_v18, %v8925_v18  ;;  %v4491_v12 = vmul.f32 %v6650_v14, %v8886_v6 }
0x261e   :  { %v6652_v8 = vpop.eup %6651 }
0x261f   :  { %4519 = vrot.lane.b32.xlu0 %v4500_v16, %s7414_s2  ;;  %v4499_v3 = vmul.f32 %v4491_v12, %v4491_v12  ;;  %v8933_v22 = vmul.f32 %v6652_v8, %v8890_v25 }
0x2620   :  { %v6654_v49 = vpop.eup %6653 }
0x2621   :  { %4517 = vrot.lane.b32.xlu1 %v4499_v3, %s7414_s2  ;;  %v4502_v63 = vmul.f32 %v8933_v22, %v8933_v22  ;;  %v8939_v9 = vmul.f32 %v6654_v49, %v8894_v56 }
0x2623   :  { %4523 = vrot.lane.b32.xlu0 %v4502_v63, %s7414_s2  ;;  %v4501_v6 = vmul.f32 %v8939_v9, %v8939_v9 }
0x2624   :  { %v6656_v4 = vpop.eup %6655 }
0x2625   :  { %4521 = vrot.lane.b32.xlu1 %v4501_v6, %s7414_s2  ;;  %v8946_v25 = vmul.f32 %v6656_v4, %v8898_v11  ;;  %v7415_v4 = vmov 2  }
0x2626   :  { %v6658_v30 = vpop.eup %6657  ;;  %6378 = vset.pattern.permute.xlu0 %v7415_v4 }
0x2627   :  { %v4504_v51 = vmul.f32 %v8946_v25, %v8946_v25  ;;  %v8951_v52 = vmul.f32 %v6658_v30, %v8902_v1  ;;  %v7416_v30 = vmov 5  }
0x2628   :  { %6376 = vset.pattern.permute.xlu1 %v7416_v30 }
0x2629   :  { %4527 = vrot.lane.b32.xlu0 %v4504_v51, %s7414_s2  ;;  %v4503_v56 = vmul.f32 %v8951_v52, %v8951_v52 }
0x262b   :  { %4525 = vrot.lane.b32.xlu1 %v4503_v56, %s7414_s2 }
0x268d   :  { %v4514_v54 = vpop.permute.xlu0 %4513 }
0x268e   :  { %v4537_v10 = vsel %vm4456_vm15, %v4514_v54, 0.0 }
0x268f   :  { %4538 = vadd.xlane.f32.xlu1 %v4537_v10  ;;  %v4516_v11 = vpop.permute.xlu1 %4515 }
0x2690   :  { %v4540_v48 = vsel %vm4456_vm15, %v4516_v11, 0.0 }
0x2691   :  { %v4520_v28 = vpop.permute.xlu0 %4519  ;;  %4541 = vadd.xlane.f32.xlu0 %v4540_v48 }
0x2692   :  { %v4546_v61 = vsel %vm4456_vm15, %v4520_v28, 0.0 }
0x2693   :  { %4547 = vadd.xlane.f32.xlu1 %v4546_v61  ;;  %v4518_v1 = vpop.permute.xlu1 %4517 }
0x2694   :  { %v4543_v17 = vsel %vm4456_vm15, %v4518_v1, 0.0 }
0x2695   :  { %4544 = vadd.xlane.f32.xlu0 %v4543_v17  ;;  %v4524_v50 = vpop.permute.xlu0 %4523  ;;  %v7417_v17 = vmov 6  }
0x2696   :  { %v4552_v6 = vsel %vm4456_vm15, %v4524_v50, 0.0 }
0x2697   :  { %v4522_v14 = vpop.permute.xlu1 %4521 }
0x2698   :  { %v4549_v16 = vsel %vm4456_vm15, %v4522_v14, 0.0 }
0x2699   :  { %4550 = vadd.xlane.f32.xlu0 %v4549_v16 }
0x269b   :  { %v4528_v8 = vpop.permute.xlu0 %4527 }
0x269c   :  { %v4558_v3 = vsel %vm4456_vm15, %v4528_v8, 0.0 }
0x269d   :  { %4559 = vadd.xlane.f32.xlu1 %v4558_v3  ;;  %v4526_v49 = vpop.permute.xlu1 %4525  ;;  %v7419_v3 = vmov 4  }
0x269e   :  { %v4555_v63 = vsel %vm4456_vm15, %v4526_v49, 0.0 }
0x269f   :  { %4556 = vadd.xlane.f32.xlu0 %v4555_v63 }
0x26a1   :  { %4553 = vadd.xlane.f32.xlu1 %v4552_v6 }
0x271c   :  { %v4539_v54 = vpop.xlane.xlu1 %4538 }
0x271e   :  { %v4542_v51 = vpop.xlane.xlu0 %4541 }
0x2720   :  { %v4548_v61 = vpop.xlane.xlu1 %4547 }
0x2722   :  { %v4545_v56 = vpop.xlane.xlu0 %4544 }
0x2723   :  { %6659 = vrsqrt.f32 %v4545_v56 }
0x2724   :  { %6661 = vrsqrt.f32 %v4539_v54 }
0x2726   :  { %v4551_v11 = vpop.xlane.xlu0 %4550 }
0x2727   :  { %6663 = vrsqrt.f32 %v4551_v11 }
0x272a   :  { %v4560_v50 = vpop.xlane.xlu1 %4559 }
0x272b   :  { %6665 = vrsqrt.f32 %v4560_v50 }
0x272c   :  { %6667 = vrsqrt.f32 %v4548_v61  ;;  %v4557_v16 = vpop.xlane.xlu0 %4556 }
0x272d   :  { %v6660_v10 = vpop.eup %6659  ;;  %6669 = vrsqrt.f32 %v4557_v16 }
0x272e   :  { %v8967_v48 = vmul.f32 %v6660_v10, %v4491_v12  ;;  %v6662_v28 = vpop.eup %6661  ;;  %v7418_v12 = vmov 3   ;;  %6671 = vrsqrt.f32 %v4542_v51  ;;  %v4554_v56 = vpop.xlane.xlu1 %4553 }
0x272f   :  { %v4569_v1 = vmul.f32 %v6662_v28, %v8915_v15  ;;  %6673 = vrsqrt.f32 %v4554_v56 }
0x2730   :  { %4730 = vperm.xlu1 %6376, %v8967_v48   ;;  %4589 = vperm.xlu0 %6378, %v8967_v48  }
0x2731   :  { %v6664_v14 = vpop.eup %6663 }
0x2732   :  { %v8979_v15 = vmul.f32 %v6664_v14, %v8939_v9 }
0x2734   :  { %6377 = vset.pattern.permute.xlu1 %v7417_v17  ;;  %6380 = vset.pattern.permute.xlu0 %v7416_v30 }
0x2735   :  { %4810 = vperm.xlu1 %6377, %v8967_v48   ;;  %4722 = vperm.xlu0 %6380, %v4569_v1   ;;  %v6666_v8 = vpop.eup %6665 }
0x2736   :  { %v4576_v9 = vmul.f32 %v6666_v8, %v8946_v25  ;;  %v6668_v49 = vpop.eup %6667 }
0x2737   :  { %v4572_v63 = vmul.f32 %v6668_v49, %v8925_v18  ;;  %v6670_v6 = vpop.eup %6669 }
0x2738   :  { %v4575_v25 = vmul.f32 %v6670_v6, %v8951_v52  ;;  %v6672_v54 = vpop.eup %6671 }
0x2739   :  { %6379 = vset.pattern.permute.xlu1 %v7418_v12  ;;  %6382 = vset.pattern.permute.xlu0 %v7415_v4  ;;  %v4570_v18 = vmul.f32 %v6672_v54, %v8919_v46  ;;  %v6674_v52 = vpop.eup %6673 }
0x273a   :  { %4634 = vperm.xlu1 %6379, %v8967_v48   ;;  %4579 = vperm.xlu0 %6382, %v4569_v1   ;;  %v4574_v51 = vmul.f32 %v6674_v52, %v8933_v22 }
0x273e   :  { %6381 = vset.pattern.permute.xlu1 %v7417_v17  ;;  %6394 = vset.pattern.permute.xlu0 %v7416_v30 }
0x273f   :  { %4802 = vperm.xlu1 %6381, %v4569_v1   ;;  %4738 = vperm.xlu0 %6394, %v8979_v15  }
0x2743   :  { %6383 = vset.pattern.permute.xlu1 %v7418_v12  ;;  %6395 = vset.pattern.permute.xlu0 %v7417_v17 }
0x2744   :  { %4626 = vperm.xlu1 %6383, %v4569_v1   ;;  %4818 = vperm.xlu0 %6395, %v8979_v15  }
0x2748   :  { %6384 = vset.pattern.permute.xlu1 %v7419_v3  ;;  %6396 = vset.pattern.permute.xlu0 %v7416_v30 }
0x2749   :  { %4674 = vperm.xlu1 %6384, %v4569_v1   ;;  %4750 = vperm.xlu0 %6396, %v4576_v9  }
0x274d   :  { %6385 = vset.pattern.permute.xlu1 %v7416_v30  ;;  %6400 = vset.pattern.permute.xlu0 %v7415_v4 }
0x274e   :  { %4734 = vperm.xlu1 %6385, %v4572_v63   ;;  %4599 = vperm.xlu0 %6400, %v8979_v15  }
0x2752   :  { %6386 = vset.pattern.permute.xlu1 %v7417_v17  ;;  %4609 = vperm.xlu0 %6400, %v4575_v25  }
0x2753   :  { %4814 = vperm.xlu1 %6386, %v4572_v63  }
0x2756   :  { %6405 = vset.pattern.permute.xlu0 %v7419_v3 }
0x2757   :  { %6387 = vset.pattern.permute.xlu1 %v7415_v4  ;;  %4698 = vperm.xlu0 %6405, %v4575_v25  }
0x2758   :  { %4594 = vperm.xlu1 %6387, %v4572_v63  }
0x275b   :  { %6406 = vset.pattern.permute.xlu0 %v7418_v12 }
0x275c   :  { %6388 = vset.pattern.permute.xlu1 %v7416_v30  ;;  %4630 = vperm.xlu0 %6406, %v4570_v18  }
0x275d   :  { %4726 = vperm.xlu1 %6388, %v4570_v18  }
0x2760   :  { %4638 = vperm.xlu0 %6406, %v4572_v63  }
0x2761   :  { %6389 = vset.pattern.permute.xlu1 %v7417_v17 }
0x2762   :  { %4806 = vperm.xlu1 %6389, %v4570_v18  }
0x2764   :  { %4654 = vperm.xlu0 %6406, %v4576_v9  }
0x2766   :  { %6390 = vset.pattern.permute.xlu1 %v7415_v4 }
0x2767   :  { %4584 = vperm.xlu1 %6390, %v4570_v18  }
0x2768   :  { %4646 = vperm.xlu0 %6406, %v4574_v51  }
0x276b   :  { %6391 = vset.pattern.permute.xlu1 %v7419_v3 }
0x276c   :  { %4678 = vperm.xlu1 %6391, %v4570_v18   ;;  %6410 = vset.pattern.permute.xlu0 %v7417_v17 }
0x2770   :  { %6392 = vset.pattern.permute.xlu1 %v7416_v30 }
0x2771   :  { %4746 = vperm.xlu1 %6392, %v4575_v25  }
0x2775   :  { %6393 = vset.pattern.permute.xlu1 %v7417_v17 }
0x2776   :  { %4826 = vperm.xlu1 %6393, %v4575_v25  }
0x277a   :  { %4830 = vperm.xlu1 %6393, %v4576_v9  }
0x277e   :  { %6397 = vset.pattern.permute.xlu1 %v7416_v30 }
0x277f   :  { %4742 = vperm.xlu1 %6397, %v4574_v51  }
0x2783   :  { %6398 = vset.pattern.permute.xlu1 %v7417_v17 }
0x2784   :  { %4822 = vperm.xlu1 %6398, %v4574_v51  }
0x2788   :  { %6399 = vset.pattern.permute.xlu1 %v7419_v3 }
0x2789   :  { %4682 = vperm.xlu1 %6399, %v8967_v48  }
0x278d   :  { %4686 = vperm.xlu1 %6399, %v4572_v63  }
0x2791   :  { %6401 = vset.pattern.permute.xlu1 %v7418_v12 }
0x2792   :  { %4642 = vperm.xlu1 %6401, %v8979_v15  }
0x2796   :  { %6402 = vset.pattern.permute.xlu1 %v7419_v3 }
0x2797   :  { %4690 = vperm.xlu1 %6402, %v8979_v15  }
0x279b   :  { %6403 = vset.pattern.permute.xlu1 %v7415_v4 }
0x279c   :  { %4614 = vperm.xlu1 %6403, %v4576_v9  }
0x27a0   :  { %6404 = vset.pattern.permute.xlu1 %v7418_v12 }
0x27a1   :  { %4650 = vperm.xlu1 %6404, %v4575_v25  }
0x27a5   :  { %6407 = vset.pattern.permute.xlu1 %v7419_v3 }
0x27a6   :  { %4702 = vperm.xlu1 %6407, %v4576_v9  }
0x27aa   :  { %6408 = vset.pattern.permute.xlu1 %v7415_v4 }
0x27ab   :  { %4604 = vperm.xlu1 %6408, %v4574_v51  }
0x27af   :  { %v4590_v46 = vpop.permute.xlu0 %4589  ;;  %6409 = vset.pattern.permute.xlu1 %v7419_v3  ;;  %v4731_v22 = vpop.permute.xlu1 %4730 }
0x27b0   :  { %v4619_v30 = vmul.f32 %v8190_v55, %v4590_v46  ;;  %4694 = vperm.xlu1 %6409, %v4574_v51   ;;  %v4755_v10 = vmul.f32 %v8799_v39, %v4731_v22 }
0x27b4   :  { %v4723_v11 = vpop.permute.xlu0 %4722  ;;  %4773 = vrot.lane.b32.xlu1 %v4755_v10, %s7413_s30  ;;  %v4811_v48 = vpop.permute.xlu1 %4810 }
0x27b5   :  { %v4835_v28 = vmul.f32 %v9488_v47, %v4811_v48  ;;  %v4753_v1 = vmul.f32 %v4723_v11, %v8803_v35  ;;  %v9511_v11 = vld [vmem:[#allocation79_spill] sm:$0xff] }
0x27b8   :  { %4853 = vrot.lane.b32.xlu1 %v4835_v28, %s7412_s17 }
0x27b9   :  { %v4580_v61 = vpop.permute.xlu0 %4579  ;;  %v4635_v4 = vpop.permute.xlu1 %4634 }
0x27ba   :  { %v4617_v17 = vmul.f32 %v4580_v61, %v8194_v58  ;;  %v4659_v50 = vmul.f32 %v8380_v44, %v4635_v4 }
0x27bc   :  { %v9029_v55 = vadd.f32 %v4659_v50, %v4619_v30  ;;  %4769 = vrot.lane.b32.xlu1 %v4753_v1, %s7413_s30 }
0x27be   :  { %v4739_v39 = vpop.permute.xlu0 %4738  ;;  %v4803_v12 = vpop.permute.xlu1 %4802 }
0x27bf   :  { %v4833_v14 = vmul.f32 %v4803_v12, %v9485_v38 }
0x27c1   :  { %4849 = vrot.lane.b32.xlu1 %v4833_v14, %s7412_s17 }
0x27c3   :  { %v4819_v47 = vpop.permute.xlu0 %4818  ;;  %v4627_v15 = vpop.permute.xlu1 %4626 }
0x27c4   :  { %v4657_v16 = vmul.f32 %v4627_v15, %v8387_v24 }
0x27c6   :  { %v4665_v8 = vadd.f32 %v4657_v16, %v4617_v17 }
0x27c8   :  { %v4751_v35 = vpop.permute.xlu0 %4750  ;;  %v4675_v9 = vpop.permute.xlu1 %4674 }
0x27c9   :  { %v4705_v58 = vmul.f32 %v4675_v9, %v8593_v21 }
0x27cb   :  { %v9036_v44 = vadd.f32 %v4705_v58, %v4665_v8  ;;  %v9512_v8 = vld [vmem:[#allocation83_spill] sm:$0xff] }
0x27cd   :  { %v4600_v3 = vpop.permute.xlu0 %4599  ;;  %v4735_v49 = vpop.permute.xlu1 %4734 }
0x27ce   :  { %v4621_v63 = vmul.f32 %v4600_v3, %v8208_v53  ;;  %v4756_v6 = vmul.f32 %v8805_v40, %v4735_v49 }
0x27d0   :  { %4775 = vrot.lane.b32.xlu0 %v4756_v6, %s7413_s30  ;;  %v9513_v6 = vld [vmem:[#allocation84_spill] sm:$0xff] }
0x27d1   :  { %v4610_v38 = vpop.permute.xlu0 %4609 }
0x27d2   :  { %v9042_v25 = vmul.f32 %v8206_v2, %v4610_v38  ;;  %v4815_v24 = vpop.permute.xlu1 %4814  ;;  %v9514_v38 = vld [vmem:[#allocation80_spill] sm:$0xff] }
0x27d3   :  { %v4836_v56 = vmul.f32 %v9486_v5, %v4815_v24 }
0x27d5   :  { %4855 = vrot.lane.b32.xlu0 %v4836_v56, %s7412_s17 }
0x27d6   :  { %v4699_v21 = vpop.permute.xlu0 %4698 }
0x27d7   :  { %v4711_v54 = vmul.f32 %v8614_v7, %v4699_v21  ;;  %v4595_v18 = vpop.permute.xlu1 %4594  ;;  %v4760_v7 = vmul.f32 %v8821_v29, %v4751_v35  ;;  %v4757_v29 = vmul.f32 %v4739_v39, %v8819_v45  ;;  %v9515_v21 = vld [vmem:[#allocation82_spill] sm:$0xff] }
0x27d8   :  { %v4620_v52 = vmul.f32 %v8198_v43, %v4595_v18 }
0x27db   :  { %v4631_v53 = vpop.permute.xlu0 %4630 }
0x27dc   :  { %v4727_v51 = vpop.permute.xlu1 %4726  ;;  %v4658_v43 = vmul.f32 %v4631_v53, %v8399_v36  ;;  %v4837_v36 = vmul.f32 %v4819_v47, %v9502_v31 }
0x27dd   :  { %v4754_v40 = vmul.f32 %v4727_v51, %v8809_v26 }
0x27df   :  { %v4639_v46 = vpop.permute.xlu0 %4638  ;;  %4771 = vrot.lane.b32.xlu1 %v4754_v40, %s7413_s30 }
0x27e0   :  { %v4660_v2 = vmul.f32 %v8393_v62, %v4639_v46  ;;  %v9516_v46 = vld [vmem:[#allocation85_spill] sm:$0xff] }
0x27e1   :  { %v4807_v22 = vpop.permute.xlu1 %4806 }
0x27e2   :  { %v4668_v30 = vadd.f32 %v4660_v2, %v4620_v52  ;;  %v4834_v5 = vmul.f32 %v4807_v22, %v9487_v59  ;;  %v9517_v22 = vld [vmem:[#allocation81_spill] sm:$0xff] }
0x27e3   :  { %v4655_v3 = vpop.permute.xlu0 %4654 }
0x27e4   :  { %4851 = vrot.lane.b32.xlu0 %v4834_v5, %s7412_s17 }
0x27e6   :  { %v4585_v10 = vpop.permute.xlu1 %4584 }
0x27e7   :  { %v4618_v48 = vmul.f32 %v4585_v10, %v9511_v11  ;;  %v4647_v51 = vpop.permute.xlu0 %4646 }
0x27e8   :  { %4783 = vrot.lane.b32.xlu0 %v4760_v7, %s7413_s30  ;;  %v4662_v2 = vmul.f32 %v4647_v51, %v9516_v46  ;;  %v9522_v51 = vld [vmem:[#allocation69_spill] sm:$0xff] }
0x27e9   :  { %v4666_v26 = vadd.f32 %v4658_v43, %v4618_v48 }
0x27eb   :  { %v4679_v28 = vpop.permute.xlu1 %4678 }
0x27ec   :  { %v4706_v61 = vmul.f32 %v4679_v28, %v8605_v41 }
0x27ee   :  { %v9058_v62 = vadd.f32 %v4706_v61, %v4666_v26 }
0x27f0   :  { %v4747_v4 = vpop.permute.xlu1 %4746 }
0x27f1   :  { %v4759_v59 = vmul.f32 %v8815_v32, %v4747_v4 }
0x27f3   :  { %4781 = vrot.lane.b32.xlu1 %v4759_v59, %s7413_s30 }
0x27f5   :  { %v4827_v1 = vpop.permute.xlu1 %4826 }
0x27f6   :  { %v4839_v50 = vmul.f32 %v9508_v0, %v4827_v1 }
0x27f7   :  { %4777 = vrot.lane.b32.xlu1 %v4757_v29, %s7413_s30 }
0x27f9   :  { %v4831_v17 = vpop.permute.xlu1 %4830 }
0x27fa   :  { %v4840_v39 = vmul.f32 %v9506_v33, %v4831_v17 }
0x27fb   :  { %4857 = vrot.lane.b32.xlu1 %v4837_v36, %s7412_s17 }
0x27fe   :  { %v4743_v41 = vpop.permute.xlu1 %4742 }
0x27ff   :  { %v4758_v12 = vmul.f32 %v4743_v41, %v8825_v23  ;;  %4861 = vrot.lane.b32.xlu1 %v4839_v50, %s7412_s17 }
0x2801   :  { %4779 = vrot.lane.b32.xlu0 %v4758_v12, %s7413_s30 }
0x2803   :  { %v4823_v32 = vpop.permute.xlu1 %4822 }
0x2804   :  { %v4838_v45 = vmul.f32 %v4823_v32, %v9501_v42 }
0x2806   :  { %4859 = vrot.lane.b32.xlu0 %v4838_v45, %s7412_s17 }
0x2808   :  { %v4683_v31 = vpop.permute.xlu1 %4682 }
0x2809   :  { %v4707_v14 = vmul.f32 %v8586_v19, %v4683_v31  ;;  %v4664_v19 = vmul.f32 %v9513_v6, %v4655_v3 }
0x280a   :  { %4863 = vrot.lane.b32.xlu0 %v4840_v39, %s7412_s17 }
0x280b   :  { %v4715_v0 = vadd.f32 %v4707_v14, %v9029_v55 }
0x280c   :  { %v4687_v47 = vpop.permute.xlu1 %4686 }
0x280d   :  { %v4708_v23 = vmul.f32 %v8599_v13, %v4687_v47 }
0x280f   :  { %v4716_v15 = vadd.f32 %v4708_v23, %v4668_v30 }
0x2811   :  { %v4643_v16 = vpop.permute.xlu1 %4642 }
0x2812   :  { %v4661_v35 = vmul.f32 %v4643_v16, %v9512_v8 }
0x2814   :  { %v4669_v9 = vadd.f32 %v4661_v35, %v4621_v63 }
0x2816   :  { %v4691_v42 = vpop.permute.xlu1 %4690 }
0x2817   :  { %v4709_v58 = vmul.f32 %v4691_v42, %v8620_v37 }
0x2819   :  { %v4717_v33 = vadd.f32 %v4709_v58, %v4669_v9 }
0x281b   :  { %v4615_v49 = vpop.permute.xlu1 %4614 }
0x281c   :  { %v4624_v24 = vmul.f32 %v9514_v38, %v4615_v49  ;;  %v5066_v49 = vmul.f32 %v9496_v34, %v9496_v34 }
0x281e   :  { %v4672_v56 = vadd.f32 %v4664_v19, %v4624_v24  ;;  %v5076_v6 = vsel %vm1324_vm2, %v5066_v49, 0.0  ;;  %v5067_v19 = vmul.f32 %v9497_v60, %v9497_v60  ;;  %v9518_v24 = vld [vmem:[#allocation65_spill] sm:$0xff] }
0x2820   :  { %v4651_v55 = vpop.permute.xlu1 %4650 }
0x2821   :  { %v4663_v18 = vmul.f32 %v9515_v21, %v4651_v55  ;;  %v5079_v55 = vsel %vm1324_vm2, %v5067_v19, 0.0  ;;  %v9519_v21 = vld [vmem:[#allocation68_spill] sm:$0xff] }
0x2822   :  { %v5069_v34 = vmul.f32 %v9519_v21, %v9519_v21 }
0x2823   :  { %v4671_v13 = vadd.f32 %v4663_v18, %v9042_v25  ;;  %v9520_v18 = vld [vmem:[#allocation70_spill] sm:$0xff] }
0x2824   :  { %v5085_v60 = vsel %vm1324_vm2, %v5069_v34, 0.0 }
0x2825   :  { %v4703_v52 = vpop.permute.xlu1 %4702  ;;  %v4719_v53 = vadd.f32 %v4711_v54, %v4671_v13  ;;  %v5070_v13 = vmul.f32 %v9520_v18, %v9520_v18 }
0x2826   :  { %v4712_v63 = vmul.f32 %v8626_v57, %v4703_v52  ;;  %v9521_v52 = vld [vmem:[#allocation67_spill] sm:$0xff] }
0x2828   :  { %v4720_v40 = vadd.f32 %v4712_v63, %v4672_v56  ;;  %v5068_v56 = vmul.f32 %v9518_v24, %v9518_v24  ;;  %v5088_v63 = vsel %vm1324_vm2, %v5070_v13, 0.0 }
0x282a   :  { %v4605_v37 = vpop.permute.xlu1 %4604 }
0x282b   :  { %v4622_v30 = vmul.f32 %v4605_v37, %v9517_v22 }
0x282d   :  { %v4670_v5 = vadd.f32 %v4662_v2, %v4622_v30 }
0x282f   :  { %v4695_v7 = vpop.permute.xlu1 %4694 }
0x2830   :  { %v4710_v10 = vmul.f32 %v4695_v7, %v8632_v20  ;;  %v9523_v7 = vld [vmem:[#allocation72_spill] sm:$0xff] }
0x2832   :  { %v4718_v43 = vadd.f32 %v4710_v10, %v4670_v5  ;;  %v6747_v10 = vld [vmem:[#allocation7 + $0x8] sm:$0xff]  }
0x2833   :  { %v4774_v11 = vpop.permute.xlu1 %4773 }
0x2834   :  { %v4795_v25 = vadd.f32 %v4774_v11, %v4715_v0  ;;  %v6749_v11 = vld [vmem:[#allocation7 + $0x18] sm:$0xff]  }
0x2837   :  { %v4854_v48 = vpop.permute.xlu1 %4853 }
0x2838   :  { %v4875_v61 = vadd.f32 %v4854_v48, %v4795_v25  ;;  %v9524_v48 = vld [vmem:[#allocation73_spill] sm:$0xff] }
0x283b   :  { %v4770_v57 = vpop.permute.xlu1 %4769 }
0x283c   :  { %v4793_v36 = vadd.f32 %v4770_v57, %v9036_v44 }
0x283f   :  { %v4850_v29 = vpop.permute.xlu1 %4849 }
0x2840   :  { %v4873_v50 = vadd.f32 %v4850_v29, %v4793_v36 }
0x2842   :  { %v4776_v26 = vpop.permute.xlu0 %4775 }
0x2843   :  { %v4796_v28 = vadd.f32 %v4776_v26, %v4716_v15  ;;  %v5102_v26 = vrot.slane %v9524_v48, 4 }
0x2845   :  { %v5103_v25 = vadd.f32 %v5102_v26, %v9524_v48 }
0x2847   :  { %v4856_v54 = vpop.permute.xlu0 %4855 }
0x2848   :  { %v4876_v4 = vadd.f32 %v4856_v54, %v4796_v28  ;;  %v5104_v28 = vrot.slane %v5103_v25, 2 }
0x284a   :  { %v4882_v59 = vpack.c.bf16 %v4876_v4, %v4875_v61  ;;  %v5105_v54 = vadd.f32 %v5104_v28, %v5103_v25 }
0x284c   :  { %4891 = vrot.lane.b32.xlu0 %v4882_v59, %s7420_s28  ;;  %v5106_v61 = vrot.slane %v5105_v54, 1  ;;  %v9525_v59 = vld [vmem:[#allocation74_spill] sm:$0xff] }
0x284d   :  { %v5246_v29 = vmul.f32 2.0, %v9525_v59 }
0x284e   :  { %v9124_v57 = vadd.f32 %v5106_v61, %v5105_v54 }
0x2851   :  { %v4772_v1 = vpop.permute.xlu1 %4771 }
0x2852   :  { %v4794_v17 = vadd.f32 %v4772_v1, %v9058_v62 }
0x2856   :  { %v4852_v20 = vpop.permute.xlu0 %4851 }
0x2857   :  { %v4874_v41 = vadd.f32 %v4852_v20, %v4794_v17  ;;  %v9526_v17 = vld [vmem:[#allocation71_spill] sm:$0xff] }
0x2858   :  { %v5245_v20 = vmul.f32 2.0, %v9526_v17 }
0x2859   :  { %v4881_v12 = vpack.c.bf16 %v4874_v41, %v4873_v50 }
0x285a   :  { %v4784_v39 = vpop.permute.xlu0 %4783 }
0x285b   :  { %4889 = vrot.lane.b32.xlu1 %v4881_v12, %s7420_s28  ;;  %v4800_v35 = vadd.f32 %v4784_v39, %v4720_v40  ;;  %v5072_v40 = vmul.f32 %v9522_v51, %v9522_v51 }
0x285d   :  { %v5094_v46 = vsel %vm1324_vm2, %v5072_v40, 0.0 }
0x2865   :  { %v4782_v32 = vpop.permute.xlu1 %4781 }
0x2866   :  { %v4799_v44 = vadd.f32 %v4782_v32, %v4719_v53  ;;  %v5071_v53 = vmul.f32 %v9521_v52, %v9521_v52 }
0x2868   :  { %v5091_v37 = vsel %vm1324_vm2, %v5071_v53, 0.0 }
0x2869   :  { %v4778_v45 = vpop.permute.xlu1 %4777 }
0x286a   :  { %v4797_v0 = vadd.f32 %v4778_v45, %v4717_v33  ;;  %v5065_v33 = vmul.f32 %v9495_v27, %v9495_v27  ;;  %v5082_v27 = vsel %vm1324_vm2, %v5068_v56, 0.0  ;;  %v9527_v45 = vld [vmem:[#allocation62_spill] sm:$0xff] }
0x286b   :  { %v5247_v39 = vmul.f32 2.0, %v9527_v45 }
0x286c   :  { %v5073_v38 = vsel %vm1324_vm2, %v5065_v33, 0.0 }
0x286d   :  { %v4858_v14 = vpop.permute.xlu1 %4857 }
0x286e   :  { %v4877_v15 = vadd.f32 %v4858_v14, %v4797_v0  ;;  %v9528_v0 = vld [vmem:[#allocation59_spill] sm:$0xff] }
0x2871   :  { %v4862_v8 = vpop.permute.xlu1 %4861 }
0x2872   :  { %v4879_v42 = vadd.f32 %v4862_v8, %v4799_v44 }
0x2873   :  { %v4780_v31 = vpop.permute.xlu0 %4779 }
0x2874   :  { %v4798_v47 = vadd.f32 %v4780_v31, %v4718_v43  ;;  %v6748_v43 = vld [vmem:[#allocation7 + $0x10] sm:$0xff]  }
0x2878   :  { %v4860_v23 = vpop.permute.xlu0 %4859 }
0x2879   :  { %v4878_v16 = vadd.f32 %v4860_v23, %v4798_v47  ;;  %v5248_v47 = vmul.f32 2.0, %v9528_v0 }
0x287b   :  { %v4883_v9 = vpack.c.bf16 %v4878_v16, %v4877_v15 }
0x287c   :  { %v4864_v62 = vpop.permute.xlu0 %4863 }
0x287d   :  { %v4880_v58 = vadd.f32 %v4864_v62, %v4800_v35  ;;  %4893 = vrot.lane.b32.xlu1 %v4883_v9, %s7420_s28  ;;  %v9529_v35 = vld [vmem:[#allocation61_spill] sm:$0xff] }
0x287e   :  { %v5249_v44 = vmul.f32 2.0, %v9529_v35 }
0x287f   :  { %v4884_v3 = vpack.c.bf16 %v4880_v58, %v4879_v42  ;;  %v9530_v42 = vld [vmem:[#allocation60_spill] sm:$0xff] }
0x2880   :  { %v5250_v58 = vmul.f32 2.0, %v9530_v42 }
0x2881   :  { %4895 = vrot.lane.b32.xlu0 %v4884_v3, %s7420_s28 }
0x28a0   :  { %5077 = vadd.xlane.f32.xlu0 %v5076_v6 }
0x28a1   :  { %5074 = vadd.xlane.f32.xlu1 %v5073_v38 }
0x28a4   :  { %5080 = vadd.xlane.f32.xlu0 %v5079_v55 }
0x28a5   :  { %5083 = vadd.xlane.f32.xlu1 %v5082_v27 }
0x28a8   :  { %5086 = vadd.xlane.f32.xlu0 %v5085_v60 }
0x28a9   :  { %5089 = vadd.xlane.f32.xlu1 %v5088_v63 }
0x28ac   :  { %5092 = vadd.xlane.f32.xlu0 %v5091_v37 }
0x28ad   :  { %5095 = vadd.xlane.f32.xlu1 %v5094_v46 }
0x28be   :  { %v4892_v22 = vpop.permute.xlu0 %4891 }
0x28cd   :  { %v4890_v2 = vpop.permute.xlu1 %4889 }
0x28ce   :  { %6250 = vmatprep.subr.bf16.mxu1 %v4890_v2 }
0x28cf   :  { %6251 = vmatpush3.bf16.msra.mxu1 %v4890_v2 }
0x28d0   :  { %6252 = vmatprep.subr.bf16.mxu1 %v4892_v22 }
0x28d3   :  { %6253 = vmatpush3.bf16.msra.mxu1 %v4892_v22 }
0x28ef   :  { %v4894_v30 = vpop.permute.xlu1 %4893 }
0x28f0   :  { %6254 = vmatprep.subr.bf16.mxu1 %v4894_v30 }
0x28f1   :  { %6255 = vmatpush3.bf16.msra.mxu1 %v4894_v30 }
0x28f3   :  { %v4896_v5 = vpop.permute.xlu0 %4895 }
0x28f4   :  { %6256 = vmatprep.subr.bf16.mxu1 %v4896_v5 }
0x28f5   :  { %6257 = vmatpush3.bf16.msra.mxu1 %v4896_v5 }
0x28f6   :  { %6286 = vmatprep.subr.bf16.mxu1 %v9523_v7 }
0x28f8   :  { %6259 = vmatmul.mubr.msk.bf16.vlgmr.msra.gmra.mrb[112].mxu1 %vm551_vm1, %v6747_v10 }
0x28f9   :  { %6262 = vmatprep.mubr.msk.bf16.mxu1 %vm551_vm1, %v6748_v43  ;;  %6287 = vmatpush3.bf16.msra.mxu1 %v9523_v7 }
0x2900   :  { %6263 = vmatmul.mubr.msk.bf16.gmra.mrb[116].mxu1 %vm551_vm1, %v6749_v11 }
0x2901   :  { %6279 = vmatprep.mubr.msk.f32.mxu1 %vm1324_vm2, %v9521_v52 }
0x2908   :  { %6280 = vmatmul.mubr.msk.f32.vlgmr.msra.gmra.mrb[120].mxu1 %vm1324_vm2, %v9522_v51 }
0x292d   :  { %v5078_v4 = vpop.xlane.xlu0 %5077 }
0x292e   :  { %v5109_v1 = vadd.f32 %v9124_v57, %v5078_v4  ;;  %v5075_v36 = vpop.xlane.xlu1 %5074 }
0x292f   :  { %v5108_v50 = vadd.f32 %v9124_v57, %v5075_v36 }
0x2930   :  { %v5254_v41 = vsub.f32 %v5109_v1, %v5246_v29 }
0x2931   :  { %v5253_v12 = vsub.f32 %v5108_v50, %v5245_v20  ;;  %v5081_v32 = vpop.xlane.xlu0 %5080 }
0x2932   :  { %v5110_v31 = vadd.f32 %v9124_v57, %v5081_v32  ;;  %v5084_v14 = vpop.xlane.xlu1 %5083  ;;  %v5262_v19 = vmax.f32 %v5254_v41, 0.0 }
0x2933   :  { %v5111_v23 = vadd.f32 %v9124_v57, %v5084_v14  ;;  %v5261_v6 = vmax.f32 %v5253_v12, 0.0 }
0x2934   :  { %v5255_v15 = vsub.f32 %v5110_v31, %v5247_v39  ;;  %v5270_v27 = vadd.f32 1.0, %v5262_v19 }
0x2935   :  { %v5256_v16 = vsub.f32 %v5111_v23, %v5248_v47  ;;  %v5087_v8 = vpop.xlane.xlu0 %5086  ;;  %v5269_v24 = vadd.f32 1.0, %v5261_v6 }
0x2936   :  { %v5112_v9 = vadd.f32 %v9124_v57, %v5087_v8  ;;  %v5090_v62 = vpop.xlane.xlu1 %5089  ;;  %v5263_v56 = vmax.f32 %v5255_v15, 0.0 }
0x2937   :  { %v5113_v3 = vadd.f32 %v9124_v57, %v5090_v62  ;;  %v5264_v18 = vmax.f32 %v5256_v16, 0.0  ;;  %6675 = vrcp.f32 %v5269_v24 }
0x2938   :  { %v5257_v49 = vsub.f32 %v5112_v9, %v5249_v44  ;;  %v5271_v52 = vadd.f32 1.0, %v5263_v56  ;;  %6677 = vrcp.f32 %v5270_v27 }
0x2939   :  { %v5258_v33 = vsub.f32 %v5113_v3, %v5250_v58  ;;  %v5272_v51 = vadd.f32 1.0, %v5264_v18  ;;  %v5093_v25 = vpop.xlane.xlu0 %5092 }
0x293a   :  { %v5265_v53 = vmax.f32 %v5257_v49, 0.0  ;;  %6679 = vrcp.f32 %v5271_v52  ;;  %v5096_v11 = vpop.xlane.xlu1 %5095  ;;  %v5114_v1 = vadd.f32 %v9124_v57, %v5093_v25 }
0x293b   :  { %v5266_v40 = vmax.f32 %v5258_v33, 0.0  ;;  %6681 = vrcp.f32 %v5272_v51  ;;  %v5115_v4 = vadd.f32 %v9124_v57, %v5096_v11 }
0x293c   :  { %v5273_v2 = vadd.f32 1.0, %v5265_v53 }
0x293d   :  { %v5274_v7 = vadd.f32 1.0, %v5266_v40 }
0x293e   :  { %6683 = vrcp.f32 %v5273_v2 }
0x293f   :  { %6685 = vrcp.f32 %v5274_v7 }
0x2941   :  { %v9168_v26 = vpop.eup %6675 }
0x2942   :  { %v9172_v61 = vpop.eup %6677  ;;  %v5293_v17 = vsel %vm4966_vm0, %v9168_v26, 0.0 }
0x2943   :  { %v5296_v12 = vsel %vm4966_vm0, %v9172_v61, 0.0 }
0x2944   :  { %v9178_v20 = vpop.eup %6679 }
0x2945   :  { %v9182_v32 = vpop.eup %6681  ;;  %v5299_v57 = vsel %vm4966_vm0, %v9178_v20, 0.0 }
0x2946   :  { %v5302_v47 = vsel %vm4966_vm0, %v9182_v32, 0.0 }
0x2948   :  { %v9186_v31 = vpop.eup %6683 }
0x2949   :  { %v9190_v23 = vpop.eup %6685  ;;  %v5305_v15 = vsel %vm4966_vm0, %v9186_v31, 0.0 }
0x294a   :  { %v5308_v16 = vsel %vm4966_vm0, %v9190_v23, 0.0 }
0x29cb   :  { %v9138_v38 = vpop.f32.mrb[112].mxu1 }
0x29cc   :  { %v9140_v55 = vpop.f32.mrb[113].mxu1  ;;  %v4973_v21 = vsel %vm4966_vm0, %v9138_v38, -inf }
0x29cd   :  { %4974 = vmax.xlane.f32.xlu0 %v4973_v21  ;;  %v9144_v34 = vpop.f32.mrb[114].mxu1  ;;  %v4967_v63 = vsel %vm4966_vm0, %v9140_v55, -inf }
0x29ce   :  { %v9146_v13 = vpop.f32.mrb[115].mxu1  ;;  %v4976_v60 = vsel %vm4966_vm0, %v9144_v34, -inf }
0x29cf   :  { %4977 = vmax.xlane.f32.xlu1 %v4976_v60  ;;  %v4970_v37 = vsel %vm4966_vm0, %v9146_v13, -inf }
0x29d1   :  { %4968 = vmax.xlane.f32.xlu0 %v4967_v63 }
0x29d3   :  { %4971 = vmax.xlane.f32.xlu1 %v4970_v37  ;;  %v9154_v46 = vpop.f32.mrb[116].mxu1 }
0x29d4   :  { %v9156_v22 = vpop.f32.mrb[117].mxu1  ;;  %v4985_v48 = vsel %vm4966_vm0, %v9154_v46, -inf }
0x29d5   :  { %v9158_v30 = vpop.f32.mrb[118].mxu1  ;;  %v4979_v5 = vsel %vm4966_vm0, %v9156_v22, -inf }
0x29d6   :  { %4980 = vmax.xlane.f32.xlu0 %v4979_v5  ;;  %v9162_v10 = vpop.f32.mrb[119].mxu1  ;;  %v4988_v54 = vsel %vm4966_vm0, %v9158_v30, -inf }
0x29d7   :  { %v4982_v43 = vsel %vm4966_vm0, %v9162_v10, -inf }
0x29d8   :  { %4983 = vmax.xlane.f32.xlu1 %v4982_v43 }
0x29da   :  { %4986 = vmax.xlane.f32.xlu0 %v4985_v48 }
0x29db   :  { %v6281_v28 = vpop.f32.mrb[120].mxu1 }
0x29dc   :  { %v5252_v59 = vmul.f32 2.0, %v6281_v28  ;;  %v5236_v29 = vpop.f32.mrb[121].mxu1  ;;  %4989 = vmax.xlane.f32.xlu1 %v4988_v54 }
0x29dd   :  { %v5251_v36 = vmul.f32 2.0, %v5236_v29 }
0x29de   :  { %v5260_v50 = vsub.f32 %v5115_v4, %v5252_v59  ;;  %5294 = vadd.xlane.f32.xlu0 %v5293_v17 }
0x29df   :  { %v5259_v41 = vsub.f32 %v5114_v1, %v5251_v36 }
0x29e0   :  { %v5268_v45 = vmax.f32 %v5260_v50, 0.0  ;;  %5297 = vadd.xlane.f32.xlu1 %v5296_v12 }
0x29e1   :  { %v5267_v39 = vmax.f32 %v5259_v41, 0.0 }
0x29e2   :  { %v5276_v14 = vadd.f32 1.0, %v5268_v45  ;;  %5300 = vadd.xlane.f32.xlu0 %v5299_v57 }
0x29e3   :  { %v5275_v0 = vadd.f32 1.0, %v5267_v39 }
0x29e4   :  { %6687 = vrcp.f32 %v5276_v14  ;;  %5303 = vadd.xlane.f32.xlu1 %v5302_v47 }
0x29e5   :  { %6689 = vrcp.f32 %v5275_v0 }
0x29e6   :  { %5306 = vadd.xlane.f32.xlu0 %v5305_v15 }
0x29e8   :  { %5309 = vadd.xlane.f32.xlu1 %v5308_v16 }
0x29ee   :  { %v9196_v8 = vpop.eup %6687 }
0x29ef   :  { %v9198_v35 = vpop.eup %6689  ;;  %v5314_v44 = vsel %vm4966_vm0, %v9196_v8, 0.0 }
0x29f0   :  { %5315 = vadd.xlane.f32.xlu1 %v5314_v44  ;;  %v5311_v9 = vsel %vm4966_vm0, %v9198_v35, 0.0 }
0x29f1   :  { %5312 = vadd.xlane.f32.xlu0 %v5311_v9 }
0x2a5a   :  { %v4975_v62 = vpop.xlane.xlu0 %4974 }
0x2a5b   :  { %v4993_v42 = vsub.f32 %v9138_v38, %v4975_v62 }
0x2a5c   :  { %v4978_v58 = vpop.xlane.xlu1 %4977 }
0x2a5d   :  { %v5003_v3 = vmul.f32 1.442695, %v4993_v42  ;;  %v4994_v49 = vsub.f32 %v9144_v34, %v4978_v58 }
0x2a5e   :  { %v4969_v33 = vpop.xlane.xlu0 %4968 }
0x2a5f   :  { %6691 = vpow2.f32 %v5003_v3  ;;  %v5005_v6 = vmul.f32 1.442695, %v4994_v49  ;;  %v4991_v19 = vsub.f32 %v9140_v55, %v4969_v33 }
0x2a60   :  { %v4972_v24 = vpop.xlane.xlu1 %4971 }
0x2a61   :  { %6693 = vpow2.f32 %v5005_v6  ;;  %v4999_v56 = vmul.f32 1.442695, %v4991_v19  ;;  %v4992_v21 = vsub.f32 %v9146_v13, %v4972_v24 }
0x2a63   :  { %6695 = vpow2.f32 %v4999_v56  ;;  %v5001_v27 = vmul.f32 1.442695, %v4992_v21  ;;  %v4981_v18 = vpop.xlane.xlu0 %4980 }
0x2a64   :  { %v4995_v60 = vsub.f32 %v9156_v22, %v4981_v18 }
0x2a65   :  { %6697 = vpow2.f32 %v5001_v27  ;;  %v4984_v38 = vpop.xlane.xlu1 %4983 }
0x2a66   :  { %v5007_v52 = vmul.f32 1.442695, %v4995_v60  ;;  %v4996_v34 = vsub.f32 %v9162_v10, %v4984_v38 }
0x2a67   :  { %v4987_v53 = vpop.xlane.xlu0 %4986 }
0x2a68   :  { %6699 = vpow2.f32 %v5007_v52  ;;  %v5009_v63 = vmul.f32 1.442695, %v4996_v34  ;;  %v4997_v55 = vsub.f32 %v9154_v46, %v4987_v53 }
0x2a69   :  { %v9211_v51 = vpop.eup %6691  ;;  %v4990_v40 = vpop.xlane.xlu1 %4989 }
0x2a6a   :  { %6701 = vpow2.f32 %v5009_v63  ;;  %v5011_v13 = vmul.f32 1.442695, %v4997_v55  ;;  %v4998_v37 = vsub.f32 %v9158_v30, %v4990_v40  ;;  %v5021_v2 = vsel %vm4966_vm0, %v9211_v51, 0.0 }
0x2a6b   :  { %v9216_v22 = vpop.eup %6693  ;;  %5022 = vadd.xlane.f32.xlu0 %v5021_v2  ;;  %v5295_v5 = vpop.xlane.xlu0 %5294 }
0x2a6c   :  { %6703 = vpow2.f32 %v5011_v13  ;;  %v5013_v7 = vmul.f32 1.442695, %v4998_v37  ;;  %v5024_v10 = vsel %vm4966_vm0, %v9216_v22, 0.0 }
0x2a6d   :  { %v9220_v46 = vpop.eup %6695  ;;  %6705 = vrcp.f32 %v5295_v5  ;;  %5025 = vadd.xlane.f32.xlu1 %v5024_v10  ;;  %v5298_v43 = vpop.xlane.xlu1 %5297 }
0x2a6e   :  { %6707 = vpow2.f32 %v5013_v7  ;;  %v5015_v30 = vsel %vm4966_vm0, %v9220_v46, 0.0 }
0x2a6f   :  { %v9224_v11 = vpop.eup %6697  ;;  %6709 = vrcp.f32 %v5298_v43  ;;  %5016 = vadd.xlane.f32.xlu0 %v5015_v30  ;;  %v5301_v48 = vpop.xlane.xlu0 %5300 }
0x2a70   :  { %6711 = vrcp.f32 %v5301_v48  ;;  %v5018_v25 = vsel %vm4966_vm0, %v9224_v11, 0.0 }
0x2a71   :  { %5019 = vadd.xlane.f32.xlu1 %v5018_v25  ;;  %v5304_v28 = vpop.xlane.xlu1 %5303 }
0x2a72   :  { %v9228_v54 = vpop.eup %6699  ;;  %6713 = vrcp.f32 %v5304_v28 }
0x2a73   :  { %v5307_v4 = vpop.xlane.xlu0 %5306  ;;  %v5027_v59 = vsel %vm4966_vm0, %v9228_v54, 0.0 }
0x2a74   :  { %v9232_v29 = vpop.eup %6701  ;;  %6715 = vrcp.f32 %v5307_v4  ;;  %5028 = vadd.xlane.f32.xlu0 %v5027_v59 }
0x2a75   :  { %v5310_v1 = vpop.xlane.xlu1 %5309  ;;  %v5030_v36 = vsel %vm4966_vm0, %v9232_v29, 0.0 }
0x2a76   :  { %v9236_v17 = vpop.eup %6703  ;;  %6717 = vrcp.f32 %v5310_v1  ;;  %5031 = vadd.xlane.f32.xlu1 %v5030_v36 }
0x2a77   :  { %v6706_v50 = vpop.eup %6705  ;;  %v5033_v41 = vsel %vm4966_vm0, %v9236_v17, 0.0 }
0x2a78   :  { %v9240_v12 = vpop.eup %6707  ;;  %v5318_v45 = vmul.f32 %v6706_v50, %v9168_v26  ;;  %5034 = vadd.xlane.f32.xlu0 %v5033_v41 }
0x2a79   :  { %v6710_v39 = vpop.eup %6709  ;;  %v5036_v57 = vsel %vm4966_vm0, %v9240_v12, 0.0 }
0x2a7a   :  { %v6712_v14 = vpop.eup %6711  ;;  %5333 = vst.msk [vmem:[#allocation39] sm:$0xff] %vm4966_vm0, %v5318_v45  ;;  %v5320_v0 = vmul.f32 %v6710_v39, %v9172_v61  ;;  %5037 = vadd.xlane.f32.xlu1 %v5036_v57 }
0x2a7b   :  { %v5322_v47 = vmul.f32 %v6712_v14, %v9178_v20 }
0x2a7c   :  { %v6714_v15 = vpop.eup %6713  ;;  %5334 = vst.msk [vmem:[#allocation39 + $0x8] sm:$0xff] %vm4966_vm0, %v5320_v0 }
0x2a7d   :  { %5335 = vst.msk [vmem:[#allocation39 + $0x10] sm:$0xff] %vm4966_vm0, %v5322_v47  ;;  %v5324_v26 = vmul.f32 %v6714_v15, %v9182_v32  ;;  %v5316_v16 = vpop.xlane.xlu1 %5315 }
0x2a7e   :  { %v6716_v44 = vpop.eup %6715  ;;  %6719 = vrcp.f32 %v5316_v16  ;;  %v5313_v9 = vpop.xlane.xlu0 %5312 }
0x2a7f   :  { %5336 = vst.msk [vmem:[#allocation39 + $0x18] sm:$0xff] %vm4966_vm0, %v5324_v26  ;;  %v5326_v62 = vmul.f32 %v6716_v44, %v9186_v31  ;;  %6721 = vrcp.f32 %v5313_v9 }
0x2a80   :  { %v6718_v61 = vpop.eup %6717 }
0x2a81   :  { %5337 = vst.msk [vmem:[#allocation39 + $0x20] sm:$0xff] %vm4966_vm0, %v5326_v62  ;;  %v5328_v20 = vmul.f32 %v6718_v61, %v9190_v23 }
0x2a83   :  { %5338 = vst.msk [vmem:[#allocation39 + $0x28] sm:$0xff] %vm4966_vm0, %v5328_v20 }
0x2a88   :  { %v6720_v42 = vpop.eup %6719 }
0x2a89   :  { %v6722_v58 = vpop.eup %6721  ;;  %v5332_v32 = vmul.f32 %v6720_v42, %v9196_v8 }
0x2a8a   :  { %v5330_v3 = vmul.f32 %v6722_v58, %v9198_v35 }
0x2a8b   :  { %5340 = vst.msk [vmem:[#allocation39 + $0x38] sm:$0xff] %vm4966_vm0, %v5332_v32 }
0x2a8c   :  { %5339 = vst.msk [vmem:[#allocation39 + $0x30] sm:$0xff] %vm4966_vm0, %v5330_v3 }
0x2a8d   :  { %7267 = shalt.err (!%p7264_p6)
}
0x2a8e   :  { %s7268_s4 = scalar_lea.hbm %s9360_s24, 1024 }
0x2a8f   :  { %p7269_p7 = scmp.ne.s32.totalorder %s9360_s24, %s7268_s4  ;;  %p7272_p8 = scmp.lt.u32.totalorder %s7268_s4, %s9360_s24 }
0x2a91   :  { %p7274_p9 = pnand %p7272_p8, %p7269_p7 }
0x2a93   :  { %7277 = shalt.err (!%p7274_p9)
}
0x2a94   :  { %5372 = dma.vmem_to_hbm [thread:$0]  %s5367_s21, 1024, %s9360_s24, [#allocation40], %s9452_s15, %s9452_s15, %s9451_s27  }
0x2a95   :  { %s7278_s11 = scalar_lea.vmem %s5355_s1, 1024  ;;  %p7283_p11 = scmp.lt.s32.totalorder %s5355_s1, %s5355_s1 }
0x2a96   :  { %p7279_p10 = scmp.ne.s32.totalorder %s5355_s1, %s7278_s11  ;;  %p7284_p12 = scmp.lt.s32.totalorder %s7278_s11, %s7278_s11 }
0x2a98   :  { %p7285_p13 = por %p7284_p12, %p7283_p11 }
0x2a9a   :  { %p7286_p0 = pnand %p7285_p13, %p7279_p10 }
0x2a9c   :  { %7289 = shalt.err (!%p7286_p0)
}
0x2a9d   :  { %s9531_s26 = sld [smem:[#allocation97_spill]] }
0x2aa3   :  { %s7290_s20 = scalar_lea.hbm %s9531_s26, 1024 }
0x2aa4   :  { %p7291_p1 = scmp.ne.s32.totalorder %s9531_s26, %s7290_s20  ;;  %p7294_p2 = scmp.lt.u32.totalorder %s7290_s20, %s9531_s26 }
0x2aa6   :  { %p7296_p3 = pnand %p7294_p2, %p7291_p1 }
0x2aa8   :  { %7299 = shalt.err (!%p7296_p3)
}
0x2aa9   :  { %5360 = dma.vmem_to_hbm [thread:$0]  %s5355_s1, 1024, %s9531_s26, [#allocation4], %s9452_s15, %s9452_s15, %s9451_s27  }
0x2aaa   :  { %s7423_s17 = smov [#allocation42]  }
0x2aab   :  { %s5390_s30 = sshll.u32 %s7423_s17, 4  ;;  %s5391_s30 = int_to_ptr.vmem [resolvable:$true] %s5390_s30 }
0x2aac   :  { %s7300_s2 = scalar_lea.vmem %s5391_s30, 1024  ;;  %p7305_p5 = scmp.lt.s32.totalorder %s5391_s30, %s5391_s30 }
0x2aad   :  { %p7301_p4 = scmp.ne.s32.totalorder %s5391_s30, %s7300_s2  ;;  %p7306_p6 = scmp.lt.s32.totalorder %s7300_s2, %s7300_s2 }
0x2aaf   :  { %p7307_p7 = por %p7306_p6, %p7305_p5 }
0x2ab1   :  { %p7308_p8 = pnand %p7307_p7, %p7301_p4 }
0x2ab3   :  { %7311 = shalt.err (!%p7308_p8)
}
0x2ab4   :  { %s9532_s21 = sld [smem:[#allocation99_spill]] }
0x2aba   :  { %s7312_s29 = scalar_lea.hbm %s9532_s21, 1024 }
0x2abb   :  { %p7313_p9 = scmp.ne.s32.totalorder %s9532_s21, %s7312_s29  ;;  %p7316_p10 = scmp.lt.u32.totalorder %s7312_s29, %s9532_s21 }
0x2abd   :  { %p7318_p11 = pnand %p7316_p10, %p7313_p9 }
0x2abf   :  { %7321 = shalt.err (!%p7318_p11)
}
0x2ac0   :  { %5396 = dma.vmem_to_hbm [thread:$0]  %s5391_s30, 1024, %s9532_s21, [#allocation43], %s9452_s15, %s9452_s15, %s9451_s27  }
0x2ac1   :  { %s7424_s0 = smov [#allocation41]  }
0x2ac2   :  { %s5378_s23 = sshll.u32 %s7424_s0, 4  ;;  %s5379_s23 = int_to_ptr.vmem [resolvable:$true] %s5378_s23 }
0x2ac3   :  { %s7322_s3 = scalar_lea.vmem %s5379_s23, 1024  ;;  %p7327_p13 = scmp.lt.s32.totalorder %s5379_s23, %s5379_s23 }
0x2ac4   :  { %p7323_p12 = scmp.ne.s32.totalorder %s5379_s23, %s7322_s3  ;;  %p7328_p0 = scmp.lt.s32.totalorder %s7322_s3, %s7322_s3 }
0x2ac6   :  { %p7329_p1 = por %p7328_p0, %p7327_p13 }
0x2ac8   :  { %p7330_p2 = pnand %p7329_p1, %p7323_p12 }
0x2af8   :  { %v5023_v31 = vpop.xlane.xlu0 %5022 }
0x2af9   :  { %6723 = vrcp.f32 %v5023_v31 }
0x2afa   :  { %v5026_v23 = vpop.xlane.xlu1 %5025 }
0x2afb   :  { %6725 = vrcp.f32 %v5026_v23 }
0x2afc   :  { %v5017_v8 = vpop.xlane.xlu0 %5016 }
0x2afd   :  { %6727 = vrcp.f32 %v5017_v8 }
0x2afe   :  { %v5020_v35 = vpop.xlane.xlu1 %5019 }
0x2aff   :  { %6729 = vrcp.f32 %v5020_v35 }
0x2b01   :  { %v5029_v49 = vpop.xlane.xlu0 %5028 }
0x2b02   :  { %6731 = vrcp.f32 %v5029_v49 }
0x2b03   :  { %v6724_v33 = vpop.eup %6723  ;;  %v5032_v6 = vpop.xlane.xlu1 %5031 }
0x2b04   :  { %v5044_v19 = vmul.f32 %v6724_v33, %v9211_v51  ;;  %6733 = vrcp.f32 %v5032_v6 }
0x2b05   :  { %v6726_v24 = vpop.eup %6725  ;;  %v5035_v56 = vpop.xlane.xlu0 %5034 }
0x2b06   :  { %5057 = vst.msk [vmem:[#allocation41 + $0x10] sm:$0xff] %vm4966_vm0, %v5044_v19  ;;  %v5046_v21 = vmul.f32 %v6726_v24, %v9216_v22  ;;  %6735 = vrcp.f32 %v5035_v56 }
0x2b07   :  { %v6728_v27 = vpop.eup %6727  ;;  %v5038_v18 = vpop.xlane.xlu1 %5037 }
0x2b08   :  { %5058 = vst.msk [vmem:[#allocation41 + $0x18] sm:$0xff] %vm4966_vm0, %v5046_v21  ;;  %v5040_v60 = vmul.f32 %v6728_v27, %v9220_v46  ;;  %6737 = vrcp.f32 %v5038_v18 }
0x2b09   :  { %v6730_v38 = vpop.eup %6729 }
0x2b0a   :  { %5055 = vst.msk [vmem:[#allocation41] sm:$0xff] %vm4966_vm0, %v5040_v60  ;;  %v5042_v52 = vmul.f32 %v6730_v38, %v9224_v11 }
0x2b0c   :  { %v6732_v34 = vpop.eup %6731  ;;  %5056 = vst.msk [vmem:[#allocation41 + $0x8] sm:$0xff] %vm4966_vm0, %v5042_v52 }
0x2b0d   :  { %v5048_v53 = vmul.f32 %v6732_v34, %v9228_v54 }
0x2b0e   :  { %v6734_v63 = vpop.eup %6733 }
0x2b0f   :  { %5059 = vst.msk [vmem:[#allocation41 + $0x20] sm:$0xff] %vm4966_vm0, %v5048_v53  ;;  %v5050_v55 = vmul.f32 %v6734_v63, %v9232_v29 }
0x2b10   :  { %v6736_v51 = vpop.eup %6735 }
0x2b11   :  { %5060 = vst.msk [vmem:[#allocation41 + $0x28] sm:$0xff] %vm4966_vm0, %v5050_v55  ;;  %v5052_v40 = vmul.f32 %v6736_v51, %v9236_v17 }
0x2b12   :  { %v6738_v13 = vpop.eup %6737 }
0x2b13   :  { %5061 = vst.msk [vmem:[#allocation41 + $0x30] sm:$0xff] %vm4966_vm0, %v5052_v40  ;;  %v5054_v37 = vmul.f32 %v6738_v13, %v9240_v12 }
0x2b15   :  { %5062 = vst.msk [vmem:[#allocation41 + $0x38] sm:$0xff] %vm4966_vm0, %v5054_v37 }
0x2b16   :  { %7333 = shalt.err (!%p7330_p2)
}
0x2b17   :  { %s9533_s11 = sld [smem:[#allocation98_spill]] }
0x2b1d   :  { %s7334_s12 = scalar_lea.hbm %s9533_s11, 1024 }
0x2b1e   :  { %p7335_p3 = scmp.ne.s32.totalorder %s9533_s11, %s7334_s12  ;;  %p7338_p4 = scmp.lt.u32.totalorder %s7334_s12, %s9533_s11 }
0x2b20   :  { %p7340_p5 = pnand %p7338_p4, %p7335_p3 }
0x2b22   :  { %7343 = shalt.err (!%p7340_p5)
}
0x2b23   :  { %5384 = dma.vmem_to_hbm [thread:$0]  %s5379_s23, 1024, %s9533_s11, [#allocation40], %s9452_s15, %s9452_s15, %s9451_s27  }
0x2b24   :  { %7368 = dma.done.wait [#allocation4], 1024  }
0x2b25   :  { %7369 = vsyncadd [#allocation4], 4294966272 }
0x2b26   :  { %7370 = dma.done.wait [#allocation40], 2048  }
0x2b27   :  { %7371 = vsyncadd [#allocation40], 4294965248 }
0x2b28   :  { %7372 = dma.done.wait [#allocation43], 1024  }
0x2b29   :  { %7373 = vsyncadd [#allocation43], 4294966272 }
0x2b2a   :  { %5409 = vsyncpa [#allocation3], 1 }
0x2b2b   :  { %5410 = vsyncpa [#allocation6], 1 }
0x2b2c   :  { %5411 = vsyncpa [#allocation9], 1 }
0x2b2d   :  { %5412 = vsyncpa [#allocation12], 1 }
0x2b2e   :  { %5413 = vsyncpa [#allocation15], 1 }
0x2b2f   :  { %5414 = vsyncpa [#allocation18], 1 }
0x2b30   :  { %5415 = vsyncpa [#allocation21], 1 }
0x2b31   :  { %5416 = vsyncpa [#allocation24], 1 }
0x2b32   :  { %5417 = vsyncpa [#allocation27], 1 }
0x2b33   :  { %5418 = vsyncpa [#allocation30], 1 }
0x2b34   :  { %5419 = vsyncpa [#allocation33], 1 }
0x2b35   :  { %5420 = vsyncpa [#allocation36], 1 }
0x2b36   :  { %5421 = vsyncpa [#allocation4], 1 }
0x2b37   :  { %5422 = vsyncpa [#allocation40], 1 }
0x2b38   :  { %5423 = vsyncpa [#allocation43], 1 }

</bundles_post_ra>
